<compile_context>
chip_gen: v7x
topology: tpu7x:2x2x1
jax: 0.10.0
libtpu: 0.0.40
codegen_flags: <defaults>
</compile_context>

<pallas_src>
import functools

import jax
import jax.numpy as jnp
from jax.experimental import pallas as pl
from jax.experimental.pallas import tpu as pltpu


# ----------------------------------------------------------------------------
# Fused kernel.
#   Grid axis 0 tiles HW (reduction, "arbitrary").
#   Per step:   y = relu( x_tile(B*T, C)@Wc(C, F) + bc )      (bf16 MXU, f32 elementwise)
#               acc(B, F) += y.reshape(B, T, F).sum(axis=1)   (sublane reduce, f32)
#   Last step:  feats = (acc - pad_correction) / HW
#               z = relu(feats @ Wl + bl);  out = BN_train(z)
# ----------------------------------------------------------------------------
def encoder_kernel(x_ref, wc_ref, bc_ref, wl_ref, bl_ref, gamma_ref, beta_ref,
                   o_ref, acc_ref, *, inv_hw, n_pad):
    t = pl.program_id(0)

    @pl.when(t == 0)
    def _init():
        acc_ref[...] = jnp.zeros_like(acc_ref)

    B, T, C = x_ref.shape
    Fd = acc_ref.shape[-1]

    # 1x1 conv over channels: bf16 operands on the MXU, f32 accumulation.
    x2 = x_ref[...].reshape(B * T, C)                                # bf16 (B*T, C)
    y = jnp.dot(x2, wc_ref[...], preferred_element_type=jnp.float32)  # f32 (B*T, F)
    y = jnp.maximum(y + bc_ref[...], 0.0)                            # f32 elementwise

    # Global average pool (partial): per-batch sublane reduction over the HW tile.
    # F stays on the lane axis -> no relayout; MXU stays free for the matmuls.
    acc_ref[...] += y.reshape(B, T, Fd).sum(axis=1)                  # f32 (B, F)

    @pl.when(t == pl.num_programs(0) - 1)
    def _head():
        eps = 1e-5
        acc = acc_ref[...]                                           # f32 (B, F)
        if n_pad > 0:
            # Zero-padded spatial rows each contributed exactly relu(b_conv);
            # remove them in f32 before scaling.
            acc = acc - float(n_pad) * jnp.maximum(bc_ref[...], 0.0)
        feats = acc * inv_hw                                         # f32 avg pool

        # self.linear + F.relu  (bf16 MXU operands, f32 accumulation / elementwise)
        z = jnp.dot(feats.astype(jnp.bfloat16), wl_ref[...],
                    preferred_element_type=jnp.float32)
        z = jnp.maximum(z + bl_ref[...], 0.0)                        # f32 (B, E)

        # self.bn (training mode: batch mean, biased variance, eps=1e-5), all f32.
        mean = jnp.mean(z, axis=0, keepdims=True)
        var = jnp.mean((z - mean) ** 2, axis=0, keepdims=True)
        inv = jax.lax.rsqrt(var + eps)
        o_ref[...] = gamma_ref[...] * (z - mean) * inv + beta_ref[...]


# ----------------------------------------------------------------------------
# Tiling: largest multiple-of-8 HW tile whose per-step working set fits the budget.
# Budget terms that dominate:
#   * x tile: C is lane-padded to 128 (32x the raw data at C=4), bf16, double-buffered.
#   * the (B*tile, F) f32 ReLU intermediate (counted twice for reshape/relayout slack).
# ----------------------------------------------------------------------------
def _choose_tile_hw(B, C, F, HW, budget_bytes):
    lane_c = -(-max(C, 1) // 128) * 128

    def footprint(t):
        x_bytes = 2 * B * t * lane_c * 2        # bf16 x tile, 2 pipeline buffers
        y_bytes = 2 * B * t * F * 4             # f32 intermediate + slack
        return x_bytes + y_bytes

    cap = -(-HW // 8) * 8                       # covers HW after padding
    best = 8
    t = 8
    while t <= cap:
        if footprint(t) <= budget_bytes:
            best = t
        t *= 2
    if footprint(cap) <= budget_bytes:          # grid of cdiv(HW, cap) == 1 step
        best = cap
    return best


# ----------------------------------------------------------------------------
# Wrapper
# ----------------------------------------------------------------------------
def encoder_cnn_forward(images, params, *, tile_hw=None, vmem_budget_bytes=16 << 20):
    """images: (B, C, H, W) float32 NCHW -> (B, embed_size) float32."""
    B, C, H, W = images.shape
    HW = H * W

    # bf16 only for MXU operands; biases / BN params stay f32.
    w_conv = params["w_conv"].astype(jnp.bfloat16)    # (C, F)
    b_conv = params["b_conv"].astype(jnp.float32)     # (1, F)
    w_lin = params["w_lin"].astype(jnp.bfloat16)      # (F, E)
    b_lin = params["b_lin"].astype(jnp.float32)       # (1, E)
    gamma = params["gamma"].astype(jnp.float32)       # (1, E)
    beta = params["beta"].astype(jnp.float32)         # (1, E)
    F_feat = w_conv.shape[1]
    E = w_lin.shape[1]

    if tile_hw is None:
        tile_hw = _choose_tile_hw(B, C, F_feat, HW, vmem_budget_bytes)
    tile_hw = max(8, (tile_hw // 8) * 8)

    n_tiles = pl.cdiv(HW, tile_hw)
    hw_pad = n_tiles * tile_hw
    n_pad = hw_pad - HW

    # Layout plumbing (plain JAX): NCHW -> (B, HW, C) so F rides the lane axis
    # in every in-kernel intermediate; zero-pad HW to a multiple of tile_hw.
    x = jnp.transpose(images, (0, 2, 3, 1)).reshape(B, HW, C).astype(jnp.bfloat16)
    if n_pad:
        x = jnp.pad(x, ((0, 0), (0, n_pad), (0, 0)))

    kernel = functools.partial(encoder_kernel,
                               inv_hw=1.0 / float(HW), n_pad=int(n_pad))

    const = lambda t: (0, 0)
    once = pl.Buffered(1)   # grid-invariant operands: single VMEM buffer

    return pl.pallas_call(
        kernel,
        out_shape=jax.ShapeDtypeStruct((B, E), jnp.float32),
        grid=(n_tiles,),
        in_specs=[
            pl.BlockSpec((B, tile_hw, C), lambda t: (0, t, 0)),                  # x tile
            pl.BlockSpec((C, F_feat), const, pipeline_mode=once),                # w_conv
            pl.BlockSpec((1, F_feat), const, pipeline_mode=once),                # b_conv
            pl.BlockSpec((F_feat, E), const, pipeline_mode=once),                # w_lin
            pl.BlockSpec((1, E), const, pipeline_mode=once),                     # b_lin
            pl.BlockSpec((1, E), const, pipeline_mode=once),                     # gamma
            pl.BlockSpec((1, E), const, pipeline_mode=once),                     # beta
        ],
        out_specs=pl.BlockSpec((B, E), const),
        scratch_shapes=[pltpu.VMEM((B, F_feat), jnp.float32)],   # pooled-feature acc
        compiler_params=pltpu.CompilerParams(
            dimension_semantics=("arbitrary",),          # HW reduction axis
            vmem_limit_bytes=32 * 1024 * 1024,           # fits v5e/v6e/v7x scoped VMEM
        ),
    )(x, w_conv, b_conv, w_lin, b_lin, gamma, beta)


def encoder_cnn_reference(images, params):
    """Pure-JAX reference of the same stand-in forward pass (mirrors the bf16
    MXU-operand casts with f32 accumulation / elementwise)."""
    B, C, H, W = images.shape
    x = jnp.transpose(images, (0, 2, 3, 1)).reshape(B, H * W, C).astype(jnp.bfloat16)
    wc = params["w_conv"].astype(jnp.bfloat16)
    y = jnp.einsum("bpc,cf->bpf", x, wc, preferred_element_type=jnp.float32)
    y = jnp.maximum(y + params["b_conv"], 0.0)
    feats = jnp.mean(y, axis=1)                                      # (B, F) f32
    z = jnp.dot(feats.astype(jnp.bfloat16), params["w_lin"].astype(jnp.bfloat16),
                preferred_element_type=jnp.float32)
    z = jnp.maximum(z + params["b_lin"], 0.0)
    mean = jnp.mean(z, axis=0, keepdims=True)
    var = jnp.mean((z - mean) ** 2, axis=0, keepdims=True)
    return params["gamma"] * (z - mean) * jax.lax.rsqrt(var + 1e-5) + params["beta"]


def init_params(key, in_channels, feat_dim, embed_size):
    """Deterministic synthetic parameters (shapes follow the module's __init__)."""
    k1, k2, k3, k4 = jax.random.split(key, 4)
    return {
        # backbone stand-in (plays the role of the frozen resnet feature extractor)
        "w_conv": jax.random.normal(k1, (in_channels, feat_dim), jnp.float32) * 0.1,
        "b_conv": jax.random.normal(k2, (1, feat_dim), jnp.float32) * 0.1,
        # self.linear = nn.Linear(resnet.fc.in_features, embed_size)
        "w_lin": jax.random.normal(k3, (feat_dim, embed_size), jnp.float32) * 0.1,
        "b_lin": jax.random.normal(k4, (1, embed_size), jnp.float32) * 0.1,
        # self.bn = nn.BatchNorm1d(embed_size, momentum=0.01): gamma=1, beta=0
        "gamma": jnp.ones((1, embed_size), jnp.float32),
        "beta": jnp.zeros((1, embed_size), jnp.float32),
    }


if __name__ == "__main__":
    # Small but layout-friendly shapes: batch fills sublanes (8), feature dims are
    # lane-dense (multiples of 128), spatial 16x16 -> HW=256 fits a single grid step.
    B, C, H, W = 8, 4, 16, 16
    FEAT_DIM = 256      # synthetic resnet.fc.in_features
    EMBED_SIZE = 128

    key = jax.random.PRNGKey(0)
    k_img, k_par = jax.random.split(key)
    images = jax.random.normal(k_img, (B, C, H, W), jnp.float32)
    params = init_params(k_par, C, FEAT_DIM, EMBED_SIZE)

    out = encoder_cnn_forward(images, params)
    out = jax.block_until_ready(out)

    ref = encoder_cnn_reference(images, params)

    assert out.shape == (B, EMBED_SIZE), out.shape
    assert bool(jnp.all(jnp.isfinite(out)))
    assert bool(jnp.allclose(out, ref, atol=2e-3, rtol=2e-3)), float(
        jnp.max(jnp.abs(out - ref)))
    print("KERNEL_OK")
</pallas_src>

<mosaic_0001>
module attributes {stable_mosaic.version = 11 : i64} {
  func.func @encoder_kernel(%arg0: i32, %arg1: memref<8x256x4xbf16, #tpu.memory_space<vmem>>, %arg2: memref<4x256xbf16, #tpu.memory_space<vmem>>, %arg3: memref<1x256xf32, #tpu.memory_space<vmem>>, %arg4: memref<256x128xbf16, #tpu.memory_space<vmem>>, %arg5: memref<1x128xf32, #tpu.memory_space<vmem>>, %arg6: memref<1x128xf32, #tpu.memory_space<vmem>>, %arg7: memref<1x128xf32, #tpu.memory_space<vmem>>, %arg8: memref<8x128xf32, #tpu.memory_space<vmem>>, %arg9: memref<8x256xf32, #tpu.memory_space<vmem>>) attributes {dimension_semantics = [#tpu.dimension_semantics<arbitrary>], iteration_bounds = array<i64: 1>, scalar_prefetch = 0 : i64, scratch_operands = 1 : i64, tpu.core_type = #tpu.core_type<tc>, window_params = [{transform_indices = @transform_0, window_bounds = array<i64: 8, 256, 4>}, {pipeline_mode = #tpu.pipeline_mode<synchronous>, transform_indices = @transform_1, window_bounds = array<i64: 4, 256>}, {pipeline_mode = #tpu.pipeline_mode<synchronous>, transform_indices = @transform_2, window_bounds = array<i64: 1, 256>}, {pipeline_mode = #tpu.pipeline_mode<synchronous>, transform_indices = @transform_3, window_bounds = array<i64: 256, 128>}, {pipeline_mode = #tpu.pipeline_mode<synchronous>, transform_indices = @transform_4, window_bounds = array<i64: 1, 128>}, {pipeline_mode = #tpu.pipeline_mode<synchronous>, transform_indices = @transform_5, window_bounds = array<i64: 1, 128>}, {pipeline_mode = #tpu.pipeline_mode<synchronous>, transform_indices = @transform_6, window_bounds = array<i64: 1, 128>}, {pipeline_mode = #tpu.pipeline_mode<synchronous>, transform_indices = @transform_7, window_bounds = array<i64: 8, 128>}]} {
    %c0_i32 = arith.constant 0 : i32
    %0 = arith.cmpi eq, %arg0, %c0_i32 : i32
    %1 = arith.extui %0 : i1 to i32
    %c0_i32_0 = arith.constant 0 : i32
    %2 = arith.cmpi ne, %1, %c0_i32_0 : i32
    scf.if %2 {
      %cst_15 = arith.constant 0.000000e+00 : f32
      %20 = vector.broadcast %cst_15 : f32 to vector<8x256xf32>
      %c0_16 = arith.constant 0 : index
      %c0_17 = arith.constant 0 : index
      %21 = vector.load %arg9[%c0_16, %c0_17] : memref<8x256xf32, #tpu.memory_space<vmem>>, vector<8x256xf32>
      tpu.vector_store %arg9[%c0_16, %c0_17], %20 {strides = array<i32>} : memref<8x256xf32, #tpu.memory_space<vmem>>, vector<8x256xf32>,
    } else {
    }
    %c0 = arith.constant 0 : index
    %c0_1 = arith.constant 0 : index
    %c0_2 = arith.constant 0 : index
    %3 = vector.load %arg1[%c0, %c0_1, %c0_2] : memref<8x256x4xbf16, #tpu.memory_space<vmem>>, vector<8x256x4xbf16>
    %4 = vector.shape_cast %3 : vector<8x256x4xbf16> to vector<2048x4xbf16>
    %c0_3 = arith.constant 0 : index
    %c0_4 = arith.constant 0 : index
    %5 = vector.load %arg2[%c0_3, %c0_4] : memref<4x256xbf16, #tpu.memory_space<vmem>>, vector<4x256xbf16>
    %cst = arith.constant dense<0.000000e+00> : vector<2048x256xf32>
    %6 = tpu.matmul %4, %5, %cst {dimension_numbers = #tpu.dot_dimension_numbers<[1], [0], [0], [1], [0, 0, 1, 1], [], []>} : vector<2048x4xbf16>, vector<4x256xbf16>, vector<2048x256xf32> -> vector<2048x256xf32>
    %c0_5 = arith.constant 0 : index
    %c0_6 = arith.constant 0 : index
    %7 = vector.load %arg3[%c0_5, %c0_6] : memref<1x256xf32, #tpu.memory_space<vmem>>, vector<1x256xf32>
    %8 = vector.broadcast %7 : vector<1x256xf32> to vector<2048x256xf32>
    %9 = arith.addf %6, %8 : vector<2048x256xf32>
    %cst_7 = arith.constant 0.000000e+00 : f32
    %10 = vector.broadcast %cst_7 : f32 to vector<2048x256xf32>
    %11 = arith.maximumf %9, %10 : vector<2048x256xf32>
    %c0_8 = arith.constant 0 : index
    %c0_9 = arith.constant 0 : index
    %12 = vector.load %arg9[%c0_8, %c0_9] : memref<8x256xf32, #tpu.memory_space<vmem>>, vector<8x256xf32>
    %13 = vector.shape_cast %11 : vector<2048x256xf32> to vector<8x256x256xf32>
    %cst_10 = arith.constant dense<0.000000e+00> : vector<8x256xf32>
    %14 = vector.multi_reduction <add>, %13, %cst_10 [1] : vector<8x256x256xf32> to vector<8x256xf32>
    %15 = arith.addf %12, %14 : vector<8x256xf32>
    %c0_11 = arith.constant 0 : index
    %c0_12 = arith.constant 0 : index
    %16 = vector.load %arg9[%c0_11, %c0_12] : memref<8x256xf32, #tpu.memory_space<vmem>>, vector<8x256xf32>
    tpu.vector_store %arg9[%c0_11, %c0_12], %15 {strides = array<i32>} : memref<8x256xf32, #tpu.memory_space<vmem>>, vector<8x256xf32>,
    %c0_i32_13 = arith.constant 0 : i32
    %17 = arith.cmpi eq, %arg0, %c0_i32_13 : i32
    %18 = arith.extui %17 : i1 to i32
    %c0_i32_14 = arith.constant 0 : i32
    %19 = arith.cmpi ne, %18, %c0_i32_14 : i32
    scf.if %19 {
      %c0_15 = arith.constant 0 : index
      %c0_16 = arith.constant 0 : index
      %20 = vector.load %arg9[%c0_15, %c0_16] : memref<8x256xf32, #tpu.memory_space<vmem>>, vector<8x256xf32>
      %cst_17 = arith.constant 3.906250e-03 : f32
      %21 = vector.broadcast %cst_17 : f32 to vector<8x256xf32>
      %22 = arith.mulf %20, %21 : vector<8x256xf32>
      %23 = arith.truncf %22 : vector<8x256xf32> to vector<8x256xbf16>
      %c0_18 = arith.constant 0 : index
      %c0_19 = arith.constant 0 : index
      %24 = vector.load %arg4[%c0_18, %c0_19] : memref<256x128xbf16, #tpu.memory_space<vmem>>, vector<256x128xbf16>
      %cst_20 = arith.constant dense<0.000000e+00> : vector<8x128xf32>
      %25 = tpu.matmul %23, %24, %cst_20 {dimension_numbers = #tpu.dot_dimension_numbers<[1], [0], [0], [1], [0, 0, 1, 1], [], []>} : vector<8x256xbf16>, vector<256x128xbf16>, vector<8x128xf32> -> vector<8x128xf32>
      %c0_21 = arith.constant 0 : index
      %c0_22 = arith.constant 0 : index
      %26 = vector.load %arg5[%c0_21, %c0_22] : memref<1x128xf32, #tpu.memory_space<vmem>>, vector<1x128xf32>
      %27 = vector.broadcast %26 : vector<1x128xf32> to vector<8x128xf32>
      %28 = arith.addf %25, %27 : vector<8x128xf32>
      %cst_23 = arith.constant 0.000000e+00 : f32
      %29 = vector.broadcast %cst_23 : f32 to vector<8x128xf32>
      %30 = arith.maximumf %28, %29 : vector<8x128xf32>
      %cst_24 = arith.constant dense<0.000000e+00> : vector<128xf32>
      %31 = vector.multi_reduction <add>, %30, %cst_24 [0] : vector<8x128xf32> to vector<128xf32>
      %32 = vector.shape_cast %31 : vector<128xf32> to vector<1x128xf32>
      %cst_25 = arith.constant 8.000000e+00 : f32
      %33 = vector.broadcast %cst_25 : f32 to vector<1x128xf32>
      %34 = arith.divf %32, %33 : vector<1x128xf32>
      %35 = vector.broadcast %34 : vector<1x128xf32> to vector<8x128xf32>
      %36 = arith.subf %30, %35 : vector<8x128xf32>
      %37 = arith.mulf %36, %36 : vector<8x128xf32>
      %cst_26 = arith.constant dense<0.000000e+00> : vector<128xf32>
      %38 = vector.multi_reduction <add>, %37, %cst_26 [0] : vector<8x128xf32> to vector<128xf32>
      %39 = vector.shape_cast %38 : vector<128xf32> to vector<1x128xf32>
      %cst_27 = arith.constant 8.000000e+00 : f32
      %40 = vector.broadcast %cst_27 : f32 to vector<1x128xf32>
      %41 = arith.divf %39, %40 : vector<1x128xf32>
      %cst_28 = arith.constant 9.99999974E-6 : f32
      %42 = vector.broadcast %cst_28 : f32 to vector<1x128xf32>
      %43 = arith.addf %41, %42 : vector<1x128xf32>
      %44 = math.rsqrt %43 : vector<1x128xf32>
      %c0_29 = arith.constant 0 : index
      %c0_30 = arith.constant 0 : index
      %45 = vector.load %arg6[%c0_29, %c0_30] : memref<1x128xf32, #tpu.memory_space<vmem>>, vector<1x128xf32>
      %46 = vector.broadcast %34 : vector<1x128xf32> to vector<8x128xf32>
      %47 = arith.subf %30, %46 : vector<8x128xf32>
      %48 = vector.broadcast %45 : vector<1x128xf32> to vector<8x128xf32>
      %49 = arith.mulf %48, %47 : vector<8x128xf32>
      %50 = vector.broadcast %44 : vector<1x128xf32> to vector<8x128xf32>
      %51 = arith.mulf %49, %50 : vector<8x128xf32>
      %c0_31 = arith.constant 0 : index
      %c0_32 = arith.constant 0 : index
      %52 = vector.load %arg7[%c0_31, %c0_32] : memref<1x128xf32, #tpu.memory_space<vmem>>, vector<1x128xf32>
      %53 = vector.broadcast %52 : vector<1x128xf32> to vector<8x128xf32>
      %54 = arith.addf %51, %53 : vector<8x128xf32>
      %c0_33 = arith.constant 0 : index
      %c0_34 = arith.constant 0 : index
      %55 = vector.load %arg8[%c0_33, %c0_34] : memref<8x128xf32, #tpu.memory_space<vmem>>, vector<8x128xf32>
      tpu.vector_store %arg8[%c0_33, %c0_34], %54 {strides = array<i32>} : memref<8x128xf32, #tpu.memory_space<vmem>>, vector<8x128xf32>,
    } else {
    }
    return
  }
  func.func @transform_0(%arg0: i32) -> (i32, i32, i32) {
    %c0_i32 = arith.constant 0 : i32
    %c0_i32_0 = arith.constant 0 : i32
    %c0_i32_1 = arith.constant 0 : i32
    return %c0_i32, %arg0, %c0_i32_0 : i32, i32, i32
  }
  func.func @transform_1(%arg0: i32) -> (i32, i32) {
    %c0_i32 = arith.constant 0 : i32
    %c0_i32_0 = arith.constant 0 : i32
    %c0_i32_1 = arith.constant 0 : i32
    return %c0_i32, %c0_i32_0 : i32, i32
  }
  func.func @transform_2(%arg0: i32) -> (i32, i32) {
    %c0_i32 = arith.constant 0 : i32
    %c0_i32_0 = arith.constant 0 : i32
    %c0_i32_1 = arith.constant 0 : i32
    return %c0_i32, %c0_i32_0 : i32, i32
  }
  func.func @transform_3(%arg0: i32) -> (i32, i32) {
    %c0_i32 = arith.constant 0 : i32
    %c0_i32_0 = arith.constant 0 : i32
    %c0_i32_1 = arith.constant 0 : i32
    return %c0_i32, %c0_i32_0 : i32, i32
  }
  func.func @transform_4(%arg0: i32) -> (i32, i32) {
    %c0_i32 = arith.constant 0 : i32
    %c0_i32_0 = arith.constant 0 : i32
    %c0_i32_1 = arith.constant 0 : i32
    return %c0_i32, %c0_i32_0 : i32, i32
  }
  func.func @transform_5(%arg0: i32) -> (i32, i32) {
    %c0_i32 = arith.constant 0 : i32
    %c0_i32_0 = arith.constant 0 : i32
    %c0_i32_1 = arith.constant 0 : i32
    return %c0_i32, %c0_i32_0 : i32, i32
  }
  func.func @transform_6(%arg0: i32) -> (i32, i32) {
    %c0_i32 = arith.constant 0 : i32
    %c0_i32_0 = arith.constant 0 : i32
    %c0_i32_1 = arith.constant 0 : i32
    return %c0_i32, %c0_i32_0 : i32, i32
  }
  func.func @transform_7(%arg0: i32) -> (i32, i32) {
    %c0_i32 = arith.constant 0 : i32
    %c0_i32_0 = arith.constant 0 : i32
    %c0_i32_1 = arith.constant 0 : i32
    return %c0_i32, %c0_i32_0 : i32, i32
  }
}

</mosaic_0001>

<bundles_post_ra>
// kernel: tpu_custom_call.1
= control target key start
LH: loop header
LB: loop body
LE: loop exit
PB: predicated region body
PF: predicated region fallthrough
CT: control target
= control target key end

     0   :  { %vm1337_vm0 = vcmask 1041408   ;;  %v6042_v3 = vmov 0   ;;  %vm952_vm1 = vcmask 31744   ;;  %s6034_s0 = inlined_call_operand.vmem [shape: bf16[8,256,4], index: 0, kind: input, shape index: {}]   ;;  %s6035_s1 = inlined_call_operand.vmem [shape: bf16[4,256], index: 1, kind: input, shape index: {}]   ;;  %s6036_s2 = inlined_call_operand.vmem [shape: f32[1,256], index: 2, kind: input, shape index: {}]   ;;  %s6037_s3 = inlined_call_operand.vmem [shape: bf16[256,128], index: 3, kind: input, shape index: {}]   ;;  %s6038_s4 = inlined_call_operand.vmem [shape: f32[1,128], index: 4, kind: input, shape index: {}]   ;;  %s6039_s5 = inlined_call_operand.vmem [shape: f32[1,128], index: 5, kind: input, shape index: {}]   ;;  %s6040_s6 = inlined_call_operand.vmem [shape: f32[1,128], index: 6, kind: input, shape index: {}]   ;;  %s6041_s7 = inlined_call_operand.hbm [shape: f32[8,128], index: 7, kind: output, shape index: {}]  }
   0x1   :  { %v4170_v0 = vld.sshfl [vmem:[%s6035_s1] sm:$0x33 pattern:$0x76325410]  ;;  %1376 = vmatprep.mubr.bf16.mxu0 %v6042_v3  ;;  %2026 = vmatprep.mubr.bf16.mxu1 %v6042_v3  ;;  %v4347_v5 = vld [vmem:[%s6034_s0 + $0x208] sm:$0xff]   ;;  %v4349_v7 = vld [vmem:[%s6034_s0 + $0x210] sm:$0xff]  }
   0x2   :  { %v951_v1 = vcombine.high %v4170_v0, %v4170_v0  ;;  %v1339_v2 = vsel %vm1337_vm0, %v4170_v0, 0  ;;  %v4345_v4 = vld [vmem:[%s6034_s0] sm:$0xff]   ;;  %v4346_v6 = vld [vmem:[%s6034_s0 + $0x8] sm:$0xff]   ;;  %v4348_v8 = vld [vmem:[%s6034_s0 + $0x10] sm:$0xff]  }
   0x3   :  { %v4351_v9 = vld [vmem:[%s6034_s0 + $0x218] sm:$0xff]   ;;  %v4353_v11 = vld [vmem:[%s6034_s0 + $0x220] sm:$0xff]   ;;  %v4355_v13 = vld [vmem:[%s6034_s0 + $0x228] sm:$0xff]  }
   0x4   :  { %4171 = vmatprep.subr.msk.bf16.mxu0 %vm1337_vm0, %v951_v1  ;;  %4341 = vmatprep.subr.msk.bf16.mxu1 %vm1337_vm0, %v951_v1  ;;  %v4350_v10 = vld [vmem:[%s6034_s0 + $0x18] sm:$0xff]   ;;  %v4352_v12 = vld [vmem:[%s6034_s0 + $0x20] sm:$0xff]   ;;  %v4354_v14 = vld [vmem:[%s6034_s0 + $0x28] sm:$0xff]  }
   0x5   :  { %1345 = vmatpush1.bf16.msra.mxu0 %v1339_v2  ;;  %4342 = vmatpush1.bf16.msra.mxu1 %v1339_v2  ;;  %v4357_v15 = vld [vmem:[%s6034_s0 + $0x230] sm:$0xff]   ;;  %v4359_v17 = vld [vmem:[%s6034_s0 + $0x238] sm:$0xff]   ;;  %v4361_v19 = vld [vmem:[%s6034_s0 + $0x240] sm:$0xff]  }
   0x6   :  { %v4356_v16 = vld [vmem:[%s6034_s0 + $0x30] sm:$0xff]   ;;  %v4358_v18 = vld [vmem:[%s6034_s0 + $0x38] sm:$0xff]   ;;  %v4360_v20 = vld [vmem:[%s6034_s0 + $0x40] sm:$0xff]  }
   0x7   :  { %v4363_v21 = vld [vmem:[%s6034_s0 + $0x248] sm:$0xff]   ;;  %v4365_v23 = vld [vmem:[%s6034_s0 + $0x250] sm:$0xff]   ;;  %v4367_v25 = vld [vmem:[%s6034_s0 + $0x258] sm:$0xff]  }
   0x8   :  { %4172 = vmatmul.mubr.msk.bf16.vlgmr.msra.gmra.mrb[0].mxu0 %vm952_vm1, %v4345_v4  ;;  %4237 = vmatmul.mubr.msk.bf16.vlgmr.msra.gmra.mrb[0].mxu1 %vm952_vm1, %v4347_v5  ;;  %v4362_v22 = vld [vmem:[%s6034_s0 + $0x48] sm:$0xff]   ;;  %v4364_v24 = vld [vmem:[%s6034_s0 + $0x50] sm:$0xff]   ;;  %v4366_v26 = vld [vmem:[%s6034_s0 + $0x58] sm:$0xff]  }
   0x9   :  { %1386 = vmatprep.mubr.bf16.mxu0 %v6042_v3  ;;  %2036 = vmatprep.mubr.bf16.mxu1 %v6042_v3  ;;  %v4369_v27 = vld [vmem:[%s6034_s0 + $0x260] sm:$0xff]   ;;  %v4371_v29 = vld [vmem:[%s6034_s0 + $0x268] sm:$0xff]   ;;  %v4373_v31 = vld [vmem:[%s6034_s0 + $0x270] sm:$0xff]  }
   0xa   :  { %v4368_v28 = vld [vmem:[%s6034_s0 + $0x60] sm:$0xff]   ;;  %v4370_v30 = vld [vmem:[%s6034_s0 + $0x68] sm:$0xff]   ;;  %v4372_v32 = vld [vmem:[%s6034_s0 + $0x70] sm:$0xff]  }
   0xb   :  { %v4375_v33 = vld [vmem:[%s6034_s0 + $0x278] sm:$0xff]  }
  0x10   :  { %4173 = vmatmul.mubr.msk.bf16.gmra.mrb[4].mxu0 %vm952_vm1, %v4346_v6  ;;  %4238 = vmatmul.mubr.msk.bf16.gmra.mrb[4].mxu1 %vm952_vm1, %v4349_v7 }
  0x11   :  { %1396 = vmatprep.mubr.bf16.mxu0 %v6042_v3  ;;  %2046 = vmatprep.mubr.bf16.mxu1 %v6042_v3 }
  0x18   :  { %4174 = vmatmul.mubr.msk.bf16.gmra.mrb[8].mxu0 %vm952_vm1, %v4348_v8  ;;  %4239 = vmatmul.mubr.msk.bf16.gmra.mrb[8].mxu1 %vm952_vm1, %v4351_v9 }
  0x19   :  { %1406 = vmatprep.mubr.bf16.mxu0 %v6042_v3  ;;  %2056 = vmatprep.mubr.bf16.mxu1 %v6042_v3 }
  0x20   :  { %4175 = vmatmul.mubr.msk.bf16.gmra.mrb[12].mxu0 %vm952_vm1, %v4350_v10  ;;  %4240 = vmatmul.mubr.msk.bf16.gmra.mrb[12].mxu1 %vm952_vm1, %v4353_v11 }
  0x21   :  { %1416 = vmatprep.mubr.bf16.mxu0 %v6042_v3  ;;  %2066 = vmatprep.mubr.bf16.mxu1 %v6042_v3 }
  0x28   :  { %4176 = vmatmul.mubr.msk.bf16.gmra.mrb[16].mxu0 %vm952_vm1, %v4352_v12  ;;  %4241 = vmatmul.mubr.msk.bf16.gmra.mrb[16].mxu1 %vm952_vm1, %v4355_v13 }
  0x29   :  { %1426 = vmatprep.mubr.bf16.mxu0 %v6042_v3  ;;  %2076 = vmatprep.mubr.bf16.mxu1 %v6042_v3 }
  0x30   :  { %4177 = vmatmul.mubr.msk.bf16.gmra.mrb[20].mxu0 %vm952_vm1, %v4354_v14  ;;  %4242 = vmatmul.mubr.msk.bf16.gmra.mrb[20].mxu1 %vm952_vm1, %v4357_v15 }
  0x31   :  { %1436 = vmatprep.mubr.bf16.mxu0 %v6042_v3  ;;  %2086 = vmatprep.mubr.bf16.mxu1 %v6042_v3 }
  0x38   :  { %4178 = vmatmul.mubr.msk.bf16.gmra.mrb[24].mxu0 %vm952_vm1, %v4356_v16  ;;  %4243 = vmatmul.mubr.msk.bf16.gmra.mrb[24].mxu1 %vm952_vm1, %v4359_v17 }
  0x39   :  { %1446 = vmatprep.mubr.bf16.mxu0 %v6042_v3  ;;  %2096 = vmatprep.mubr.bf16.mxu1 %v6042_v3 }
  0x40   :  { %4179 = vmatmul.mubr.msk.bf16.gmra.mrb[28].mxu0 %vm952_vm1, %v4358_v18  ;;  %4244 = vmatmul.mubr.msk.bf16.gmra.mrb[28].mxu1 %vm952_vm1, %v4361_v19 }
  0x41   :  { %1456 = vmatprep.mubr.bf16.mxu0 %v6042_v3  ;;  %2106 = vmatprep.mubr.bf16.mxu1 %v6042_v3 }
  0x48   :  { %4180 = vmatmul.mubr.msk.bf16.gmra.mrb[32].mxu0 %vm952_vm1, %v4360_v20  ;;  %4245 = vmatmul.mubr.msk.bf16.gmra.mrb[32].mxu1 %vm952_vm1, %v4363_v21 }
  0x49   :  { %1466 = vmatprep.mubr.bf16.mxu0 %v6042_v3  ;;  %2116 = vmatprep.mubr.bf16.mxu1 %v6042_v3 }
  0x50   :  { %4181 = vmatmul.mubr.msk.bf16.gmra.mrb[36].mxu0 %vm952_vm1, %v4362_v22  ;;  %4246 = vmatmul.mubr.msk.bf16.gmra.mrb[36].mxu1 %vm952_vm1, %v4365_v23 }
  0x51   :  { %1476 = vmatprep.mubr.bf16.mxu0 %v6042_v3  ;;  %2126 = vmatprep.mubr.bf16.mxu1 %v6042_v3 }
  0x58   :  { %4182 = vmatmul.mubr.msk.bf16.gmra.mrb[40].mxu0 %vm952_vm1, %v4364_v24  ;;  %4247 = vmatmul.mubr.msk.bf16.gmra.mrb[40].mxu1 %vm952_vm1, %v4367_v25 }
  0x59   :  { %1486 = vmatprep.mubr.bf16.mxu0 %v6042_v3  ;;  %2136 = vmatprep.mubr.bf16.mxu1 %v6042_v3 }
  0x60   :  { %4183 = vmatmul.mubr.msk.bf16.gmra.mrb[44].mxu0 %vm952_vm1, %v4366_v26  ;;  %4248 = vmatmul.mubr.msk.bf16.gmra.mrb[44].mxu1 %vm952_vm1, %v4369_v27 }
  0x61   :  { %1496 = vmatprep.mubr.bf16.mxu0 %v6042_v3  ;;  %2146 = vmatprep.mubr.bf16.mxu1 %v6042_v3 }
  0x68   :  { %4184 = vmatmul.mubr.msk.bf16.gmra.mrb[48].mxu0 %vm952_vm1, %v4368_v28  ;;  %4249 = vmatmul.mubr.msk.bf16.gmra.mrb[48].mxu1 %vm952_vm1, %v4371_v29 }
  0x69   :  { %1506 = vmatprep.mubr.bf16.mxu0 %v6042_v3  ;;  %2156 = vmatprep.mubr.bf16.mxu1 %v6042_v3 }
  0x70   :  { %4185 = vmatmul.mubr.msk.bf16.gmra.mrb[52].mxu0 %vm952_vm1, %v4370_v30  ;;  %4250 = vmatmul.mubr.msk.bf16.gmra.mrb[52].mxu1 %vm952_vm1, %v4373_v31 }
  0x71   :  { %1516 = vmatprep.mubr.bf16.mxu0 %v6042_v3  ;;  %2166 = vmatprep.mubr.bf16.mxu1 %v6042_v3 }
  0x72   :  { %12 = vsyncpa [#allocation4], 0  ;;  %v4374_v34 = vld [vmem:[%s6034_s0 + $0x78] sm:$0xff]   ;;  %v4377_v35 = vld [vmem:[%s6034_s0 + $0x280] sm:$0xff]   ;;  %v293_v58 = vlaneseq  ;;  %vm3779_vm2 = vcmask 1041409   ;;  %vm3781_vm3 = vcmask 1042434  }
  0x73   :  { %v4376_v36 = vld [vmem:[%s6034_s0 + $0x80] sm:$0xff]   ;;  %v4379_v37 = vld [vmem:[%s6034_s0 + $0x288] sm:$0xff]   ;;  %v4381_v39 = vld [vmem:[%s6034_s0 + $0x290] sm:$0xff]   ;;  %vm3783_vm4 = vcmask 1043459   ;;  %vm3785_vm5 = vcmask 1044484   ;;  %vm3787_vm6 = vcmask 1045509  }
  0x74   :  { %v4378_v38 = vld [vmem:[%s6034_s0 + $0x88] sm:$0xff]   ;;  %v4380_v40 = vld [vmem:[%s6034_s0 + $0x90] sm:$0xff]   ;;  %v4383_v41 = vld [vmem:[%s6034_s0 + $0x298] sm:$0xff]   ;;  %v294_v59 = vshrl.u32 %v293_v58, 7  ;;  %vm3789_vm7 = vcmask 1046534   ;;  %vm3791_vm8 = vcmask 1047559  }
  0x75   :  { %v4382_v42 = vld [vmem:[%s6034_s0 + $0x98] sm:$0xff]   ;;  %v4385_v43 = vld [vmem:[%s6034_s0 + $0x2a0] sm:$0xff]   ;;  %v4387_v45 = vld [vmem:[%s6034_s0 + $0x2a8] sm:$0xff]   ;;  %s4516_s23 = smov [#allocation3]  }
  0x76   :  { %v4384_v44 = vld [vmem:[%s6034_s0 + $0xa0] sm:$0xff]   ;;  %v4386_v46 = vld [vmem:[%s6034_s0 + $0xa8] sm:$0xff]   ;;  %v4389_v47 = vld [vmem:[%s6034_s0 + $0x2b0] sm:$0xff]   ;;  %v295_v61 = vsub.s32 0, %v294_v59  ;;  %v299_v0 = vsub.s32 1, %v294_v59  ;;  %s4034_s24 = sshll.u32 %s4516_s23, 4  ;;  %s4035_s24 = int_to_ptr.vmem [resolvable:$true] %s4034_s24 }
  0x77   :  { %v4388_v48 = vld [vmem:[%s6034_s0 + $0xb0] sm:$0xff]   ;;  %v4391_v49 = vld [vmem:[%s6034_s0 + $0x2b8] sm:$0xff]   ;;  %v4393_v51 = vld [vmem:[%s6034_s0 + $0x2c0] sm:$0xff]   ;;  %s4491_s25 = scalar_lea.vmem %s4035_s24, 128  ;;  %p4496_p1 = scmp.lt.s32.totalorder %s4035_s24, %s4035_s24 }
  0x78   :  { %4186 = vmatmul.mubr.msk.bf16.gmra.mrb[56].mxu0 %vm952_vm1, %v4372_v32  ;;  %4251 = vmatmul.mubr.msk.bf16.gmra.mrb[56].mxu1 %vm952_vm1, %v4375_v33  ;;  %v4390_v50 = vld [vmem:[%s6034_s0 + $0xb8] sm:$0xff]   ;;  %v4422_v52 = vld [vmem:[%s6037_s3 + $0x40] sm:$0xff]   ;;  %v4395_v55 = vld [vmem:[%s6034_s0 + $0x2c8] sm:$0xff]   ;;  %p4492_p0 = scmp.ne.s32.totalorder %s4035_s24, %s4491_s25  ;;  %p4497_p2 = scmp.lt.s32.totalorder %s4491_s25, %s4491_s25 }
  0x79   :  { %1526 = vmatprep.mubr.bf16.mxu0 %v6042_v3  ;;  %2176 = vmatprep.mubr.bf16.mxu1 %v6042_v3  ;;  %v4423_v53 = vld [vmem:[%s6037_s3] sm:$0xff]   ;;  %v4394_v56 = vld [vmem:[%s6034_s0 + $0xc8] sm:$0xff]   ;;  %v4397_v57 = vld [vmem:[%s6034_s0 + $0x2d0] sm:$0xff]  }
  0x7a   :  { %v4392_v54 = vld [vmem:[%s6034_s0 + $0xc0] sm:$0xff]   ;;  %4319 = vmatprep.subr.bf16.mxu1 %v4422_v52  ;;  %v4396_v60 = vld [vmem:[%s6034_s0 + $0xd0] sm:$0xff]   ;;  %v4399_v62 = vld [vmem:[%s6034_s0 + $0x2d8] sm:$0xff]   ;;  %p4498_p3 = por %p4497_p2, %p4496_p1 }
  0x7b   :  { %4320 = vmatpush3.bf16.msra.mxu1 %v4423_v53  ;;  %v291_v63 = vld [vmem:[%s6036_s2] sm:$0x3]  ;;  %v4398_v8 = vld [vmem:[%s6034_s0 + $0xd8] sm:$0xff]   ;;  %v4403_v29 = vld [vmem:[%s6034_s0 + $0x2e8] sm:$0xff]  }
  0x7c   :  { %v4838_v1 = vrot.slane %v291_v63, %v295_v61  ;;  %v4841_v2 = vrot.slane %v291_v63, %v299_v0  ;;  %v4401_v9 = vld [vmem:[%s6034_s0 + $0x2e0] sm:$0xff]   ;;  %p4499_p4 = pnand %p4498_p3, %p4492_p0 }
  0x7d   :  { %v4400_v28 = vld [vmem:[%s6034_s0 + $0xe0] sm:$0xff]  }
  0x80   :  { %4187 = vmatmul.mubr.msk.bf16.gmra.mrb[60].mxu0 %vm952_vm1, %v4374_v34  ;;  %4252 = vmatmul.mubr.msk.bf16.gmra.mrb[60].mxu1 %vm952_vm1, %v4377_v35 }
  0x81   :  { %1536 = vmatprep.mubr.bf16.mxu0 %v6042_v3  ;;  %2186 = vmatprep.mubr.bf16.mxu1 %v6042_v3 }
  0x88   :  { %4188 = vmatmul.mubr.msk.bf16.gmra.mrb[64].mxu0 %vm952_vm1, %v4376_v36  ;;  %4253 = vmatmul.mubr.msk.bf16.gmra.mrb[64].mxu1 %vm952_vm1, %v4379_v37 }
  0x89   :  { %1546 = vmatprep.mubr.bf16.mxu0 %v6042_v3  ;;  %2196 = vmatprep.mubr.bf16.mxu1 %v6042_v3 }
  0x90   :  { %4189 = vmatmul.mubr.msk.bf16.gmra.mrb[68].mxu0 %vm952_vm1, %v4378_v38  ;;  %4254 = vmatmul.mubr.msk.bf16.gmra.mrb[68].mxu1 %vm952_vm1, %v4381_v39 }
  0x91   :  { %1556 = vmatprep.mubr.bf16.mxu0 %v6042_v3  ;;  %2206 = vmatprep.mubr.bf16.mxu1 %v6042_v3 }
  0x98   :  { %4190 = vmatmul.mubr.msk.bf16.gmra.mrb[72].mxu0 %vm952_vm1, %v4380_v40  ;;  %4255 = vmatmul.mubr.msk.bf16.gmra.mrb[72].mxu1 %vm952_vm1, %v4383_v41 }
  0x99   :  { %1566 = vmatprep.mubr.bf16.mxu0 %v6042_v3  ;;  %2216 = vmatprep.mubr.bf16.mxu1 %v6042_v3 }
  0xa0   :  { %4191 = vmatmul.mubr.msk.bf16.gmra.mrb[76].mxu0 %vm952_vm1, %v4382_v42  ;;  %4256 = vmatmul.mubr.msk.bf16.gmra.mrb[76].mxu1 %vm952_vm1, %v4385_v43 }
  0xa1   :  { %1576 = vmatprep.mubr.bf16.mxu0 %v6042_v3  ;;  %2226 = vmatprep.mubr.bf16.mxu1 %v6042_v3 }
  0xa8   :  { %4192 = vmatmul.mubr.msk.bf16.gmra.mrb[80].mxu0 %vm952_vm1, %v4384_v44  ;;  %4257 = vmatmul.mubr.msk.bf16.gmra.mrb[80].mxu1 %vm952_vm1, %v4387_v45 }
  0xa9   :  { %1586 = vmatprep.mubr.bf16.mxu0 %v6042_v3  ;;  %2236 = vmatprep.mubr.bf16.mxu1 %v6042_v3 }
  0xb0   :  { %4193 = vmatmul.mubr.msk.bf16.gmra.mrb[84].mxu0 %vm952_vm1, %v4386_v46  ;;  %4258 = vmatmul.mubr.msk.bf16.gmra.mrb[84].mxu1 %vm952_vm1, %v4389_v47 }
  0xb1   :  { %1596 = vmatprep.mubr.bf16.mxu0 %v6042_v3  ;;  %2246 = vmatprep.mubr.bf16.mxu1 %v6042_v3 }
  0xb8   :  { %4194 = vmatmul.mubr.msk.bf16.gmra.mrb[88].mxu0 %vm952_vm1, %v4388_v48  ;;  %4259 = vmatmul.mubr.msk.bf16.gmra.mrb[88].mxu1 %vm952_vm1, %v4391_v49 }
  0xb9   :  { %1606 = vmatprep.mubr.bf16.mxu0 %v6042_v3  ;;  %2256 = vmatprep.mubr.bf16.mxu1 %v6042_v3 }
  0xc0   :  { %4195 = vmatmul.mubr.msk.bf16.gmra.mrb[92].mxu0 %vm952_vm1, %v4390_v50  ;;  %4260 = vmatmul.mubr.msk.bf16.gmra.mrb[92].mxu1 %vm952_vm1, %v4393_v51  ;;  %v4402_v50 = vld [vmem:[%s6034_s0 + $0xe8] sm:$0xff]   ;;  %v4405_v51 = vld [vmem:[%s6034_s0 + $0x2f0] sm:$0xff]  }
  0xc1   :  { %1616 = vmatprep.mubr.bf16.mxu0 %v6042_v3  ;;  %2266 = vmatprep.mubr.bf16.mxu1 %v6042_v3 }
  0xc8   :  { %4196 = vmatmul.mubr.msk.bf16.gmra.mrb[96].mxu0 %vm952_vm1, %v4392_v54  ;;  %4261 = vmatmul.mubr.msk.bf16.gmra.mrb[96].mxu1 %vm952_vm1, %v4395_v55 }
  0xc9   :  { %1626 = vmatprep.mubr.bf16.mxu0 %v6042_v3  ;;  %2276 = vmatprep.mubr.bf16.mxu1 %v6042_v3 }
  0xd0   :  { %4197 = vmatmul.mubr.msk.bf16.gmra.mrb[100].mxu0 %vm952_vm1, %v4394_v56  ;;  %4262 = vmatmul.mubr.msk.bf16.gmra.mrb[100].mxu1 %vm952_vm1, %v4397_v57 }
  0xd1   :  { %1636 = vmatprep.mubr.bf16.mxu0 %v6042_v3  ;;  %2286 = vmatprep.mubr.bf16.mxu1 %v6042_v3 }
  0xd8   :  { %4198 = vmatmul.mubr.msk.bf16.gmra.mrb[104].mxu0 %vm952_vm1, %v4396_v60  ;;  %4263 = vmatmul.mubr.msk.bf16.gmra.mrb[104].mxu1 %vm952_vm1, %v4399_v62 }
  0xd9   :  { %1646 = vmatprep.mubr.bf16.mxu0 %v6042_v3  ;;  %2296 = vmatprep.mubr.bf16.mxu1 %v6042_v3 }
  0xdb   :  { %v1378_v4 = vpop.f32.mrb[0].mxu0  ;;  %v4845_v5 = vpop.f32.mrb[0].mxu1 }
  0xdc   :  { %v1379_v6 = vadd.f32 %v1378_v4, %v4838_v1  ;;  %v1380_v7 = vpop.f32.mrb[1].mxu0  ;;  %v4854_v10 = vpop.f32.mrb[1].mxu1 }
  0xdd   :  { %v1381_v11 = vadd.f32 %v1380_v7, %v4841_v2  ;;  %v1382_v12 = vpop.f32.mrb[2].mxu0  ;;  %v4857_v13 = vpop.f32.mrb[2].mxu1 }
  0xde   :  { %v1383_v14 = vadd.f32 %v1382_v12, %v4838_v1  ;;  %v1384_v15 = vpop.f32.mrb[3].mxu0  ;;  %v4860_v16 = vpop.f32.mrb[3].mxu1  ;;  %v2657_v18 = vmax.f32 %v1379_v6, 0.0 }
  0xdf   :  { %v1385_v17 = vadd.f32 %v1384_v15, %v4841_v2  ;;  %v2658_v20 = vmax.f32 %v1381_v11, 0.0  ;;  %v4407_v15 = vld [vmem:[%s6034_s0 + $0x2f8] sm:$0xff]  }
  0xe0   :  { %v2659_v19 = vmax.f32 %v1383_v14, 0.0  ;;  %4199 = vmatmul.mubr.msk.bf16.gmra.mrb[108].mxu0 %vm952_vm1, %v4398_v8  ;;  %4264 = vmatmul.mubr.msk.bf16.gmra.mrb[108].mxu1 %vm952_vm1, %v4401_v9  ;;  %v4404_v14 = vld [vmem:[%s6034_s0 + $0xf0] sm:$0xff]  }
  0xe1   :  { %v2660_v21 = vmax.f32 %v1385_v17, 0.0  ;;  %1656 = vmatprep.mubr.bf16.mxu0 %v6042_v3  ;;  %2306 = vmatprep.mubr.bf16.mxu1 %v6042_v3 }
  0xe2   :  { %v3171_v22 = vadd.f32 %v2659_v19, %v2657_v18 }
  0xe3   :  { %v3208_v23 = vadd.f32 %v2660_v21, %v2658_v20  ;;  %v1388_v24 = vpop.f32.mrb[4].mxu0  ;;  %v4867_v25 = vpop.f32.mrb[4].mxu1 }
  0xe4   :  { %v1389_v26 = vadd.f32 %v1388_v24, %v4838_v1  ;;  %v1390_v27 = vpop.f32.mrb[5].mxu0  ;;  %v4876_v30 = vpop.f32.mrb[5].mxu1 }
  0xe5   :  { %v1391_v31 = vadd.f32 %v1390_v27, %v4841_v2  ;;  %v1392_v32 = vpop.f32.mrb[6].mxu0  ;;  %v4879_v33 = vpop.f32.mrb[6].mxu1 }
  0xe6   :  { %v2661_v34 = vmax.f32 %v1389_v26, 0.0  ;;  %v1393_v35 = vadd.f32 %v1392_v32, %v4838_v1  ;;  %v1394_v36 = vpop.f32.mrb[7].mxu0  ;;  %v4882_v37 = vpop.f32.mrb[7].mxu1 }
  0xe7   :  { %v2662_v38 = vmax.f32 %v1391_v31, 0.0  ;;  %v1395_v39 = vadd.f32 %v1394_v36, %v4841_v2 }
  0xe8   :  { %v3172_v40 = vadd.f32 %v3171_v22, %v2661_v34  ;;  %v2663_v41 = vmax.f32 %v1393_v35, 0.0  ;;  %4200 = vmatmul.mubr.msk.bf16.gmra.mrb[112].mxu0 %vm952_vm1, %v4400_v28  ;;  %4265 = vmatmul.mubr.msk.bf16.gmra.mrb[112].mxu1 %vm952_vm1, %v4403_v29 }
  0xe9   :  { %v3209_v42 = vadd.f32 %v3208_v23, %v2662_v38  ;;  %v2664_v43 = vmax.f32 %v1395_v39, 0.0  ;;  %1666 = vmatprep.mubr.bf16.mxu0 %v6042_v3  ;;  %2316 = vmatprep.mubr.bf16.mxu1 %v6042_v3 }
  0xea   :  { %v3173_v44 = vadd.f32 %v3172_v40, %v2663_v41  ;;  %v4406_v41 = vld [vmem:[%s6034_s0 + $0xf8] sm:$0xff]  }
  0xeb   :  { %v3210_v45 = vadd.f32 %v3209_v42, %v2664_v43  ;;  %v1398_v46 = vpop.f32.mrb[8].mxu0  ;;  %v4889_v47 = vpop.f32.mrb[8].mxu1  ;;  %v4409_v42 = vld [vmem:[%s6034_s0 + $0x300] sm:$0xff]  }
  0xec   :  { %v1399_v48 = vadd.f32 %v1398_v46, %v4838_v1  ;;  %v1400_v49 = vpop.f32.mrb[9].mxu0  ;;  %v4898_v52 = vpop.f32.mrb[9].mxu1 }
  0xed   :  { %v1401_v53 = vadd.f32 %v1400_v49, %v4841_v2  ;;  %v1402_v54 = vpop.f32.mrb[10].mxu0  ;;  %v4901_v55 = vpop.f32.mrb[10].mxu1 }
  0xee   :  { %v2665_v56 = vmax.f32 %v1399_v48, 0.0  ;;  %v1403_v57 = vadd.f32 %v1402_v54, %v4838_v1  ;;  %v1404_v58 = vpop.f32.mrb[11].mxu0  ;;  %v4904_v59 = vpop.f32.mrb[11].mxu1 }
  0xef   :  { %v2666_v60 = vmax.f32 %v1401_v53, 0.0  ;;  %v1405_v61 = vadd.f32 %v1404_v58, %v4841_v2 }
  0xf0   :  { %v3174_v62 = vadd.f32 %v3173_v44, %v2665_v56  ;;  %v2667_v63 = vmax.f32 %v1403_v57, 0.0  ;;  %4201 = vmatmul.mubr.msk.bf16.gmra.mrb[116].mxu0 %vm952_vm1, %v4402_v50  ;;  %4266 = vmatmul.mubr.msk.bf16.gmra.mrb[116].mxu1 %vm952_vm1, %v4405_v51 }
  0xf1   :  { %v3211_v0 = vadd.f32 %v3210_v45, %v2666_v60  ;;  %v2668_v4 = vmax.f32 %v1405_v61, 0.0  ;;  %1676 = vmatprep.mubr.bf16.mxu0 %v6042_v3  ;;  %2326 = vmatprep.mubr.bf16.mxu1 %v6042_v3  ;;  %v4440_v61 = vld [vmem:[%s6037_s3 + $0x48] sm:$0xff]  }
  0xf2   :  { %v3175_v6 = vadd.f32 %v3174_v62, %v2667_v63  ;;  %v4441_v63 = vld [vmem:[%s6037_s3 + $0x8] sm:$0xff]   ;;  %4321 = vmatprep.subr.bf16.mxu1 %v4440_v61 }
  0xf3   :  { %v3212_v7 = vadd.f32 %v3211_v0, %v2668_v4  ;;  %v1408_v8 = vpop.f32.mrb[12].mxu0  ;;  %v4911_v9 = vpop.f32.mrb[12].mxu1  ;;  %4322 = vmatpush3.bf16.msra.mxu1 %v4441_v63 }
  0xf4   :  { %v1409_v11 = vadd.f32 %v1408_v8, %v4838_v1  ;;  %v1410_v12 = vpop.f32.mrb[13].mxu0  ;;  %v4920_v17 = vpop.f32.mrb[13].mxu1 }
  0xf5   :  { %v1411_v18 = vadd.f32 %v1410_v12, %v4841_v2  ;;  %v1412_v19 = vpop.f32.mrb[14].mxu0  ;;  %v4923_v20 = vpop.f32.mrb[14].mxu1  ;;  %v4411_v12 = vld [vmem:[%s6034_s0 + $0x308] sm:$0xff]  }
  0xf6   :  { %v2669_v21 = vmax.f32 %v1409_v11, 0.0  ;;  %v1413_v22 = vadd.f32 %v1412_v19, %v4838_v1  ;;  %v1414_v23 = vpop.f32.mrb[15].mxu0  ;;  %v4926_v24 = vpop.f32.mrb[15].mxu1  ;;  %v4408_v11 = vld [vmem:[%s6034_s0 + $0x100] sm:$0xff]  }
  0xf7   :  { %v2670_v26 = vmax.f32 %v1411_v18, 0.0  ;;  %v1415_v27 = vadd.f32 %v1414_v23, %v4841_v2 }
  0xf8   :  { %v3176_v28 = vadd.f32 %v3175_v6, %v2669_v21  ;;  %v2671_v29 = vmax.f32 %v1413_v22, 0.0  ;;  %4202 = vmatmul.mubr.msk.bf16.gmra.mrb[120].mxu0 %vm952_vm1, %v4404_v14  ;;  %4267 = vmatmul.mubr.msk.bf16.gmra.mrb[120].mxu1 %vm952_vm1, %v4407_v15 }
  0xf9   :  { %v3213_v31 = vadd.f32 %v3212_v7, %v2670_v26  ;;  %v2672_v32 = vmax.f32 %v1415_v27, 0.0  ;;  %1686 = vmatprep.mubr.bf16.mxu0 %v6042_v3  ;;  %2336 = vmatprep.mubr.bf16.mxu1 %v6042_v3 }
  0xfa   :  { %v3177_v34 = vadd.f32 %v3176_v28, %v2671_v29 }
  0xfb   :  { %v3214_v35 = vadd.f32 %v3213_v31, %v2672_v32  ;;  %v1418_v36 = vpop.f32.mrb[16].mxu0  ;;  %v4933_v38 = vpop.f32.mrb[16].mxu1 }
  0xfc   :  { %v1419_v39 = vadd.f32 %v1418_v36, %v4838_v1  ;;  %v1420_v40 = vpop.f32.mrb[17].mxu0  ;;  %v4942_v43 = vpop.f32.mrb[17].mxu1 }
  0xfd   :  { %v1421_v44 = vadd.f32 %v1420_v40, %v4841_v2  ;;  %v1422_v45 = vpop.f32.mrb[18].mxu0  ;;  %v4945_v46 = vpop.f32.mrb[18].mxu1 }
  0xfe   :  { %v2673_v48 = vmax.f32 %v1419_v39, 0.0  ;;  %v1423_v49 = vadd.f32 %v1422_v45, %v4838_v1  ;;  %v1424_v50 = vpop.f32.mrb[19].mxu0  ;;  %v4948_v51 = vpop.f32.mrb[19].mxu1  ;;  %v4413_v45 = vld [vmem:[%s6034_s0 + $0x310] sm:$0xff]  }
  0xff   :  { %v2674_v53 = vmax.f32 %v1421_v44, 0.0  ;;  %v1425_v54 = vadd.f32 %v1424_v50, %v4841_v2  ;;  %v4410_v44 = vld [vmem:[%s6034_s0 + $0x108] sm:$0xff]  }
 0x100   :  { %v3178_v56 = vadd.f32 %v3177_v34, %v2673_v48  ;;  %v2675_v57 = vmax.f32 %v1423_v49, 0.0  ;;  %4203 = vmatmul.mubr.msk.bf16.gmra.mrb[124].mxu0 %vm952_vm1, %v4406_v41  ;;  %4268 = vmatmul.mubr.msk.bf16.gmra.mrb[124].mxu1 %vm952_vm1, %v4409_v42 }
 0x101   :  { %v3215_v58 = vadd.f32 %v3214_v35, %v2674_v53  ;;  %v2676_v60 = vmax.f32 %v1425_v54, 0.0  ;;  %1696 = vmatprep.mubr.bf16.mxu0 %v6042_v3  ;;  %2346 = vmatprep.mubr.bf16.mxu1 %v6042_v3 }
 0x102   :  { %v3179_v62 = vadd.f32 %v3178_v56, %v2675_v57 }
 0x103   :  { %v3216_v0 = vadd.f32 %v3215_v58, %v2676_v60  ;;  %v1428_v4 = vpop.f32.mrb[20].mxu0  ;;  %v4961_v6 = vpop.f32.mrb[20].mxu1 }
 0x104   :  { %v1429_v7 = vadd.f32 %v1428_v4, %v4838_v1  ;;  %v1430_v8 = vpop.f32.mrb[21].mxu0  ;;  %v4970_v14 = vpop.f32.mrb[21].mxu1 }
 0x105   :  { %v1431_v15 = vadd.f32 %v1430_v8, %v4841_v2  ;;  %v1432_v18 = vpop.f32.mrb[22].mxu0  ;;  %v4973_v19 = vpop.f32.mrb[22].mxu1 }
 0x106   :  { %v2677_v21 = vmax.f32 %v1429_v7, 0.0  ;;  %v1433_v22 = vadd.f32 %v1432_v18, %v4838_v1  ;;  %v1434_v23 = vpop.f32.mrb[23].mxu0  ;;  %v4976_v26 = vpop.f32.mrb[23].mxu1 }
 0x107   :  { %v2678_v27 = vmax.f32 %v1431_v15, 0.0  ;;  %v1435_v28 = vadd.f32 %v1434_v23, %v4841_v2 }
 0x108   :  { %v3180_v29 = vadd.f32 %v3179_v62, %v2677_v21  ;;  %v2679_v31 = vmax.f32 %v1433_v22, 0.0  ;;  %4204 = vmatmul.mubr.msk.bf16.gmra.mrb[128].mxu0 %vm952_vm1, %v4408_v11  ;;  %4269 = vmatmul.mubr.msk.bf16.gmra.mrb[128].mxu1 %vm952_vm1, %v4411_v12  ;;  %v4412_v21 = vld [vmem:[%s6034_s0 + $0x110] sm:$0xff]   ;;  %v4415_v22 = vld [vmem:[%s6034_s0 + $0x318] sm:$0xff]  }
 0x109   :  { %v3217_v32 = vadd.f32 %v3216_v0, %v2678_v27  ;;  %v2680_v34 = vmax.f32 %v1435_v28, 0.0  ;;  %1706 = vmatprep.mubr.bf16.mxu0 %v6042_v3  ;;  %2356 = vmatprep.mubr.bf16.mxu1 %v6042_v3 }
 0x10a   :  { %v3181_v35 = vadd.f32 %v3180_v29, %v2679_v31 }
 0x10b   :  { %v3218_v36 = vadd.f32 %v3217_v32, %v2680_v34  ;;  %v1438_v39 = vpop.f32.mrb[24].mxu0  ;;  %v4983_v40 = vpop.f32.mrb[24].mxu1 }
 0x10c   :  { %v1439_v41 = vadd.f32 %v1438_v39, %v4838_v1  ;;  %v1440_v42 = vpop.f32.mrb[25].mxu0  ;;  %v4992_v48 = vpop.f32.mrb[25].mxu1 }
 0x10d   :  { %v1441_v49 = vadd.f32 %v1440_v42, %v4841_v2  ;;  %v1442_v50 = vpop.f32.mrb[26].mxu0  ;;  %v4995_v53 = vpop.f32.mrb[26].mxu1 }
 0x10e   :  { %v2681_v54 = vmax.f32 %v1439_v41, 0.0  ;;  %v1443_v56 = vadd.f32 %v1442_v50, %v4838_v1  ;;  %v1444_v57 = vpop.f32.mrb[27].mxu0  ;;  %v4998_v58 = vpop.f32.mrb[27].mxu1 }
 0x10f   :  { %6047 = vst [vmem:[#allocation6_spill] sm:$0xff] %v4998_v58  ;;  %v2682_v60 = vmax.f32 %v1441_v49, 0.0  ;;  %v1445_v61 = vadd.f32 %v1444_v57, %v4841_v2 }
 0x110   :  { %v3182_v62 = vadd.f32 %v3181_v35, %v2681_v54  ;;  %v2683_v63 = vmax.f32 %v1443_v56, 0.0  ;;  %4205 = vmatmul.mubr.msk.bf16.gmra.mrb[132].mxu0 %vm952_vm1, %v4410_v44  ;;  %4270 = vmatmul.mubr.msk.bf16.gmra.mrb[132].mxu1 %vm952_vm1, %v4413_v45 }
 0x111   :  { %v3219_v0 = vadd.f32 %v3218_v36, %v2682_v60  ;;  %v2684_v4 = vmax.f32 %v1445_v61, 0.0  ;;  %1716 = vmatprep.mubr.bf16.mxu0 %v6042_v3  ;;  %2366 = vmatprep.mubr.bf16.mxu1 %v6042_v3  ;;  %v4414_v61 = vld [vmem:[%s6034_s0 + $0x118] sm:$0xff]  }
 0x112   :  { %v3183_v7 = vadd.f32 %v3182_v62, %v2683_v63  ;;  %v4417_v62 = vld [vmem:[%s6034_s0 + $0x320] sm:$0xff]  }
 0x113   :  { %v3220_v8 = vadd.f32 %v3219_v0, %v2684_v4  ;;  %v1448_v11 = vpop.f32.mrb[28].mxu0  ;;  %v5005_v12 = vpop.f32.mrb[28].mxu1 }
 0x114   :  { %6048 = vst [vmem:[#allocation7_spill] sm:$0xff] %v5005_v12  ;;  %v1449_v15 = vadd.f32 %v1448_v11, %v4838_v1  ;;  %v1450_v18 = vpop.f32.mrb[29].mxu0  ;;  %v5014_v23 = vpop.f32.mrb[29].mxu1 }
 0x115   :  { %6049 = vst [vmem:[#allocation8_spill] sm:$0xff] %v5014_v23  ;;  %v1451_v27 = vadd.f32 %v1450_v18, %v4841_v2  ;;  %v1452_v28 = vpop.f32.mrb[30].mxu0  ;;  %v5017_v29 = vpop.f32.mrb[30].mxu1 }
 0x116   :  { %6050 = vst [vmem:[#allocation9_spill] sm:$0xff] %v5017_v29  ;;  %v2685_v31 = vmax.f32 %v1449_v15, 0.0  ;;  %v1453_v32 = vadd.f32 %v1452_v28, %v4838_v1  ;;  %v1454_v34 = vpop.f32.mrb[31].mxu0  ;;  %v5020_v35 = vpop.f32.mrb[31].mxu1 }
 0x117   :  { %6051 = vst [vmem:[#allocation10_spill] sm:$0xff] %v5020_v35  ;;  %v2686_v36 = vmax.f32 %v1451_v27, 0.0  ;;  %v1455_v39 = vadd.f32 %v1454_v34, %v4841_v2 }
 0x118   :  { %v3184_v41 = vadd.f32 %v3183_v7, %v2685_v31  ;;  %v2687_v42 = vmax.f32 %v1453_v32, 0.0  ;;  %4206 = vmatmul.mubr.msk.bf16.gmra.mrb[136].mxu0 %vm952_vm1, %v4412_v21  ;;  %4271 = vmatmul.mubr.msk.bf16.gmra.mrb[136].mxu1 %vm952_vm1, %v4415_v22 }
 0x119   :  { %v3221_v44 = vadd.f32 %v3220_v8, %v2686_v36  ;;  %v2688_v45 = vmax.f32 %v1455_v39, 0.0  ;;  %1726 = vmatprep.mubr.bf16.mxu0 %v6042_v3  ;;  %2376 = vmatprep.mubr.bf16.mxu1 %v6042_v3 }
 0x11a   :  { %v3185_v49 = vadd.f32 %v3184_v41, %v2687_v42 }
 0x11b   :  { %v3222_v50 = vadd.f32 %v3221_v44, %v2688_v45  ;;  %v1458_v54 = vpop.f32.mrb[32].mxu0  ;;  %v5027_v56 = vpop.f32.mrb[32].mxu1  ;;  %v4416_v45 = vld [vmem:[%s6034_s0 + $0x120] sm:$0xff]  }
 0x11c   :  { %6052 = vst [vmem:[#allocation11_spill] sm:$0xff] %v5027_v56  ;;  %v1459_v57 = vadd.f32 %v1458_v54, %v4838_v1  ;;  %v1460_v60 = vpop.f32.mrb[33].mxu0  ;;  %v5036_v63 = vpop.f32.mrb[33].mxu1 }
 0x11d   :  { %6053 = vst [vmem:[#allocation12_spill] sm:$0xff] %v5036_v63  ;;  %v1461_v0 = vadd.f32 %v1460_v60, %v4841_v2  ;;  %v1462_v4 = vpop.f32.mrb[34].mxu0  ;;  %v5039_v7 = vpop.f32.mrb[34].mxu1 }
 0x11e   :  { %6054 = vst [vmem:[#allocation13_spill] sm:$0xff] %v5039_v7  ;;  %v2689_v8 = vmax.f32 %v1459_v57, 0.0  ;;  %v1463_v11 = vadd.f32 %v1462_v4, %v4838_v1  ;;  %v1464_v15 = vpop.f32.mrb[35].mxu0  ;;  %v5042_v18 = vpop.f32.mrb[35].mxu1 }
 0x11f   :  { %6055 = vst [vmem:[#allocation14_spill] sm:$0xff] %v5042_v18  ;;  %v2690_v21 = vmax.f32 %v1461_v0, 0.0  ;;  %v1465_v22 = vadd.f32 %v1464_v15, %v4841_v2 }
 0x120   :  { %v3186_v27 = vadd.f32 %v3185_v49, %v2689_v8  ;;  %v2691_v28 = vmax.f32 %v1463_v11, 0.0  ;;  %4207 = vmatmul.mubr.msk.bf16.gmra.mrb[140].mxu0 %vm952_vm1, %v4414_v61  ;;  %4272 = vmatmul.mubr.msk.bf16.gmra.mrb[140].mxu1 %vm952_vm1, %v4417_v62  ;;  %v4419_v49 = vld [vmem:[%s6034_s0 + $0x328] sm:$0xff]  }
 0x121   :  { %v3223_v31 = vadd.f32 %v3222_v50, %v2690_v21  ;;  %v2692_v32 = vmax.f32 %v1465_v22, 0.0  ;;  %1736 = vmatprep.mubr.bf16.mxu0 %v6042_v3  ;;  %2386 = vmatprep.mubr.bf16.mxu1 %v6042_v3 }
 0x122   :  { %v3187_v34 = vadd.f32 %v3186_v27, %v2691_v28 }
 0x123   :  { %v3224_v36 = vadd.f32 %v3223_v31, %v2692_v32  ;;  %v1468_v39 = vpop.f32.mrb[36].mxu0  ;;  %v5049_v41 = vpop.f32.mrb[36].mxu1 }
 0x124   :  { %6056 = vst [vmem:[#allocation15_spill] sm:$0xff] %v5049_v41  ;;  %v1469_v42 = vadd.f32 %v1468_v39, %v4838_v1  ;;  %v1470_v44 = vpop.f32.mrb[37].mxu0  ;;  %v5058_v50 = vpop.f32.mrb[37].mxu1 }
 0x125   :  { %6057 = vst [vmem:[#allocation16_spill] sm:$0xff] %v5058_v50  ;;  %v1471_v54 = vadd.f32 %v1470_v44, %v4841_v2  ;;  %v1472_v57 = vpop.f32.mrb[38].mxu0  ;;  %v5061_v60 = vpop.f32.mrb[38].mxu1 }
 0x126   :  { %6058 = vst [vmem:[#allocation17_spill] sm:$0xff] %v5061_v60  ;;  %v2693_v61 = vmax.f32 %v1469_v42, 0.0  ;;  %v1473_v62 = vadd.f32 %v1472_v57, %v4838_v1  ;;  %v1474_v0 = vpop.f32.mrb[39].mxu0  ;;  %v5064_v4 = vpop.f32.mrb[39].mxu1 }
 0x127   :  { %6059 = vst [vmem:[#allocation18_spill] sm:$0xff] %v5064_v4  ;;  %v2694_v8 = vmax.f32 %v1471_v54, 0.0  ;;  %v1475_v11 = vadd.f32 %v1474_v0, %v4841_v2 }
 0x128   :  { %v3188_v15 = vadd.f32 %v3187_v34, %v2693_v61  ;;  %v2695_v21 = vmax.f32 %v1473_v62, 0.0  ;;  %4208 = vmatmul.mubr.msk.bf16.gmra.mrb[144].mxu0 %vm952_vm1, %v4416_v45  ;;  %4273 = vmatmul.mubr.msk.bf16.gmra.mrb[144].mxu1 %vm952_vm1, %v4419_v49  ;;  %v4418_v34 = vld [vmem:[%s6034_s0 + $0x128] sm:$0xff]  }
 0x129   :  { %v3225_v22 = vadd.f32 %v3224_v36, %v2694_v8  ;;  %v2696_v27 = vmax.f32 %v1475_v11, 0.0  ;;  %1746 = vmatprep.mubr.bf16.mxu0 %v6042_v3  ;;  %2396 = vmatprep.mubr.bf16.mxu1 %v6042_v3  ;;  %v4421_v36 = vld [vmem:[%s6034_s0 + $0x330] sm:$0xff]  }
 0x12a   :  { %v3189_v28 = vadd.f32 %v3188_v15, %v2695_v21 }
 0x12b   :  { %v3226_v31 = vadd.f32 %v3225_v22, %v2696_v27  ;;  %v1478_v32 = vpop.f32.mrb[40].mxu0  ;;  %v5071_v39 = vpop.f32.mrb[40].mxu1 }
 0x12c   :  { %6060 = vst [vmem:[#allocation19_spill] sm:$0xff] %v5071_v39  ;;  %v1479_v42 = vadd.f32 %v1478_v32, %v4838_v1  ;;  %v1480_v44 = vpop.f32.mrb[41].mxu0  ;;  %v5080_v45 = vpop.f32.mrb[41].mxu1 }
 0x12d   :  { %6061 = vst [vmem:[#allocation20_spill] sm:$0xff] %v5080_v45  ;;  %v1481_v49 = vadd.f32 %v1480_v44, %v4841_v2  ;;  %v1482_v54 = vpop.f32.mrb[42].mxu0  ;;  %v5083_v57 = vpop.f32.mrb[42].mxu1 }
 0x12e   :  { %6062 = vst [vmem:[#allocation21_spill] sm:$0xff] %v5083_v57  ;;  %v2697_v61 = vmax.f32 %v1479_v42, 0.0  ;;  %v1483_v62 = vadd.f32 %v1482_v54, %v4838_v1  ;;  %v1484_v0 = vpop.f32.mrb[43].mxu0  ;;  %v5086_v8 = vpop.f32.mrb[43].mxu1 }
 0x12f   :  { %6063 = vst [vmem:[#allocation22_spill] sm:$0xff] %v5086_v8  ;;  %v2698_v11 = vmax.f32 %v1481_v49, 0.0  ;;  %v1485_v15 = vadd.f32 %v1484_v0, %v4841_v2 }
 0x130   :  { %v3190_v21 = vadd.f32 %v3189_v28, %v2697_v61  ;;  %v2699_v22 = vmax.f32 %v1483_v62, 0.0  ;;  %4209 = vmatmul.mubr.msk.bf16.gmra.mrb[148].mxu0 %vm952_vm1, %v4418_v34  ;;  %4274 = vmatmul.mubr.msk.bf16.gmra.mrb[148].mxu1 %vm952_vm1, %v4421_v36  ;;  %v4420_v28 = vld [vmem:[%s6034_s0 + $0x130] sm:$0xff]  }
 0x131   :  { %v3227_v27 = vadd.f32 %v3226_v31, %v2698_v11  ;;  %v2700_v32 = vmax.f32 %v1485_v15, 0.0  ;;  %1756 = vmatprep.mubr.bf16.mxu0 %v6042_v3  ;;  %2406 = vmatprep.mubr.bf16.mxu1 %v6042_v3  ;;  %v4425_v31 = vld [vmem:[%s6034_s0 + $0x338] sm:$0xff]  }
 0x132   :  { %v3191_v42 = vadd.f32 %v3190_v21, %v2699_v22 }
 0x133   :  { %v3228_v44 = vadd.f32 %v3227_v27, %v2700_v32  ;;  %v1488_v54 = vpop.f32.mrb[44].mxu0  ;;  %v5093_v57 = vpop.f32.mrb[44].mxu1 }
 0x134   :  { %6064 = vst [vmem:[#allocation23_spill] sm:$0xff] %v5093_v57  ;;  %v1489_v49 = vadd.f32 %v1488_v54, %v4838_v1  ;;  %v1490_v0 = vpop.f32.mrb[45].mxu0  ;;  %v5102_v34 = vpop.f32.mrb[45].mxu1  ;;  %v6068_v57 = vmov 0  }
 0x135   :  { %6065 = vst [vmem:[#allocation24_spill] sm:$0xff] %v5102_v34  ;;  %v1491_v36 = vadd.f32 %v1490_v0, %v4841_v2  ;;  %v1492_v61 = vpop.f32.mrb[46].mxu0  ;;  %v5105_v62 = vpop.f32.mrb[46].mxu1 }
 0x136   :  { %6066 = vst [vmem:[#allocation25_spill] sm:$0xff] %v5105_v62  ;;  %v2701_v11 = vmax.f32 %v1489_v49, 0.0  ;;  %v1493_v15 = vadd.f32 %v1492_v61, %v4838_v1  ;;  %v1494_v21 = vpop.f32.mrb[47].mxu0  ;;  %v5108_v22 = vpop.f32.mrb[47].mxu1 }
 0x137   :  { %6067 = vst [vmem:[#allocation26_spill] sm:$0xff] %v5108_v22  ;;  %v2702_v27 = vmax.f32 %v1491_v36, 0.0  ;;  %v1495_v32 = vadd.f32 %v1494_v21, %v4841_v2 }
 0x138   :  { %v3192_v54 = vadd.f32 %v3191_v42, %v2701_v11  ;;  %v2703_v3 = vmax.f32 %v1493_v15, 0.0  ;;  %4210 = vmatmul.mubr.msk.bf16.gmra.mrb[152].mxu0 %vm952_vm1, %v4420_v28  ;;  %4275 = vmatmul.mubr.msk.bf16.gmra.mrb[152].mxu1 %vm952_vm1, %v4425_v31  ;;  %v4424_v42 = vld [vmem:[%s6034_s0 + $0x138] sm:$0xff]  }
 0x139   :  { %v3229_v34 = vadd.f32 %v3228_v44, %v2702_v27  ;;  %v2704_v0 = vmax.f32 %v1495_v32, 0.0  ;;  %1766 = vmatprep.mubr.bf16.mxu0 %v6068_v57  ;;  %2416 = vmatprep.mubr.bf16.mxu1 %v6068_v57  ;;  %v4427_v44 = vld [vmem:[%s6034_s0 + $0x340] sm:$0xff]  }
 0x13a   :  { %v3193_v49 = vadd.f32 %v3192_v54, %v2703_v3 }
 0x13b   :  { %v3230_v61 = vadd.f32 %v3229_v34, %v2704_v0  ;;  %v1498_v62 = vpop.f32.mrb[48].mxu0  ;;  %v5115_v8 = vpop.f32.mrb[48].mxu1 }
 0x13c   :  { %6069 = vst [vmem:[#allocation27_spill] sm:$0xff] %v5115_v8  ;;  %v1499_v36 = vadd.f32 %v1498_v62, %v4838_v1  ;;  %v1500_v21 = vpop.f32.mrb[49].mxu0  ;;  %v5124_v28 = vpop.f32.mrb[49].mxu1 }
 0x13d   :  { %6070 = vst [vmem:[#allocation28_spill] sm:$0xff] %v5124_v28  ;;  %v1501_v31 = vadd.f32 %v1500_v21, %v4841_v2  ;;  %v1502_v3 = vpop.f32.mrb[50].mxu0  ;;  %v5127_v34 = vpop.f32.mrb[50].mxu1  ;;  %v4458_v21 = vld [vmem:[%s6037_s3 + $0x50] sm:$0xff]  }
 0x13e   :  { %6071 = vst [vmem:[#allocation29_spill] sm:$0xff] %v5127_v34  ;;  %v2705_v11 = vmax.f32 %v1499_v36, 0.0  ;;  %v1503_v15 = vadd.f32 %v1502_v3, %v4838_v1  ;;  %v1504_v62 = vpop.f32.mrb[51].mxu0  ;;  %v5130_v27 = vpop.f32.mrb[51].mxu1  ;;  %4323 = vmatprep.subr.bf16.mxu1 %v4458_v21 }
 0x13f   :  { %6072 = vst [vmem:[#allocation30_spill] sm:$0xff] %v5130_v27  ;;  %v2706_v32 = vmax.f32 %v1501_v31, 0.0  ;;  %v1505_v54 = vadd.f32 %v1504_v62, %v4841_v2  ;;  %v4459_v31 = vld [vmem:[%s6037_s3 + $0x10] sm:$0xff]   ;;  %v4429_v62 = vld [vmem:[%s6034_s0 + $0x348] sm:$0xff]  }
 0x140   :  { %v3194_v0 = vadd.f32 %v3193_v49, %v2705_v11  ;;  %v2707_v8 = vmax.f32 %v1503_v15, 0.0  ;;  %4211 = vmatmul.mubr.msk.bf16.gmra.mrb[156].mxu0 %vm952_vm1, %v4424_v42  ;;  %4276 = vmatmul.mubr.msk.bf16.gmra.mrb[156].mxu1 %vm952_vm1, %v4427_v44 }
 0x141   :  { %v3231_v34 = vadd.f32 %v3230_v61, %v2706_v32  ;;  %v2708_v36 = vmax.f32 %v1505_v54, 0.0  ;;  %1776 = vmatprep.mubr.bf16.mxu0 %v6068_v57  ;;  %2426 = vmatprep.mubr.bf16.mxu1 %v6068_v57  ;;  %v4426_v61 = vld [vmem:[%s6034_s0 + $0x140] sm:$0xff]  }
 0x142   :  { %v3195_v49 = vadd.f32 %v3194_v0, %v2707_v8  ;;  %4324 = vmatpush3.bf16.msra.mxu1 %v4459_v31 }
 0x143   :  { %v3232_v3 = vadd.f32 %v3231_v34, %v2708_v36  ;;  %v1508_v42 = vpop.f32.mrb[52].mxu0  ;;  %v5143_v11 = vpop.f32.mrb[52].mxu1 }
 0x144   :  { %6073 = vst [vmem:[#allocation31_spill] sm:$0xff] %v5143_v11  ;;  %v1509_v44 = vadd.f32 %v1508_v42, %v4838_v1  ;;  %v1510_v15 = vpop.f32.mrb[53].mxu0  ;;  %v5152_v32 = vpop.f32.mrb[53].mxu1 }
 0x145   :  { %6074 = vst [vmem:[#allocation32_spill] sm:$0xff] %v5152_v32  ;;  %v1511_v8 = vadd.f32 %v1510_v15, %v4841_v2  ;;  %v1512_v34 = vpop.f32.mrb[54].mxu0  ;;  %v5155_v54 = vpop.f32.mrb[54].mxu1 }
 0x146   :  { %6075 = vst [vmem:[#allocation33_spill] sm:$0xff] %v5155_v54  ;;  %v2709_v0 = vmax.f32 %v1509_v44, 0.0  ;;  %v1513_v21 = vadd.f32 %v1512_v34, %v4838_v1  ;;  %v1514_v36 = vpop.f32.mrb[55].mxu0  ;;  %v5158_v31 = vpop.f32.mrb[55].mxu1 }
 0x147   :  { %6076 = vst [vmem:[#allocation34_spill] sm:$0xff] %v5158_v31  ;;  %v2710_v42 = vmax.f32 %v1511_v8, 0.0  ;;  %v1515_v11 = vadd.f32 %v1514_v36, %v4841_v2 }
 0x148   :  { %v3196_v27 = vadd.f32 %v3195_v49, %v2709_v0  ;;  %v2711_v28 = vmax.f32 %v1513_v21, 0.0  ;;  %4212 = vmatmul.mubr.msk.bf16.gmra.mrb[160].mxu0 %vm952_vm1, %v4426_v61  ;;  %4277 = vmatmul.mubr.msk.bf16.gmra.mrb[160].mxu1 %vm952_vm1, %v4429_v62  ;;  %v4428_v49 = vld [vmem:[%s6034_s0 + $0x148] sm:$0xff]  }
 0x149   :  { %v3233_v32 = vadd.f32 %v3232_v3, %v2710_v42  ;;  %v2712_v15 = vmax.f32 %v1515_v11, 0.0  ;;  %1786 = vmatprep.mubr.bf16.mxu0 %v6068_v57  ;;  %2436 = vmatprep.mubr.bf16.mxu1 %v6068_v57  ;;  %v4431_v3 = vld [vmem:[%s6034_s0 + $0x350] sm:$0xff]  }
 0x14a   :  { %v3197_v44 = vadd.f32 %v3196_v27, %v2711_v28 }
 0x14b   :  { %v3234_v34 = vadd.f32 %v3233_v32, %v2712_v15  ;;  %v1518_v54 = vpop.f32.mrb[56].mxu0  ;;  %v5165_v22 = vpop.f32.mrb[56].mxu1 }
 0x14c   :  { %6077 = vst [vmem:[#allocation35_spill] sm:$0xff] %v5165_v22  ;;  %v1519_v8 = vadd.f32 %v1518_v54, %v4838_v1  ;;  %v1520_v36 = vpop.f32.mrb[57].mxu0  ;;  %v5174_v11 = vpop.f32.mrb[57].mxu1 }
 0x14d   :  { %6078 = vst [vmem:[#allocation36_spill] sm:$0xff] %v5174_v11  ;;  %v1521_v61 = vadd.f32 %v1520_v36, %v4841_v2  ;;  %v1522_v28 = vpop.f32.mrb[58].mxu0  ;;  %v5177_v27 = vpop.f32.mrb[58].mxu1 }
 0x14e   :  { %6079 = vst [vmem:[#allocation37_spill] sm:$0xff] %v5177_v27  ;;  %v2713_v62 = vmax.f32 %v1519_v8, 0.0  ;;  %v1523_v32 = vadd.f32 %v1522_v28, %v4838_v1  ;;  %v1524_v54 = vpop.f32.mrb[59].mxu0  ;;  %v5180_v0 = vpop.f32.mrb[59].mxu1 }
 0x14f   :  { %6080 = vst [vmem:[#allocation38_spill] sm:$0xff] %v5180_v0  ;;  %v2714_v21 = vmax.f32 %v1521_v61, 0.0  ;;  %v1525_v42 = vadd.f32 %v1524_v54, %v4841_v2 }
 0x150   :  { %v3198_v15 = vadd.f32 %v3197_v44, %v2713_v62  ;;  %v2715_v22 = vmax.f32 %v1523_v32, 0.0  ;;  %4213 = vmatmul.mubr.msk.bf16.gmra.mrb[164].mxu0 %vm952_vm1, %v4428_v49  ;;  %4278 = vmatmul.mubr.msk.bf16.gmra.mrb[164].mxu1 %vm952_vm1, %v4431_v3  ;;  %v4430_v44 = vld [vmem:[%s6034_s0 + $0x150] sm:$0xff]  }
 0x151   :  { %v3235_v11 = vadd.f32 %v3234_v34, %v2714_v21  ;;  %v2716_v36 = vmax.f32 %v1525_v42, 0.0  ;;  %1796 = vmatprep.mubr.bf16.mxu0 %v6068_v57  ;;  %2446 = vmatprep.mubr.bf16.mxu1 %v6068_v57  ;;  %v4433_v34 = vld [vmem:[%s6034_s0 + $0x358] sm:$0xff]  }
 0x152   :  { %v3199_v8 = vadd.f32 %v3198_v15, %v2715_v22 }
 0x153   :  { %v3236_v28 = vadd.f32 %v3235_v11, %v2716_v36  ;;  %v1528_v27 = vpop.f32.mrb[60].mxu0  ;;  %v2178_v31 = vpop.f32.mrb[60].mxu1 }
 0x154   :  { %v1529_v61 = vadd.f32 %v1528_v27, %v4838_v1  ;;  %v1530_v0 = vpop.f32.mrb[61].mxu0  ;;  %v2179_v49 = vadd.f32 %v2178_v31, %v4838_v1  ;;  %v2180_v3 = vpop.f32.mrb[61].mxu1 }
 0x155   :  { %v1531_v62 = vadd.f32 %v1530_v0, %v4841_v2  ;;  %v1532_v22 = vpop.f32.mrb[62].mxu0  ;;  %v2181_v11 = vadd.f32 %v2180_v3, %v4841_v2  ;;  %v2182_v32 = vpop.f32.mrb[62].mxu1 }
 0x156   :  { %v2717_v54 = vmax.f32 %v1529_v61, 0.0  ;;  %v1533_v27 = vadd.f32 %v1532_v22, %v4838_v1  ;;  %v1534_v21 = vpop.f32.mrb[63].mxu0  ;;  %v2977_v42 = vmax.f32 %v2179_v49, 0.0  ;;  %v2183_v15 = vadd.f32 %v2182_v32, %v4838_v1  ;;  %v2184_v36 = vpop.f32.mrb[63].mxu1 }
 0x157   :  { %v2718_v45 = vmax.f32 %v1531_v62, 0.0  ;;  %v1535_v39 = vadd.f32 %v1534_v21, %v4841_v2  ;;  %v2978_v4 = vmax.f32 %v2181_v11, 0.0  ;;  %v2185_v31 = vadd.f32 %v2184_v36, %v4841_v2 }
 0x158   :  { %v3200_v60 = vadd.f32 %v3199_v8, %v2717_v54  ;;  %v2719_v0 = vmax.f32 %v1533_v27, 0.0  ;;  %4214 = vmatmul.mubr.msk.bf16.gmra.mrb[168].mxu0 %vm952_vm1, %v4430_v44  ;;  %4279 = vmatmul.mubr.msk.bf16.gmra.mrb[168].mxu1 %vm952_vm1, %v4433_v34  ;;  %v2979_v61 = vmax.f32 %v2183_v15, 0.0 }
 0x159   :  { %v3237_v3 = vadd.f32 %v3236_v28, %v2718_v45  ;;  %v2720_v22 = vmax.f32 %v1535_v39, 0.0  ;;  %1806 = vmatprep.mubr.bf16.mxu0 %v6068_v57  ;;  %2456 = vmatprep.mubr.bf16.mxu1 %v6068_v57  ;;  %v2980_v49 = vmax.f32 %v2185_v31, 0.0  ;;  %v4432_v39 = vld [vmem:[%s6034_s0 + $0x158] sm:$0xff]   ;;  %v4435_v45 = vld [vmem:[%s6034_s0 + $0x360] sm:$0xff]  }
 0x15a   :  { %v5205_v62 = vadd.f32 %v3200_v60, %v2719_v0  ;;  %v3541_v32 = vadd.f32 %v2979_v61, %v2977_v42 }
 0x15b   :  { %v5207_v11 = vadd.f32 %v3237_v3, %v2720_v22  ;;  %v1538_v21 = vpop.f32.mrb[64].mxu0  ;;  %v3578_v8 = vadd.f32 %v2980_v49, %v2978_v4  ;;  %v2188_v54 = vpop.f32.mrb[64].mxu1 }
 0x15c   :  { %v1539_v44 = vadd.f32 %v1538_v21, %v4838_v1  ;;  %v1540_v27 = vpop.f32.mrb[65].mxu0  ;;  %v2189_v60 = vadd.f32 %v2188_v54, %v4838_v1  ;;  %v2190_v28 = vpop.f32.mrb[65].mxu1 }
 0x15d   :  { %v1541_v34 = vadd.f32 %v1540_v27, %v4841_v2  ;;  %v1542_v42 = vpop.f32.mrb[66].mxu0  ;;  %v2191_v4 = vadd.f32 %v2190_v28, %v4841_v2  ;;  %v2192_v15 = vpop.f32.mrb[66].mxu1 }
 0x15e   :  { %v1543_v36 = vadd.f32 %v1542_v42, %v4838_v1  ;;  %v1544_v31 = vpop.f32.mrb[67].mxu0  ;;  %v2981_v0 = vmax.f32 %v2189_v60, 0.0  ;;  %v2194_v61 = vpop.f32.mrb[67].mxu1  ;;  %v2721_v49 = vmax.f32 %v1539_v44, 0.0  ;;  %v2193_v27 = vadd.f32 %v2192_v15, %v4838_v1  ;;  %v4437_v15 = vld [vmem:[%s6034_s0 + $0x368] sm:$0xff]  }
 0x15f   :  { %v1545_v3 = vadd.f32 %v1544_v31, %v4841_v2  ;;  %v2982_v22 = vmax.f32 %v2191_v4, 0.0  ;;  %v2722_v50 = vmax.f32 %v1541_v34, 0.0  ;;  %v2195_v42 = vadd.f32 %v2194_v61, %v4841_v2  ;;  %v4434_v34 = vld [vmem:[%s6034_s0 + $0x160] sm:$0xff]  }
 0x160   :  { %v2723_v21 = vmax.f32 %v1543_v36, 0.0  ;;  %4215 = vmatmul.mubr.msk.bf16.gmra.mrb[172].mxu0 %vm952_vm1, %v4432_v39  ;;  %4280 = vmatmul.mubr.msk.bf16.gmra.mrb[172].mxu1 %vm952_vm1, %v4435_v45  ;;  %v3542_v54 = vadd.f32 %v3541_v32, %v2981_v0  ;;  %v2983_v4 = vmax.f32 %v2193_v27, 0.0 }
 0x161   :  { %v2724_v28 = vmax.f32 %v1545_v3, 0.0  ;;  %1816 = vmatprep.mubr.bf16.mxu0 %v6068_v57  ;;  %2466 = vmatprep.mubr.bf16.mxu1 %v6068_v57  ;;  %v3579_v60 = vadd.f32 %v3578_v8, %v2982_v22  ;;  %v2984_v41 = vmax.f32 %v2195_v42, 0.0 }
 0x162   :  { %v3245_v31 = vadd.f32 %v2723_v21, %v2721_v49  ;;  %v3543_v8 = vadd.f32 %v3542_v54, %v2983_v4 }
 0x163   :  { %v3282_v44 = vadd.f32 %v2724_v28, %v2722_v50  ;;  %v1548_v36 = vpop.f32.mrb[68].mxu0  ;;  %v2198_v39 = vpop.f32.mrb[68].mxu1  ;;  %v3580_v22 = vadd.f32 %v3579_v60, %v2984_v41 }
 0x164   :  { %v1549_v45 = vadd.f32 %v1548_v36, %v4838_v1  ;;  %v1550_v32 = vpop.f32.mrb[69].mxu0  ;;  %v2199_v0 = vadd.f32 %v2198_v39, %v4838_v1  ;;  %v2200_v61 = vpop.f32.mrb[69].mxu1 }
 0x165   :  { %v1551_v50 = vadd.f32 %v1550_v32, %v4841_v2  ;;  %v1552_v3 = vpop.f32.mrb[70].mxu0  ;;  %v2201_v49 = vadd.f32 %v2200_v61, %v4841_v2  ;;  %v2202_v21 = vpop.f32.mrb[70].mxu1 }
 0x166   :  { %v2725_v27 = vmax.f32 %v1549_v45, 0.0  ;;  %v1553_v28 = vadd.f32 %v1552_v3, %v4838_v1  ;;  %v1554_v42 = vpop.f32.mrb[71].mxu0  ;;  %v2985_v36 = vmax.f32 %v2199_v0, 0.0  ;;  %v2204_v18 = vpop.f32.mrb[71].mxu1  ;;  %v2203_v60 = vadd.f32 %v2202_v21, %v4838_v1 }
 0x167   :  { %v2726_v7 = vmax.f32 %v1551_v50, 0.0  ;;  %v1555_v63 = vadd.f32 %v1554_v42, %v4841_v2  ;;  %v2986_v54 = vmax.f32 %v2201_v49, 0.0  ;;  %v2205_v61 = vadd.f32 %v2204_v18, %v4841_v2 }
 0x168   :  { %v3246_v4 = vadd.f32 %v3245_v31, %v2725_v27  ;;  %v2727_v39 = vmax.f32 %v1553_v28, 0.0  ;;  %4216 = vmatmul.mubr.msk.bf16.gmra.mrb[176].mxu0 %vm952_vm1, %v4434_v34  ;;  %4281 = vmatmul.mubr.msk.bf16.gmra.mrb[176].mxu1 %vm952_vm1, %v4437_v15  ;;  %v3544_v41 = vadd.f32 %v3543_v8, %v2985_v36  ;;  %v2987_v3 = vmax.f32 %v2203_v60, 0.0 }
 0x169   :  { %v3283_v32 = vadd.f32 %v3282_v44, %v2726_v7  ;;  %v2728_v45 = vmax.f32 %v1555_v63, 0.0  ;;  %1826 = vmatprep.mubr.bf16.mxu0 %v6068_v57  ;;  %2476 = vmatprep.mubr.bf16.mxu1 %v6068_v57  ;;  %v3581_v0 = vadd.f32 %v3580_v22, %v2986_v54  ;;  %v2988_v27 = vmax.f32 %v2205_v61, 0.0  ;;  %v4436_v63 = vld [vmem:[%s6034_s0 + $0x168] sm:$0xff]   ;;  %v4439_v7 = vld [vmem:[%s6034_s0 + $0x370] sm:$0xff]  }
 0x16a   :  { %v3247_v50 = vadd.f32 %v3246_v4, %v2727_v39  ;;  %v3545_v44 = vadd.f32 %v3544_v41, %v2987_v3 }
 0x16b   :  { %v3284_v31 = vadd.f32 %v3283_v32, %v2728_v45  ;;  %v1558_v49 = vpop.f32.mrb[72].mxu0  ;;  %v2208_v34 = vpop.f32.mrb[72].mxu1  ;;  %v3582_v42 = vadd.f32 %v3581_v0, %v2988_v27 }
 0x16c   :  { %v1559_v15 = vadd.f32 %v1558_v49, %v4838_v1  ;;  %v1560_v8 = vpop.f32.mrb[73].mxu0  ;;  %v2209_v18 = vadd.f32 %v2208_v34, %v4838_v1  ;;  %v2210_v22 = vpop.f32.mrb[73].mxu1 }
 0x16d   :  { %v1561_v21 = vadd.f32 %v1560_v8, %v4841_v2  ;;  %v1562_v28 = vpop.f32.mrb[74].mxu0  ;;  %v2211_v36 = vadd.f32 %v2210_v22, %v4841_v2  ;;  %v2212_v54 = vpop.f32.mrb[74].mxu1 }
 0x16e   :  { %v2729_v4 = vmax.f32 %v1559_v15, 0.0  ;;  %v1563_v39 = vadd.f32 %v1562_v28, %v4838_v1  ;;  %v1564_v60 = vpop.f32.mrb[75].mxu0  ;;  %v2989_v32 = vmax.f32 %v2209_v18, 0.0  ;;  %v2213_v45 = vadd.f32 %v2212_v54, %v4838_v1  ;;  %v2214_v61 = vpop.f32.mrb[75].mxu1 }
 0x16f   :  { %v2730_v49 = vmax.f32 %v1561_v21, 0.0  ;;  %v1565_v41 = vadd.f32 %v1564_v60, %v4841_v2  ;;  %v2990_v3 = vmax.f32 %v2211_v36, 0.0  ;;  %v2215_v34 = vadd.f32 %v2214_v61, %v4841_v2 }
 0x170   :  { %v3248_v8 = vadd.f32 %v3247_v50, %v2729_v4  ;;  %v2731_v56 = vmax.f32 %v1563_v39, 0.0  ;;  %4217 = vmatmul.mubr.msk.bf16.gmra.mrb[180].mxu0 %vm952_vm1, %v4436_v63  ;;  %4282 = vmatmul.mubr.msk.bf16.gmra.mrb[180].mxu1 %vm952_vm1, %v4439_v7  ;;  %v3546_v0 = vadd.f32 %v3545_v44, %v2989_v32  ;;  %v2991_v27 = vmax.f32 %v2213_v45, 0.0  ;;  %v4443_v7 = vld [vmem:[%s6034_s0 + $0x378] sm:$0xff]  }
 0x171   :  { %v3285_v15 = vadd.f32 %v3284_v31, %v2730_v49  ;;  %v2732_v22 = vmax.f32 %v1565_v41, 0.0  ;;  %1836 = vmatprep.mubr.bf16.mxu0 %v6068_v57  ;;  %2486 = vmatprep.mubr.bf16.mxu1 %v6068_v57  ;;  %v3583_v18 = vadd.f32 %v3582_v42, %v2990_v3  ;;  %v2992_v21 = vmax.f32 %v2215_v34, 0.0  ;;  %v4438_v31 = vld [vmem:[%s6034_s0 + $0x170] sm:$0xff]  }
 0x172   :  { %v3249_v28 = vadd.f32 %v3248_v8, %v2731_v56  ;;  %v3547_v36 = vadd.f32 %v3546_v0, %v2991_v27 }
 0x173   :  { %v3286_v54 = vadd.f32 %v3285_v15, %v2732_v22  ;;  %v1568_v60 = vpop.f32.mrb[76].mxu0  ;;  %v3584_v50 = vadd.f32 %v3583_v18, %v2992_v21  ;;  %v2218_v4 = vpop.f32.mrb[76].mxu1 }
 0x174   :  { %v1569_v63 = vadd.f32 %v1568_v60, %v4838_v1  ;;  %v1570_v39 = vpop.f32.mrb[77].mxu0  ;;  %v2219_v44 = vadd.f32 %v2218_v4, %v4838_v1  ;;  %v2220_v42 = vpop.f32.mrb[77].mxu1 }
 0x175   :  { %v1571_v56 = vadd.f32 %v1570_v39, %v4841_v2  ;;  %v1572_v32 = vpop.f32.mrb[78].mxu0  ;;  %v2221_v45 = vadd.f32 %v2220_v42, %v4841_v2  ;;  %v2222_v61 = vpop.f32.mrb[78].mxu1 }
 0x176   :  { %v2733_v49 = vmax.f32 %v1569_v63, 0.0  ;;  %v1573_v41 = vadd.f32 %v1572_v32, %v4838_v1  ;;  %v1574_v3 = vpop.f32.mrb[79].mxu0  ;;  %v2993_v34 = vmax.f32 %v2219_v44, 0.0  ;;  %v2223_v8 = vadd.f32 %v2222_v61, %v4838_v1  ;;  %v2224_v0 = vpop.f32.mrb[79].mxu1 }
 0x177   :  { %v2734_v27 = vmax.f32 %v1571_v56, 0.0  ;;  %v1575_v15 = vadd.f32 %v1574_v3, %v4841_v2  ;;  %v2994_v22 = vmax.f32 %v2221_v45, 0.0  ;;  %v2225_v18 = vadd.f32 %v2224_v0, %v4841_v2 }
 0x178   :  { %v3250_v21 = vadd.f32 %v3249_v28, %v2733_v49  ;;  %v2735_v60 = vmax.f32 %v1573_v41, 0.0  ;;  %4218 = vmatmul.mubr.msk.bf16.gmra.mrb[184].mxu0 %vm952_vm1, %v4438_v31  ;;  %4283 = vmatmul.mubr.msk.bf16.gmra.mrb[184].mxu1 %vm952_vm1, %v4443_v7  ;;  %v3548_v4 = vadd.f32 %v3547_v36, %v2993_v34  ;;  %v2995_v63 = vmax.f32 %v2223_v8, 0.0  ;;  %v4476_v31 = vld [vmem:[%s6037_s3 + $0x58] sm:$0xff]  }
 0x179   :  { %v3287_v39 = vadd.f32 %v3286_v54, %v2734_v27  ;;  %v2736_v42 = vmax.f32 %v1575_v15, 0.0  ;;  %1846 = vmatprep.mubr.bf16.mxu0 %v6068_v57  ;;  %2496 = vmatprep.mubr.bf16.mxu1 %v6068_v57  ;;  %v3585_v44 = vadd.f32 %v3584_v50, %v2994_v22  ;;  %v2996_v56 = vmax.f32 %v2225_v18, 0.0  ;;  %v4442_v7 = vld [vmem:[%s6034_s0 + $0x178] sm:$0xff]   ;;  %v4445_v50 = vld [vmem:[%s6034_s0 + $0x380] sm:$0xff]  }
 0x17a   :  { %v3251_v32 = vadd.f32 %v3250_v21, %v2735_v60  ;;  %v3549_v45 = vadd.f32 %v3548_v4, %v2995_v63  ;;  %4325 = vmatprep.subr.bf16.mxu1 %v4476_v31 }
 0x17b   :  { %v3288_v61 = vadd.f32 %v3287_v39, %v2736_v42  ;;  %v1578_v3 = vpop.f32.mrb[80].mxu0  ;;  %v3586_v28 = vadd.f32 %v3585_v44, %v2996_v56  ;;  %v2228_v49 = vpop.f32.mrb[80].mxu1 }
 0x17c   :  { %v1579_v36 = vadd.f32 %v1578_v3, %v4838_v1  ;;  %v1580_v54 = vpop.f32.mrb[81].mxu0  ;;  %v2229_v41 = vadd.f32 %v2228_v49, %v4838_v1  ;;  %v2230_v34 = vpop.f32.mrb[81].mxu1 }
 0x17d   :  { %v1581_v8 = vadd.f32 %v1580_v54, %v4841_v2  ;;  %v1582_v0 = vpop.f32.mrb[82].mxu0  ;;  %v2231_v27 = vadd.f32 %v2230_v34, %v4841_v2  ;;  %v2232_v15 = vpop.f32.mrb[82].mxu1  ;;  %v4477_v54 = vld [vmem:[%s6037_s3 + $0x18] sm:$0xff]  }
 0x17e   :  { %v2737_v22 = vmax.f32 %v1579_v36, 0.0  ;;  %v1583_v18 = vadd.f32 %v1582_v0, %v4838_v1  ;;  %v1584_v21 = vpop.f32.mrb[83].mxu0  ;;  %v2997_v60 = vmax.f32 %v2229_v41, 0.0  ;;  %v2233_v4 = vadd.f32 %v2232_v15, %v4838_v1  ;;  %v2234_v63 = vpop.f32.mrb[83].mxu1  ;;  %4326 = vmatpush3.bf16.msra.mxu1 %v4477_v54 }
 0x17f   :  { %v2738_v39 = vmax.f32 %v1581_v8, 0.0  ;;  %v1585_v42 = vadd.f32 %v1584_v21, %v4841_v2  ;;  %v2998_v44 = vmax.f32 %v2231_v27, 0.0  ;;  %v2235_v56 = vadd.f32 %v2234_v63, %v4841_v2  ;;  %v4447_v21 = vld [vmem:[%s6034_s0 + $0x388] sm:$0xff]  }
 0x180   :  { %v3252_v3 = vadd.f32 %v3251_v32, %v2737_v22  ;;  %v2739_v49 = vmax.f32 %v1583_v18, 0.0  ;;  %4219 = vmatmul.mubr.msk.bf16.gmra.mrb[188].mxu0 %vm952_vm1, %v4442_v7  ;;  %4284 = vmatmul.mubr.msk.bf16.gmra.mrb[188].mxu1 %vm952_vm1, %v4445_v50  ;;  %v3550_v31 = vadd.f32 %v3549_v45, %v2997_v60  ;;  %v2999_v36 = vmax.f32 %v2233_v4, 0.0 }
 0x181   :  { %v3289_v41 = vadd.f32 %v3288_v61, %v2738_v39  ;;  %v2740_v34 = vmax.f32 %v1585_v42, 0.0  ;;  %1856 = vmatprep.mubr.bf16.mxu0 %v6068_v57  ;;  %2506 = vmatprep.mubr.bf16.mxu1 %v6068_v57  ;;  %v3587_v8 = vadd.f32 %v3586_v28, %v2998_v44  ;;  %v3000_v0 = vmax.f32 %v2235_v56, 0.0  ;;  %v4444_v61 = vld [vmem:[%s6034_s0 + $0x180] sm:$0xff]  }
 0x182   :  { %v3253_v32 = vadd.f32 %v3252_v3, %v2739_v49  ;;  %v3551_v27 = vadd.f32 %v3550_v31, %v2999_v36 }
 0x183   :  { %v3290_v7 = vadd.f32 %v3289_v41, %v2740_v34  ;;  %v1588_v15 = vpop.f32.mrb[84].mxu0  ;;  %v3588_v50 = vadd.f32 %v3587_v8, %v3000_v0  ;;  %v2238_v45 = vpop.f32.mrb[84].mxu1 }
 0x184   :  { %v1589_v22 = vadd.f32 %v1588_v15, %v4838_v1  ;;  %v1590_v18 = vpop.f32.mrb[85].mxu0  ;;  %v2239_v28 = vadd.f32 %v2238_v45, %v4838_v1  ;;  %v2240_v60 = vpop.f32.mrb[85].mxu1 }
 0x185   :  { %v1591_v4 = vadd.f32 %v1590_v18, %v4841_v2  ;;  %v1592_v63 = vpop.f32.mrb[86].mxu0  ;;  %v2241_v39 = vadd.f32 %v2240_v60, %v4841_v2  ;;  %v2242_v42 = vpop.f32.mrb[86].mxu1 }
 0x186   :  { %v2741_v44 = vmax.f32 %v1589_v22, 0.0  ;;  %v1593_v56 = vadd.f32 %v1592_v63, %v4838_v1  ;;  %v1594_v3 = vpop.f32.mrb[87].mxu0  ;;  %v3001_v49 = vmax.f32 %v2239_v28, 0.0  ;;  %v2243_v31 = vadd.f32 %v2242_v42, %v4838_v1  ;;  %v2244_v36 = vpop.f32.mrb[87].mxu1 }
 0x187   :  { %v2742_v54 = vmax.f32 %v1591_v4, 0.0  ;;  %v1595_v41 = vadd.f32 %v1594_v3, %v4841_v2  ;;  %v3002_v34 = vmax.f32 %v2241_v39, 0.0  ;;  %v2245_v8 = vadd.f32 %v2244_v36, %v4841_v2 }
 0x188   :  { %v3254_v0 = vadd.f32 %v3253_v32, %v2741_v44  ;;  %v2743_v15 = vmax.f32 %v1593_v56, 0.0  ;;  %4220 = vmatmul.mubr.msk.bf16.gmra.mrb[192].mxu0 %vm952_vm1, %v4444_v61  ;;  %4285 = vmatmul.mubr.msk.bf16.gmra.mrb[192].mxu1 %vm952_vm1, %v4447_v21  ;;  %v3552_v45 = vadd.f32 %v3551_v27, %v3001_v49  ;;  %v3003_v22 = vmax.f32 %v2243_v31, 0.0  ;;  %v4446_v27 = vld [vmem:[%s6034_s0 + $0x188] sm:$0xff]  }
 0x189   :  { %v3291_v18 = vadd.f32 %v3290_v7, %v2742_v54  ;;  %v2744_v60 = vmax.f32 %v1595_v41, 0.0  ;;  %1866 = vmatprep.mubr.bf16.mxu0 %v6068_v57  ;;  %2516 = vmatprep.mubr.bf16.mxu1 %v6068_v57  ;;  %v3589_v28 = vadd.f32 %v3588_v50, %v3002_v34  ;;  %v3004_v4 = vmax.f32 %v2245_v8, 0.0  ;;  %v4449_v7 = vld [vmem:[%s6034_s0 + $0x390] sm:$0xff]  }
 0x18a   :  { %v3255_v63 = vadd.f32 %v3254_v0, %v2743_v15  ;;  %v3553_v39 = vadd.f32 %v3552_v45, %v3003_v22 }
 0x18b   :  { %v3292_v42 = vadd.f32 %v3291_v18, %v2744_v60  ;;  %v1598_v3 = vpop.f32.mrb[88].mxu0  ;;  %v3590_v32 = vadd.f32 %v3589_v28, %v3004_v4  ;;  %v2248_v44 = vpop.f32.mrb[88].mxu1 }
 0x18c   :  { %v1599_v61 = vadd.f32 %v1598_v3, %v4838_v1  ;;  %v1600_v56 = vpop.f32.mrb[89].mxu0  ;;  %v2249_v50 = vadd.f32 %v2248_v44, %v4838_v1  ;;  %v2250_v21 = vpop.f32.mrb[89].mxu1 }
 0x18d   :  { %v1601_v49 = vadd.f32 %v1600_v56, %v4841_v2  ;;  %v1602_v31 = vpop.f32.mrb[90].mxu0  ;;  %v2251_v36 = vadd.f32 %v2250_v21, %v4841_v2  ;;  %v2252_v54 = vpop.f32.mrb[90].mxu1 }
 0x18e   :  { %v2745_v41 = vmax.f32 %v1599_v61, 0.0  ;;  %v1603_v34 = vadd.f32 %v1602_v31, %v4838_v1  ;;  %v1604_v8 = vpop.f32.mrb[91].mxu0  ;;  %v3005_v0 = vmax.f32 %v2249_v50, 0.0  ;;  %v2253_v15 = vadd.f32 %v2252_v54, %v4838_v1  ;;  %v2254_v45 = vpop.f32.mrb[91].mxu1 }
 0x18f   :  { %v2746_v22 = vmax.f32 %v1601_v49, 0.0  ;;  %v1605_v18 = vadd.f32 %v1604_v8, %v4841_v2  ;;  %v3006_v60 = vmax.f32 %v2251_v36, 0.0  ;;  %v2255_v28 = vadd.f32 %v2254_v45, %v4841_v2 }
 0x190   :  { %v3256_v4 = vadd.f32 %v3255_v63, %v2745_v41  ;;  %v2747_v3 = vmax.f32 %v1603_v34, 0.0  ;;  %4221 = vmatmul.mubr.msk.bf16.gmra.mrb[196].mxu0 %vm952_vm1, %v4446_v27  ;;  %4286 = vmatmul.mubr.msk.bf16.gmra.mrb[196].mxu1 %vm952_vm1, %v4449_v7  ;;  %v3554_v44 = vadd.f32 %v3553_v39, %v3005_v0  ;;  %v3007_v61 = vmax.f32 %v2253_v15, 0.0  ;;  %v4448_v39 = vld [vmem:[%s6034_s0 + $0x190] sm:$0xff]  }
 0x191   :  { %v3293_v56 = vadd.f32 %v3292_v42, %v2746_v22  ;;  %v2748_v21 = vmax.f32 %v1605_v18, 0.0  ;;  %1876 = vmatprep.mubr.bf16.mxu0 %v6068_v57  ;;  %2526 = vmatprep.mubr.bf16.mxu1 %v6068_v57  ;;  %v3591_v50 = vadd.f32 %v3590_v32, %v3006_v60  ;;  %v3008_v49 = vmax.f32 %v2255_v28, 0.0  ;;  %v4451_v42 = vld [vmem:[%s6034_s0 + $0x398] sm:$0xff]  }
 0x192   :  { %v3257_v31 = vadd.f32 %v3256_v4, %v2747_v3  ;;  %v3555_v36 = vadd.f32 %v3554_v44, %v3007_v61 }
 0x193   :  { %v3294_v54 = vadd.f32 %v3293_v56, %v2748_v21  ;;  %v1608_v8 = vpop.f32.mrb[92].mxu0  ;;  %v3592_v63 = vadd.f32 %v3591_v50, %v3008_v49  ;;  %v2258_v41 = vpop.f32.mrb[92].mxu1 }
 0x194   :  { %v1609_v27 = vadd.f32 %v1608_v8, %v4838_v1  ;;  %v1610_v34 = vpop.f32.mrb[93].mxu0  ;;  %v2259_v32 = vadd.f32 %v2258_v41, %v4838_v1  ;;  %v2260_v7 = vpop.f32.mrb[93].mxu1 }
 0x195   :  { %v1611_v0 = vadd.f32 %v1610_v34, %v4841_v2  ;;  %v1612_v15 = vpop.f32.mrb[94].mxu0  ;;  %v2261_v45 = vadd.f32 %v2260_v7, %v4841_v2  ;;  %v2262_v22 = vpop.f32.mrb[94].mxu1 }
 0x196   :  { %v2749_v18 = vmax.f32 %v1609_v27, 0.0  ;;  %v1613_v60 = vadd.f32 %v1612_v15, %v4838_v1  ;;  %v1614_v28 = vpop.f32.mrb[95].mxu0  ;;  %v3009_v4 = vmax.f32 %v2259_v32, 0.0  ;;  %v2263_v3 = vadd.f32 %v2262_v22, %v4838_v1  ;;  %v2264_v44 = vpop.f32.mrb[95].mxu1 }
 0x197   :  { %v2750_v61 = vmax.f32 %v1611_v0, 0.0  ;;  %v1615_v56 = vadd.f32 %v1614_v28, %v4841_v2  ;;  %v3010_v21 = vmax.f32 %v2261_v45, 0.0  ;;  %v2265_v50 = vadd.f32 %v2264_v44, %v4841_v2 }
 0x198   :  { %v3258_v49 = vadd.f32 %v3257_v31, %v2749_v18  ;;  %v2751_v8 = vmax.f32 %v1613_v60, 0.0  ;;  %4222 = vmatmul.mubr.msk.bf16.gmra.mrb[200].mxu0 %vm952_vm1, %v4448_v39  ;;  %4287 = vmatmul.mubr.msk.bf16.gmra.mrb[200].mxu1 %vm952_vm1, %v4451_v42  ;;  %v3556_v41 = vadd.f32 %v3555_v36, %v3009_v4  ;;  %v3011_v27 = vmax.f32 %v2263_v3, 0.0  ;;  %v4450_v36 = vld [vmem:[%s6034_s0 + $0x198] sm:$0xff]  }
 0x199   :  { %v3295_v34 = vadd.f32 %v3294_v54, %v2750_v61  ;;  %v2752_v7 = vmax.f32 %v1615_v56, 0.0  ;;  %1886 = vmatprep.mubr.bf16.mxu0 %v6068_v57  ;;  %2536 = vmatprep.mubr.bf16.mxu1 %v6068_v57  ;;  %v3593_v32 = vadd.f32 %v3592_v63, %v3010_v21  ;;  %v3012_v0 = vmax.f32 %v2265_v50, 0.0  ;;  %v4453_v54 = vld [vmem:[%s6034_s0 + $0x3a0] sm:$0xff]  }
 0x19a   :  { %v3259_v15 = vadd.f32 %v3258_v49, %v2751_v8  ;;  %v3557_v45 = vadd.f32 %v3556_v41, %v3011_v27 }
 0x19b   :  { %v3296_v22 = vadd.f32 %v3295_v34, %v2752_v7  ;;  %v1618_v28 = vpop.f32.mrb[96].mxu0  ;;  %v3594_v31 = vadd.f32 %v3593_v32, %v3012_v0  ;;  %v2268_v18 = vpop.f32.mrb[96].mxu1 }
 0x19c   :  { %v1619_v39 = vadd.f32 %v1618_v28, %v4838_v1  ;;  %v1620_v60 = vpop.f32.mrb[97].mxu0  ;;  %v2269_v63 = vadd.f32 %v2268_v18, %v4838_v1  ;;  %v2270_v42 = vpop.f32.mrb[97].mxu1 }
 0x19d   :  { %v1621_v4 = vadd.f32 %v1620_v60, %v4841_v2  ;;  %v1622_v3 = vpop.f32.mrb[98].mxu0  ;;  %v2271_v44 = vadd.f32 %v2270_v42, %v4841_v2  ;;  %v2272_v61 = vpop.f32.mrb[98].mxu1 }
 0x19e   :  { %v2753_v56 = vmax.f32 %v1619_v39, 0.0  ;;  %v1623_v21 = vadd.f32 %v1622_v3, %v4838_v1  ;;  %v1624_v50 = vpop.f32.mrb[99].mxu0  ;;  %v3013_v49 = vmax.f32 %v2269_v63, 0.0  ;;  %v2273_v8 = vadd.f32 %v2272_v61, %v4838_v1  ;;  %v2274_v41 = vpop.f32.mrb[99].mxu1 }
 0x19f   :  { %v2754_v27 = vmax.f32 %v1621_v4, 0.0  ;;  %v1625_v34 = vadd.f32 %v1624_v50, %v4841_v2  ;;  %v3014_v7 = vmax.f32 %v2271_v44, 0.0  ;;  %v2275_v32 = vadd.f32 %v2274_v41, %v4841_v2 }
 0x1a0   :  { %v3260_v0 = vadd.f32 %v3259_v15, %v2753_v56  ;;  %v2755_v28 = vmax.f32 %v1623_v21, 0.0  ;;  %4223 = vmatmul.mubr.msk.bf16.gmra.mrb[204].mxu0 %vm952_vm1, %v4450_v36  ;;  %4288 = vmatmul.mubr.msk.bf16.gmra.mrb[204].mxu1 %vm952_vm1, %v4453_v54  ;;  %v3558_v18 = vadd.f32 %v3557_v45, %v3013_v49  ;;  %v3015_v39 = vmax.f32 %v2273_v8, 0.0  ;;  %v4452_v45 = vld [vmem:[%s6034_s0 + $0x1a0] sm:$0xff]  }
 0x1a1   :  { %v3297_v60 = vadd.f32 %v3296_v22, %v2754_v27  ;;  %v2756_v42 = vmax.f32 %v1625_v34, 0.0  ;;  %1896 = vmatprep.mubr.bf16.mxu0 %v6068_v57  ;;  %2546 = vmatprep.mubr.bf16.mxu1 %v6068_v57  ;;  %v3595_v63 = vadd.f32 %v3594_v31, %v3014_v7  ;;  %v3016_v4 = vmax.f32 %v2275_v32, 0.0  ;;  %v4455_v22 = vld [vmem:[%s6034_s0 + $0x3a8] sm:$0xff]  }
 0x1a2   :  { %v3261_v3 = vadd.f32 %v3260_v0, %v2755_v28  ;;  %v3559_v44 = vadd.f32 %v3558_v18, %v3015_v39 }
 0x1a3   :  { %v3298_v61 = vadd.f32 %v3297_v60, %v2756_v42  ;;  %v1628_v50 = vpop.f32.mrb[100].mxu0  ;;  %v3596_v15 = vadd.f32 %v3595_v63, %v3016_v4  ;;  %v2278_v56 = vpop.f32.mrb[100].mxu1 }
 0x1a4   :  { %v1629_v36 = vadd.f32 %v1628_v50, %v4838_v1  ;;  %v1630_v21 = vpop.f32.mrb[101].mxu0  ;;  %v2279_v31 = vadd.f32 %v2278_v56, %v4838_v1  ;;  %v2280_v54 = vpop.f32.mrb[101].mxu1 }
 0x1a5   :  { %v1631_v49 = vadd.f32 %v1630_v21, %v4841_v2  ;;  %v1632_v8 = vpop.f32.mrb[102].mxu0  ;;  %v2281_v41 = vadd.f32 %v2280_v54, %v4841_v2  ;;  %v2282_v27 = vpop.f32.mrb[102].mxu1 }
 0x1a6   :  { %v2757_v34 = vmax.f32 %v1629_v36, 0.0  ;;  %v1633_v7 = vadd.f32 %v1632_v8, %v4838_v1  ;;  %v1634_v32 = vpop.f32.mrb[103].mxu0  ;;  %v3017_v0 = vmax.f32 %v2279_v31, 0.0  ;;  %v2283_v28 = vadd.f32 %v2282_v27, %v4838_v1  ;;  %v2284_v18 = vpop.f32.mrb[103].mxu1 }
 0x1a7   :  { %v2758_v39 = vmax.f32 %v1631_v49, 0.0  ;;  %v1635_v60 = vadd.f32 %v1634_v32, %v4841_v2  ;;  %v3018_v42 = vmax.f32 %v2281_v41, 0.0  ;;  %v2285_v63 = vadd.f32 %v2284_v18, %v4841_v2 }
 0x1a8   :  { %v3262_v4 = vadd.f32 %v3261_v3, %v2757_v34  ;;  %v2759_v50 = vmax.f32 %v1633_v7, 0.0  ;;  %4224 = vmatmul.mubr.msk.bf16.gmra.mrb[208].mxu0 %vm952_vm1, %v4452_v45  ;;  %4289 = vmatmul.mubr.msk.bf16.gmra.mrb[208].mxu1 %vm952_vm1, %v4455_v22  ;;  %v3560_v56 = vadd.f32 %v3559_v44, %v3017_v0  ;;  %v3019_v36 = vmax.f32 %v2283_v28, 0.0  ;;  %v4454_v44 = vld [vmem:[%s6034_s0 + $0x1a8] sm:$0xff]  }
 0x1a9   :  { %v3299_v21 = vadd.f32 %v3298_v61, %v2758_v39  ;;  %v2760_v54 = vmax.f32 %v1635_v60, 0.0  ;;  %1906 = vmatprep.mubr.bf16.mxu0 %v6068_v57  ;;  %2556 = vmatprep.mubr.bf16.mxu1 %v6068_v57  ;;  %v3597_v31 = vadd.f32 %v3596_v15, %v3018_v42  ;;  %v3020_v49 = vmax.f32 %v2285_v63, 0.0  ;;  %v4457_v61 = vld [vmem:[%s6034_s0 + $0x3b0] sm:$0xff]  }
 0x1aa   :  { %v3263_v8 = vadd.f32 %v3262_v4, %v2759_v50  ;;  %v3561_v41 = vadd.f32 %v3560_v56, %v3019_v36 }
 0x1ab   :  { %v3300_v27 = vadd.f32 %v3299_v21, %v2760_v54  ;;  %v1638_v32 = vpop.f32.mrb[104].mxu0  ;;  %v3598_v3 = vadd.f32 %v3597_v31, %v3020_v49  ;;  %v2288_v34 = vpop.f32.mrb[104].mxu1 }
 0x1ac   :  { %v1639_v45 = vadd.f32 %v1638_v32, %v4838_v1  ;;  %v1640_v7 = vpop.f32.mrb[105].mxu0  ;;  %v2289_v15 = vadd.f32 %v2288_v34, %v4838_v1  ;;  %v2290_v22 = vpop.f32.mrb[105].mxu1 }
 0x1ad   :  { %v1641_v0 = vadd.f32 %v1640_v7, %v4841_v2  ;;  %v1642_v28 = vpop.f32.mrb[106].mxu0  ;;  %v2291_v18 = vadd.f32 %v2290_v22, %v4841_v2  ;;  %v2292_v39 = vpop.f32.mrb[106].mxu1 }
 0x1ae   :  { %v2761_v60 = vmax.f32 %v1639_v45, 0.0  ;;  %v1643_v42 = vadd.f32 %v1642_v28, %v4838_v1  ;;  %v1644_v63 = vpop.f32.mrb[107].mxu0  ;;  %v3021_v4 = vmax.f32 %v2289_v15, 0.0  ;;  %v2293_v50 = vadd.f32 %v2292_v39, %v4838_v1  ;;  %v2294_v56 = vpop.f32.mrb[107].mxu1 }
 0x1af   :  { %v2762_v36 = vmax.f32 %v1641_v0, 0.0  ;;  %v1645_v21 = vadd.f32 %v1644_v63, %v4841_v2  ;;  %v3022_v54 = vmax.f32 %v2291_v18, 0.0  ;;  %v2295_v31 = vadd.f32 %v2294_v56, %v4841_v2 }
 0x1b0   :  { %v3264_v49 = vadd.f32 %v3263_v8, %v2761_v60  ;;  %v2763_v32 = vmax.f32 %v1643_v42, 0.0  ;;  %4225 = vmatmul.mubr.msk.bf16.gmra.mrb[212].mxu0 %vm952_vm1, %v4454_v44  ;;  %4290 = vmatmul.mubr.msk.bf16.gmra.mrb[212].mxu1 %vm952_vm1, %v4457_v61  ;;  %v3562_v34 = vadd.f32 %v3561_v41, %v3021_v4  ;;  %v3023_v45 = vmax.f32 %v2293_v50, 0.0  ;;  %v4456_v41 = vld [vmem:[%s6034_s0 + $0x1b0] sm:$0xff]  }
 0x1b1   :  { %v3301_v7 = vadd.f32 %v3300_v27, %v2762_v36  ;;  %v2764_v22 = vmax.f32 %v1645_v21, 0.0  ;;  %1916 = vmatprep.mubr.bf16.mxu0 %v6068_v57  ;;  %2566 = vmatprep.mubr.bf16.mxu1 %v6068_v57  ;;  %v3599_v15 = vadd.f32 %v3598_v3, %v3022_v54  ;;  %v3024_v0 = vmax.f32 %v2295_v31, 0.0  ;;  %v4461_v27 = vld [vmem:[%s6034_s0 + $0x3b8] sm:$0xff]  }
 0x1b2   :  { %v3265_v28 = vadd.f32 %v3264_v49, %v2763_v32  ;;  %v3563_v18 = vadd.f32 %v3562_v34, %v3023_v45 }
 0x1b3   :  { %v3302_v39 = vadd.f32 %v3301_v7, %v2764_v22  ;;  %v1648_v63 = vpop.f32.mrb[108].mxu0  ;;  %v3600_v8 = vadd.f32 %v3599_v15, %v3024_v0  ;;  %v2298_v60 = vpop.f32.mrb[108].mxu1 }
 0x1b4   :  { %v1649_v44 = vadd.f32 %v1648_v63, %v4838_v1  ;;  %v1650_v42 = vpop.f32.mrb[109].mxu0  ;;  %v2299_v3 = vadd.f32 %v2298_v60, %v4838_v1  ;;  %v2300_v61 = vpop.f32.mrb[109].mxu1 }
 0x1b5   :  { %v1651_v4 = vadd.f32 %v1650_v42, %v4841_v2  ;;  %v1652_v50 = vpop.f32.mrb[110].mxu0  ;;  %v2301_v56 = vadd.f32 %v2300_v61, %v4841_v2  ;;  %v2302_v36 = vpop.f32.mrb[110].mxu1 }
 0x1b6   :  { %v2765_v21 = vmax.f32 %v1649_v44, 0.0  ;;  %v1653_v54 = vadd.f32 %v1652_v50, %v4838_v1  ;;  %v1654_v31 = vpop.f32.mrb[111].mxu0  ;;  %v3025_v49 = vmax.f32 %v2299_v3, 0.0  ;;  %v2303_v32 = vadd.f32 %v2302_v36, %v4838_v1  ;;  %v2304_v34 = vpop.f32.mrb[111].mxu1 }
 0x1b7   :  { %v2766_v45 = vmax.f32 %v1651_v4, 0.0  ;;  %v1655_v7 = vadd.f32 %v1654_v31, %v4841_v2  ;;  %v3026_v22 = vmax.f32 %v2301_v56, 0.0  ;;  %v2305_v15 = vadd.f32 %v2304_v34, %v4841_v2 }
 0x1b8   :  { %v3266_v0 = vadd.f32 %v3265_v28, %v2765_v21  ;;  %v2767_v63 = vmax.f32 %v1653_v54, 0.0  ;;  %4226 = vmatmul.mubr.msk.bf16.gmra.mrb[216].mxu0 %vm952_vm1, %v4456_v41  ;;  %4291 = vmatmul.mubr.msk.bf16.gmra.mrb[216].mxu1 %vm952_vm1, %v4461_v27  ;;  %v3564_v60 = vadd.f32 %v3563_v18, %v3025_v49  ;;  %v3027_v44 = vmax.f32 %v2303_v32, 0.0  ;;  %v4481_v41 = vld [vmem:[%s6037_s3 + $0x60] sm:$0xff]  }
 0x1b9   :  { %v3303_v42 = vadd.f32 %v3302_v39, %v2766_v45  ;;  %v2768_v61 = vmax.f32 %v1655_v7, 0.0  ;;  %1926 = vmatprep.mubr.bf16.mxu0 %v6068_v57  ;;  %2576 = vmatprep.mubr.bf16.mxu1 %v6068_v57  ;;  %v3601_v3 = vadd.f32 %v3600_v8, %v3026_v22  ;;  %v3028_v4 = vmax.f32 %v2305_v15, 0.0  ;;  %v4482_v18 = vld [vmem:[%s6037_s3 + $0x20] sm:$0xff]   ;;  %v4460_v8 = vld [vmem:[%s6034_s0 + $0x1b8] sm:$0xff]  }
 0x1ba   :  { %v3267_v50 = vadd.f32 %v3266_v0, %v2767_v63  ;;  %v3565_v56 = vadd.f32 %v3564_v60, %v3027_v44  ;;  %v4463_v54 = vld [vmem:[%s6034_s0 + $0x3c0] sm:$0xff]   ;;  %v3202_v34 = vrot.slane %v5205_v62, 4  ;;  %4327 = vmatprep.subr.bf16.mxu1 %v4481_v41 }
 0x1bb   :  { %v3304_v36 = vadd.f32 %v3303_v42, %v2768_v61  ;;  %v1658_v31 = vpop.f32.mrb[112].mxu0  ;;  %v3602_v28 = vadd.f32 %v3601_v3, %v3028_v4  ;;  %v2308_v21 = vpop.f32.mrb[112].mxu1  ;;  %4328 = vmatpush3.bf16.msra.mxu1 %v4482_v18 }
 0x1bc   :  { %v1659_v39 = vadd.f32 %v1658_v31, %v4838_v1  ;;  %v1660_v27 = vpop.f32.mrb[113].mxu0  ;;  %v2309_v49 = vadd.f32 %v2308_v21, %v4838_v1  ;;  %v2310_v32 = vpop.f32.mrb[113].mxu1 }
 0x1bd   :  { %v1661_v45 = vadd.f32 %v1660_v27, %v4841_v2  ;;  %v1662_v7 = vpop.f32.mrb[114].mxu0  ;;  %v2311_v22 = vadd.f32 %v2310_v32, %v4841_v2  ;;  %v2312_v15 = vpop.f32.mrb[114].mxu1 }
 0x1be   :  { %v2769_v0 = vmax.f32 %v1659_v39, 0.0  ;;  %v1663_v63 = vadd.f32 %v1662_v7, %v4838_v1  ;;  %v1664_v60 = vpop.f32.mrb[115].mxu0  ;;  %v3029_v44 = vmax.f32 %v2309_v49, 0.0  ;;  %v2313_v42 = vadd.f32 %v2312_v15, %v4838_v1  ;;  %v2314_v61 = vpop.f32.mrb[115].mxu1 }
 0x1bf   :  { %v2770_v3 = vmax.f32 %v1661_v45, 0.0  ;;  %v1665_v4 = vadd.f32 %v1664_v60, %v4841_v2  ;;  %v3030_v31 = vmax.f32 %v2311_v22, 0.0  ;;  %v2315_v21 = vadd.f32 %v2314_v61, %v4841_v2 }
 0x1c0   :  { %v3268_v27 = vadd.f32 %v3267_v50, %v2769_v0  ;;  %v2771_v35 = vmax.f32 %v1663_v63, 0.0  ;;  %4227 = vmatmul.mubr.msk.bf16.gmra.mrb[220].mxu0 %vm952_vm1, %v4460_v8  ;;  %4292 = vmatmul.mubr.msk.bf16.gmra.mrb[220].mxu1 %vm952_vm1, %v4463_v54  ;;  %v3566_v41 = vadd.f32 %v3565_v56, %v3029_v44  ;;  %v3031_v39 = vmax.f32 %v2313_v42, 0.0  ;;  %v4462_v56 = vld [vmem:[%s6034_s0 + $0x1c0] sm:$0xff]  }
 0x1c1   :  { %v3305_v32 = vadd.f32 %v3304_v36, %v2770_v3  ;;  %v2772_v49 = vmax.f32 %v1665_v4, 0.0  ;;  %1936 = vmatprep.mubr.bf16.mxu0 %v6068_v57  ;;  %v3603_v7 = vadd.f32 %v3602_v28, %v3030_v31  ;;  %v3032_v18 = vmax.f32 %v2315_v21, 0.0  ;;  %2586 = vmatprep.mubr.bf16.mxu1 %v6068_v57  ;;  %v4465_v28 = vld [vmem:[%s6034_s0 + $0x3c8] sm:$0xff]  }
 0x1c2   :  { %v3269_v45 = vadd.f32 %v3268_v27, %v2771_v35  ;;  %v3567_v22 = vadd.f32 %v3566_v41, %v3031_v39  ;;  %v5465_v35 = vadd.f32 %v3202_v34, %v5205_v62  ;;  %v3239_v44 = vrot.slane %v5207_v11, 4 }
 0x1c3   :  { %v3306_v15 = vadd.f32 %v3305_v32, %v2772_v49  ;;  %v1668_v60 = vpop.f32.mrb[116].mxu0  ;;  %v3604_v50 = vadd.f32 %v3603_v7, %v3032_v18  ;;  %v2318_v0 = vpop.f32.mrb[116].mxu1 }
 0x1c4   :  { %v1669_v8 = vadd.f32 %v1668_v60, %v4838_v1  ;;  %v1670_v63 = vpop.f32.mrb[117].mxu0  ;;  %v2319_v36 = vadd.f32 %v2318_v0, %v4838_v1  ;;  %v2320_v54 = vpop.f32.mrb[117].mxu1 }
 0x1c5   :  { %v1671_v42 = vadd.f32 %v1670_v63, %v4841_v2  ;;  %v1672_v61 = vpop.f32.mrb[118].mxu0  ;;  %v2321_v3 = vadd.f32 %v2320_v54, %v4841_v2  ;;  %v2322_v4 = vpop.f32.mrb[118].mxu1 }
 0x1c6   :  { %v2773_v31 = vmax.f32 %v1669_v8, 0.0  ;;  %v1673_v21 = vadd.f32 %v1672_v61, %v4838_v1  ;;  %v1674_v27 = vpop.f32.mrb[119].mxu0  ;;  %v3033_v41 = vmax.f32 %v2319_v36, 0.0  ;;  %v2323_v39 = vadd.f32 %v2322_v4, %v4838_v1  ;;  %v2324_v32 = vpop.f32.mrb[119].mxu1 }
 0x1c7   :  { %v2774_v49 = vmax.f32 %v1671_v42, 0.0  ;;  %v1675_v62 = vadd.f32 %v1674_v27, %v4841_v2  ;;  %v3034_v34 = vmax.f32 %v2321_v3, 0.0  ;;  %v2325_v7 = vadd.f32 %v2324_v32, %v4841_v2 }
 0x1c8   :  { %v3270_v18 = vadd.f32 %v3269_v45, %v2773_v31  ;;  %v2775_v60 = vmax.f32 %v1673_v21, 0.0  ;;  %4228 = vmatmul.mubr.msk.bf16.gmra.mrb[224].mxu0 %vm952_vm1, %v4462_v56  ;;  %v3568_v0 = vadd.f32 %v3567_v22, %v3033_v41  ;;  %4293 = vmatmul.mubr.msk.bf16.gmra.mrb[224].mxu1 %vm952_vm1, %v4465_v28  ;;  %v3035_v8 = vmax.f32 %v2323_v39, 0.0 }
 0x1c9   :  { %v3307_v63 = vadd.f32 %v3306_v15, %v2774_v49  ;;  %v2776_v54 = vmax.f32 %v1675_v62, 0.0  ;;  %1946 = vmatprep.mubr.bf16.mxu0 %v6068_v57  ;;  %v3605_v36 = vadd.f32 %v3604_v50, %v3034_v34  ;;  %v3036_v61 = vmax.f32 %v2325_v7, 0.0  ;;  %2596 = vmatprep.mubr.bf16.mxu1 %v6068_v57  ;;  %v4464_v15 = vld [vmem:[%s6034_s0 + $0x1c8] sm:$0xff]   ;;  %v4467_v50 = vld [vmem:[%s6034_s0 + $0x3d0] sm:$0xff]  }
 0x1ca   :  { %v3271_v42 = vadd.f32 %v3270_v18, %v2775_v60  ;;  %v3569_v3 = vadd.f32 %v3568_v0, %v3035_v8  ;;  %v3204_v41 = vrot.slane %v5465_v35, 2  ;;  %v3240_v39 = vadd.f32 %v3239_v44, %v5207_v11 }
 0x1cb   :  { %v3308_v4 = vadd.f32 %v3307_v63, %v2776_v54  ;;  %v1678_v27 = vpop.f32.mrb[120].mxu0  ;;  %v3606_v45 = vadd.f32 %v3605_v36, %v3036_v61  ;;  %v2328_v31 = vpop.f32.mrb[120].mxu1 }
 0x1cc   :  { %v1679_v56 = vadd.f32 %v1678_v27, %v4838_v1  ;;  %v1680_v22 = vpop.f32.mrb[121].mxu0  ;;  %v2329_v28 = vadd.f32 %v2328_v31, %v4838_v1  ;;  %v2330_v21 = vpop.f32.mrb[121].mxu1 }
 0x1cd   :  { %v1681_v32 = vadd.f32 %v1680_v22, %v4841_v2  ;;  %v1682_v49 = vpop.f32.mrb[122].mxu0  ;;  %v2331_v62 = vadd.f32 %v2330_v21, %v4841_v2  ;;  %v2332_v34 = vpop.f32.mrb[122].mxu1 }
 0x1ce   :  { %v2777_v7 = vmax.f32 %v1679_v56, 0.0  ;;  %v1683_v18 = vadd.f32 %v1682_v49, %v4838_v1  ;;  %v1684_v60 = vpop.f32.mrb[123].mxu0  ;;  %v3037_v0 = vmax.f32 %v2329_v28, 0.0  ;;  %v2333_v8 = vadd.f32 %v2332_v34, %v4838_v1  ;;  %v2334_v63 = vpop.f32.mrb[123].mxu1 }
 0x1cf   :  { %v2778_v54 = vmax.f32 %v1681_v32, 0.0  ;;  %v1685_v36 = vadd.f32 %v1684_v60, %v4841_v2  ;;  %v3038_v61 = vmax.f32 %v2331_v62, 0.0  ;;  %v2335_v11 = vadd.f32 %v2334_v63, %v4841_v2  ;;  %v4469_v60 = vld [vmem:[%s6034_s0 + $0x3d8] sm:$0xff]  }
 0x1d0   :  { %v3272_v44 = vadd.f32 %v3271_v42, %v2777_v7  ;;  %v2779_v27 = vmax.f32 %v1683_v18, 0.0  ;;  %4229 = vmatmul.mubr.msk.bf16.gmra.mrb[228].mxu0 %vm952_vm1, %v4464_v15  ;;  %v3570_v31 = vadd.f32 %v3569_v3, %v3037_v0  ;;  %v3039_v22 = vmax.f32 %v2333_v8, 0.0  ;;  %4294 = vmatmul.mubr.msk.bf16.gmra.mrb[228].mxu1 %vm952_vm1, %v4467_v50 }
 0x1d1   :  { %v3309_v56 = vadd.f32 %v3308_v4, %v2778_v54  ;;  %v2780_v21 = vmax.f32 %v1685_v36, 0.0  ;;  %v3607_v28 = vadd.f32 %v3606_v45, %v3038_v61  ;;  %1956 = vmatprep.mubr.bf16.mxu0 %v6068_v57  ;;  %v3040_v49 = vmax.f32 %v2335_v11, 0.0  ;;  %2606 = vmatprep.mubr.bf16.mxu1 %v6068_v57  ;;  %v4466_v45 = vld [vmem:[%s6034_s0 + $0x1d0] sm:$0xff]  }
 0x1d2   :  { %v3241_v32 = vrot.slane %v3240_v39, 2  ;;  %v3273_v62 = vadd.f32 %v3272_v44, %v2779_v27  ;;  %v5498_v34 = vadd.f32 %v3570_v31, %v3039_v22  ;;  %v3205_v42 = vadd.f32 %v3204_v41, %v5465_v35 }
 0x1d3   :  { %v3310_v7 = vadd.f32 %v3309_v56, %v2780_v21  ;;  %v1688_v15 = vpop.f32.mrb[124].mxu0  ;;  %v5501_v3 = vadd.f32 %v3607_v28, %v3040_v49  ;;  %v2338_v18 = vpop.f32.mrb[124].mxu1 }
 0x1d4   :  { %6081 = vst [vmem:[#allocation39_spill] sm:$0xff] %v5498_v34  ;;  %v1689_v4 = vadd.f32 %v1688_v15, %v4838_v1  ;;  %v1690_v50 = vpop.f32.mrb[125].mxu0  ;;  %v2339_v0 = vadd.f32 %v2338_v18, %v4838_v1  ;;  %v2340_v8 = vpop.f32.mrb[125].mxu1  ;;  %v3242_v36 = vadd.f32 %v3241_v32, %v3240_v39  ;;  %v3206_v31 = vrot.slane %v3205_v42, 1 }
 0x1d5   :  { %6082 = vst [vmem:[#allocation40_spill] sm:$0xff] %v5501_v3  ;;  %v1691_v35 = vadd.f32 %v1690_v50, %v4841_v2  ;;  %v1692_v41 = vpop.f32.mrb[126].mxu0  ;;  %v2341_v63 = vadd.f32 %v2340_v8, %v4841_v2  ;;  %v2342_v54 = vpop.f32.mrb[126].mxu1 }
 0x1d6   :  { %v2781_v61 = vmax.f32 %v1689_v4, 0.0  ;;  %v1693_v11 = vadd.f32 %v1692_v41, %v4838_v1  ;;  %v1694_v44 = vpop.f32.mrb[127].mxu0  ;;  %v2344_v27 = vpop.f32.mrb[127].mxu1  ;;  %v3041_v49 = vmax.f32 %v2339_v0, 0.0  ;;  %v2343_v15 = vadd.f32 %v2342_v54, %v4838_v1 }
 0x1d7   :  { %v2782_v22 = vmax.f32 %v1691_v35, 0.0  ;;  %v1695_v56 = vadd.f32 %v1694_v44, %v4841_v2  ;;  %v3042_v32 = vmax.f32 %v2341_v63, 0.0  ;;  %v2345_v4 = vadd.f32 %v2344_v27, %v4841_v2  ;;  %v4471_v63 = vld [vmem:[%s6034_s0 + $0x3e0] sm:$0xff]  }
 0x1d8   :  { %v3274_v21 = vadd.f32 %v3273_v62, %v2781_v61  ;;  %v2783_v28 = vmax.f32 %v1693_v11, 0.0  ;;  %4230 = vmatmul.mubr.msk.bf16.gmra.mrb[232].mxu0 %vm952_vm1, %v4466_v45  ;;  %4295 = vmatmul.mubr.msk.bf16.gmra.mrb[232].mxu1 %vm952_vm1, %v4469_v60  ;;  %v3243_v50 = vrot.slane %v3242_v36, 1  ;;  %v3043_v62 = vmax.f32 %v2343_v15, 0.0 }
 0x1d9   :  { %v3311_v18 = vadd.f32 %v3310_v7, %v2782_v22  ;;  %v2784_v39 = vmax.f32 %v1695_v56, 0.0  ;;  %1966 = vmatprep.mubr.bf16.mxu0 %v6068_v57  ;;  %2616 = vmatprep.mubr.bf16.mxu1 %v6068_v57  ;;  %v3044_v45 = vmax.f32 %v2345_v4, 0.0  ;;  %v4468_v7 = vld [vmem:[%s6034_s0 + $0x1d8] sm:$0xff]   ;;  %v5528_v27 = vadd.f32 %v3206_v31, %v3205_v42 }
 0x1da   :  { %v3275_v8 = vadd.f32 %v3274_v21, %v2783_v28  ;;  %v3615_v11 = vadd.f32 %v3043_v62, %v3041_v49 }
 0x1db   :  { %v3312_v35 = vadd.f32 %v3311_v18, %v2784_v39  ;;  %v1698_v41 = vpop.f32.mrb[128].mxu0  ;;  %v2348_v61 = vpop.f32.mrb[128].mxu1  ;;  %v3652_v28 = vadd.f32 %v3044_v45, %v3042_v32  ;;  %v5531_v18 = vadd.f32 %v3243_v50, %v3242_v36 }
 0x1dc   :  { %v3276_v60 = vrot.slane %v3275_v8, 4  ;;  %v1699_v0 = vadd.f32 %v1698_v41, %v4838_v1  ;;  %v1700_v54 = vpop.f32.mrb[129].mxu0  ;;  %v2350_v44 = vpop.f32.mrb[129].mxu1  ;;  %v2349_v36 = vadd.f32 %v2348_v61, %v4838_v1 }
 0x1dd   :  { %v3313_v22 = vrot.slane %v3312_v35, 4  ;;  %v1701_v56 = vadd.f32 %v1700_v54, %v4841_v2  ;;  %v1702_v21 = vpop.f32.mrb[130].mxu0  ;;  %v2352_v15 = vpop.f32.mrb[130].mxu1  ;;  %v2351_v32 = vadd.f32 %v2350_v44, %v4841_v2 }
 0x1de   :  { %v3277_v39 = vadd.f32 %v3276_v60, %v3275_v8  ;;  %v1703_v4 = vadd.f32 %v1702_v21, %v4838_v1  ;;  %v1704_v41 = vpop.f32.mrb[131].mxu0  ;;  %v2354_v3 = vpop.f32.mrb[131].mxu1  ;;  %v2785_v29 = vmax.f32 %v1699_v0, 0.0  ;;  %v3045_v54 = vmax.f32 %v2349_v36, 0.0 }
 0x1df   :  { %v3314_v34 = vadd.f32 %v3313_v22, %v3312_v35  ;;  %v2786_v49 = vmax.f32 %v1701_v56, 0.0  ;;  %v1705_v42 = vadd.f32 %v1704_v41, %v4841_v2  ;;  %v2353_v35 = vadd.f32 %v2352_v15, %v4838_v1  ;;  %v4470_v15 = vld [vmem:[%s6034_s0 + $0x1e0] sm:$0xff]  }
 0x1e0   :  { %v3278_v31 = vrot.slane %v3277_v39, 2  ;;  %v2787_v62 = vmax.f32 %v1703_v4, 0.0  ;;  %4231 = vmatmul.mubr.msk.bf16.gmra.mrb[236].mxu0 %vm952_vm1, %v4468_v7  ;;  %4296 = vmatmul.mubr.msk.bf16.gmra.mrb[236].mxu1 %vm952_vm1, %v4471_v63  ;;  %v2355_v45 = vadd.f32 %v2354_v3, %v4841_v2  ;;  %v3046_v7 = vmax.f32 %v2351_v32, 0.0 }
 0x1e1   :  { %v3315_v50 = vrot.slane %v3314_v34, 2  ;;  %v2788_v8 = vmax.f32 %v1705_v42, 0.0  ;;  %1976 = vmatprep.mubr.bf16.mxu0 %v6068_v57  ;;  %2626 = vmatprep.mubr.bf16.mxu1 %v6068_v57  ;;  %v3047_v61 = vmax.f32 %v2353_v35, 0.0  ;;  %v3616_v3 = vadd.f32 %v3615_v11, %v3045_v54 }
 0x1e2   :  { %v3279_v60 = vadd.f32 %v3278_v31, %v3277_v39  ;;  %v3319_v0 = vadd.f32 %v2787_v62, %v2785_v29  ;;  %v3048_v21 = vmax.f32 %v2355_v45, 0.0  ;;  %v4473_v29 = vld [vmem:[%s6034_s0 + $0x3e8] sm:$0xff]   ;;  %v3653_v39 = vadd.f32 %v3652_v28, %v3046_v7 }
 0x1e3   :  { %v3316_v22 = vadd.f32 %v3315_v50, %v3314_v34  ;;  %v3356_v63 = vadd.f32 %v2788_v8, %v2786_v49  ;;  %v1708_v56 = vpop.f32.mrb[132].mxu0  ;;  %v2358_v44 = vpop.f32.mrb[132].mxu1  ;;  %v3617_v23 = vadd.f32 %v3616_v3, %v3047_v61 }
 0x1e4   :  { %v3280_v4 = vrot.slane %v3279_v60, 1  ;;  %v1709_v41 = vadd.f32 %v1708_v56, %v4838_v1  ;;  %v1710_v42 = vpop.f32.mrb[133].mxu0  ;;  %v2360_v34 = vpop.f32.mrb[133].mxu1  ;;  %v2359_v36 = vadd.f32 %v2358_v44, %v4838_v1  ;;  %v3654_v54 = vadd.f32 %v3653_v39, %v3048_v21 }
 0x1e5   :  { %v3317_v49 = vrot.slane %v3316_v22, 1  ;;  %v1711_v31 = vadd.f32 %v1710_v42, %v4841_v2  ;;  %v1712_v62 = vpop.f32.mrb[134].mxu0  ;;  %v2361_v32 = vadd.f32 %v2360_v34, %v4841_v2  ;;  %v2362_v50 = vpop.f32.mrb[134].mxu1 }
 0x1e6   :  { %v3281_v8 = vadd.f32 %v3280_v4, %v3279_v60  ;;  %v2789_v35 = vmax.f32 %v1709_v41, 0.0  ;;  %v1713_v45 = vadd.f32 %v1712_v62, %v4838_v1  ;;  %v1714_v56 = vpop.f32.mrb[135].mxu0  ;;  %v2364_v12 = vpop.f32.mrb[135].mxu1  ;;  %v3049_v60 = vmax.f32 %v2359_v36, 0.0 }
 0x1e7   :  { %v3318_v58 = vadd.f32 %v3317_v49, %v3316_v22  ;;  %v2790_v11 = vmax.f32 %v1711_v31, 0.0  ;;  %v1715_v28 = vadd.f32 %v1714_v56, %v4841_v2  ;;  %v3050_v21 = vmax.f32 %v2361_v32, 0.0  ;;  %v4475_v49 = vld [vmem:[%s6034_s0 + $0x3f0] sm:$0xff]  }
 0x1e8   :  { %v5557_v7 = vsel %vm3779_vm2, %v3281_v8, %v5528_v27  ;;  %v3320_v44 = vadd.f32 %v3319_v0, %v2789_v35  ;;  %v2791_v42 = vmax.f32 %v1713_v45, 0.0  ;;  %4232 = vmatmul.mubr.msk.bf16.gmra.mrb[240].mxu0 %vm952_vm1, %v4470_v15  ;;  %4297 = vmatmul.mubr.msk.bf16.gmra.mrb[240].mxu1 %vm952_vm1, %v4473_v29  ;;  %v3618_v41 = vadd.f32 %v3617_v23, %v3049_v60 }
 0x1e9   :  { %v5563_v61 = vsel %vm3779_vm2, %v3318_v58, %v5531_v18  ;;  %v3357_v22 = vadd.f32 %v3356_v63, %v2790_v11  ;;  %v2792_v4 = vmax.f32 %v1715_v28, 0.0  ;;  %1986 = vmatprep.mubr.bf16.mxu0 %v6068_v57  ;;  %2636 = vmatprep.mubr.bf16.mxu1 %v6068_v57  ;;  %v2363_v0 = vadd.f32 %v2362_v50, %v4838_v1  ;;  %v4472_v63 = vld [vmem:[%s6034_s0 + $0x1e8] sm:$0xff]  }
 0x1ea   :  { %v3321_v27 = vadd.f32 %v3320_v44, %v2791_v42  ;;  %v2365_v15 = vadd.f32 %v2364_v12, %v4841_v2  ;;  %v3655_v39 = vadd.f32 %v3654_v54, %v3050_v21 }
 0x1eb   :  { %v3358_v3 = vadd.f32 %v3357_v22, %v2792_v4  ;;  %v1718_v29 = vpop.f32.mrb[136].mxu0  ;;  %v2368_v34 = vpop.f32.mrb[136].mxu1  ;;  %v3051_v23 = vmax.f32 %v2363_v0, 0.0 }
 0x1ec   :  { %v1719_v58 = vadd.f32 %v1718_v29, %v4838_v1  ;;  %v1720_v18 = vpop.f32.mrb[137].mxu0  ;;  %v3052_v31 = vmax.f32 %v2365_v15, 0.0  ;;  %v2369_v62 = vadd.f32 %v2368_v34, %v4838_v1  ;;  %v2370_v12 = vpop.f32.mrb[137].mxu1 }
 0x1ed   :  { %v1721_v36 = vadd.f32 %v1720_v18, %v4841_v2  ;;  %v1722_v32 = vpop.f32.mrb[138].mxu0  ;;  %v2371_v50 = vadd.f32 %v2370_v12, %v4841_v2  ;;  %v2372_v8 = vpop.f32.mrb[138].mxu1  ;;  %v3619_v11 = vadd.f32 %v3618_v41, %v3051_v23  ;;  %v4479_v12 = vld [vmem:[%s6034_s0 + $0x3f8] sm:$0xff]  }
 0x1ee   :  { %v2793_v35 = vmax.f32 %v1719_v58, 0.0  ;;  %v1723_v45 = vadd.f32 %v1722_v32, %v4838_v1  ;;  %v1724_v56 = vpop.f32.mrb[139].mxu0  ;;  %v3656_v28 = vadd.f32 %v3655_v39, %v3052_v31  ;;  %v2374_v54 = vpop.f32.mrb[139].mxu1  ;;  %v3053_v60 = vmax.f32 %v2369_v62, 0.0 }
 0x1ef   :  { %v2794_v44 = vmax.f32 %v1721_v36, 0.0  ;;  %v1725_v42 = vadd.f32 %v1724_v56, %v4841_v2  ;;  %v3054_v22 = vmax.f32 %v2371_v50, 0.0  ;;  %v2373_v0 = vadd.f32 %v2372_v8, %v4838_v1 }
 0x1f0   :  { %v3322_v4 = vadd.f32 %v3321_v27, %v2793_v35  ;;  %v2795_v21 = vmax.f32 %v1723_v45, 0.0  ;;  %4233 = vmatmul.mubr.msk.bf16.gmra.mrb[244].mxu0 %vm952_vm1, %v4472_v63  ;;  %4298 = vmatmul.mubr.msk.bf16.gmra.mrb[244].mxu1 %vm952_vm1, %v4475_v49  ;;  %v2375_v15 = vadd.f32 %v2374_v54, %v4841_v2  ;;  %v3620_v41 = vadd.f32 %v3619_v11, %v3053_v60 }
 0x1f1   :  { %v3359_v29 = vadd.f32 %v3358_v3, %v2794_v44  ;;  %v2796_v34 = vmax.f32 %v1725_v42, 0.0  ;;  %1996 = vmatprep.mubr.bf16.mxu0 %v6068_v57  ;;  %2646 = vmatprep.mubr.bf16.mxu1 %v6068_v57  ;;  %v3657_v39 = vadd.f32 %v3656_v28, %v3054_v22  ;;  %v3055_v18 = vmax.f32 %v2373_v0, 0.0  ;;  %v4474_v3 = vld [vmem:[%s6034_s0 + $0x1f0] sm:$0xff]  }
 0x1f2   :  { %v3323_v58 = vadd.f32 %v3322_v4, %v2795_v21  ;;  %v3056_v27 = vmax.f32 %v2375_v15, 0.0 }
 0x1f3   :  { %v3360_v23 = vadd.f32 %v3359_v29, %v2796_v34  ;;  %v1728_v31 = vpop.f32.mrb[140].mxu0  ;;  %v2378_v63 = vpop.f32.mrb[140].mxu1  ;;  %v3621_v36 = vadd.f32 %v3620_v41, %v3055_v18 }
 0x1f4   :  { %v1729_v49 = vadd.f32 %v1728_v31, %v4838_v1  ;;  %v1730_v62 = vpop.f32.mrb[141].mxu0  ;;  %v3658_v32 = vadd.f32 %v3657_v39, %v3056_v27  ;;  %v2379_v50 = vadd.f32 %v2378_v63, %v4838_v1  ;;  %v2380_v8 = vpop.f32.mrb[141].mxu1 }
 0x1f5   :  { %v1731_v35 = vadd.f32 %v1730_v62, %v4841_v2  ;;  %v1732_v45 = vpop.f32.mrb[142].mxu0  ;;  %v2381_v56 = vadd.f32 %v2380_v8, %v4841_v2  ;;  %v2382_v11 = vpop.f32.mrb[142].mxu1 }
 0x1f6   :  { %v2797_v28 = vmax.f32 %v1729_v49, 0.0  ;;  %v1733_v54 = vadd.f32 %v1732_v45, %v4838_v1  ;;  %v1734_v44 = vpop.f32.mrb[143].mxu0  ;;  %v3057_v42 = vmax.f32 %v2379_v50, 0.0  ;;  %v2383_v60 = vadd.f32 %v2382_v11, %v4838_v1  ;;  %v2384_v22 = vpop.f32.mrb[143].mxu1 }
 0x1f7   :  { %v2798_v4 = vmax.f32 %v1731_v35, 0.0  ;;  %v1735_v21 = vadd.f32 %v1734_v44, %v4841_v2  ;;  %v3058_v0 = vmax.f32 %v2381_v56, 0.0  ;;  %v2385_v15 = vadd.f32 %v2384_v22, %v4841_v2 }
 0x1f8   :  { %v3324_v29 = vadd.f32 %v3323_v58, %v2797_v28  ;;  %v2799_v34 = vmax.f32 %v1733_v54, 0.0  ;;  %4234 = vmatmul.mubr.msk.bf16.gmra.mrb[248].mxu0 %vm952_vm1, %v4474_v3  ;;  %4299 = vmatmul.mubr.msk.bf16.gmra.mrb[248].mxu1 %vm952_vm1, %v4479_v12  ;;  %v3622_v41 = vadd.f32 %v3621_v36, %v3057_v42  ;;  %v3059_v39 = vmax.f32 %v2383_v60, 0.0  ;;  %v4483_v58 = vld [vmem:[%s6037_s3 + $0x68] sm:$0xff]   ;;  %v4478_v36 = vld [vmem:[%s6034_s0 + $0x1f8] sm:$0xff]  }
 0x1f9   :  { %v3361_v18 = vadd.f32 %v3360_v23, %v2798_v4  ;;  %v2800_v27 = vmax.f32 %v1735_v21, 0.0  ;;  %2006 = vmatprep.mubr.bf16.mxu0 %v6068_v57  ;;  %v3659_v31 = vadd.f32 %v3658_v32, %v3058_v0  ;;  %v3060_v63 = vmax.f32 %v2385_v15, 0.0  ;;  %v4484_v3 = vld [vmem:[%s6037_s3 + $0x28] sm:$0xff]   ;;  %4329 = vmatprep.subr.bf16.mxu1 %v4483_v58 }
 0x1fa   :  { %v3325_v49 = vadd.f32 %v3324_v29, %v2799_v34  ;;  %v3623_v62 = vadd.f32 %v3622_v41, %v3059_v39  ;;  %4330 = vmatpush3.bf16.msra.mxu1 %v4484_v3 }
 0x1fb   :  { %v3362_v50 = vadd.f32 %v3361_v18, %v2800_v27  ;;  %v1738_v8 = vpop.f32.mrb[144].mxu0  ;;  %v3660_v35 = vadd.f32 %v3659_v31, %v3060_v63  ;;  %v2388_v45 = vpop.f32.mrb[144].mxu1 }
 0x1fc   :  { %v1739_v23 = vadd.f32 %v1738_v8, %v4838_v1  ;;  %v1740_v12 = vpop.f32.mrb[145].mxu0  ;;  %v2389_v32 = vadd.f32 %v2388_v45, %v4838_v1  ;;  %v2390_v56 = vpop.f32.mrb[145].mxu1 }
 0x1fd   :  { %v1741_v11 = vadd.f32 %v1740_v12, %v4841_v2  ;;  %v1742_v28 = vpop.f32.mrb[146].mxu0  ;;  %v2391_v54 = vadd.f32 %v2390_v56, %v4841_v2  ;;  %v2392_v44 = vpop.f32.mrb[146].mxu1 }
 0x1fe   :  { %v2801_v42 = vmax.f32 %v1739_v23, 0.0  ;;  %v1743_v60 = vadd.f32 %v1742_v28, %v4838_v1  ;;  %v1744_v22 = vpop.f32.mrb[147].mxu0  ;;  %v3061_v4 = vmax.f32 %v2389_v32, 0.0  ;;  %v2393_v21 = vadd.f32 %v2392_v44, %v4838_v1  ;;  %v2394_v0 = vpop.f32.mrb[147].mxu1 }
 0x1ff   :  { %v2802_v15 = vmax.f32 %v1741_v11, 0.0  ;;  %v1745_v29 = vadd.f32 %v1744_v22, %v4841_v2  ;;  %v3062_v34 = vmax.f32 %v2391_v54, 0.0  ;;  %v2395_v41 = vadd.f32 %v2394_v0, %v4841_v2 }
 0x200   :  { %v3326_v39 = vadd.f32 %v3325_v49, %v2801_v42  ;;  %v2803_v18 = vmax.f32 %v1743_v60, 0.0  ;;  %4235 = vmatmul.mubr.msk.bf16.gmra.mrb[252].mxu0 %vm952_vm1, %v4478_v36  ;;  %v3624_v27 = vadd.f32 %v3623_v62, %v3061_v4  ;;  %v3063_v31 = vmax.f32 %v2393_v21, 0.0  ;;  %v4480_v62 = vld [vmem:[%s6034_s0 + $0x200] sm:$0xff]  }
 0x201   :  { %v3363_v63 = vadd.f32 %v3362_v50, %v2802_v15  ;;  %v2804_v8 = vmax.f32 %v1745_v29, 0.0  ;;  %2016 = vmatprep.mubr.bf16.mxu0 %v6068_v57  ;;  %v3661_v45 = vadd.f32 %v3660_v35, %v3062_v34  ;;  %v3064_v58 = vmax.f32 %v2395_v41, 0.0 }
 0x202   :  { %v3327_v23 = vadd.f32 %v3326_v39, %v2803_v18  ;;  %v3625_v3 = vadd.f32 %v3624_v27, %v3063_v31 }
 0x203   :  { %v3364_v12 = vadd.f32 %v3363_v63, %v2804_v8  ;;  %v1748_v32 = vpop.f32.mrb[148].mxu0  ;;  %v3662_v56 = vadd.f32 %v3661_v45, %v3064_v58  ;;  %v2398_v11 = vpop.f32.mrb[148].mxu1 }
 0x204   :  { %v1749_v28 = vadd.f32 %v1748_v32, %v4838_v1  ;;  %v1750_v49 = vpop.f32.mrb[149].mxu0  ;;  %v2399_v50 = vadd.f32 %v2398_v11, %v4838_v1  ;;  %v2400_v36 = vpop.f32.mrb[149].mxu1 }
 0x205   :  { %v1751_v57 = vadd.f32 %v1750_v49, %v4841_v2  ;;  %v1752_v35 = vpop.f32.mrb[150].mxu0  ;;  %v2401_v54 = vadd.f32 %v2400_v36, %v4841_v2  ;;  %v2402_v44 = vpop.f32.mrb[150].mxu1 }
 0x206   :  { %v2805_v42 = vmax.f32 %v1749_v28, 0.0  ;;  %v1753_v60 = vadd.f32 %v1752_v35, %v4838_v1  ;;  %v1754_v22 = vpop.f32.mrb[151].mxu0  ;;  %v3065_v4 = vmax.f32 %v2399_v50, 0.0  ;;  %v2403_v21 = vadd.f32 %v2402_v44, %v4838_v1  ;;  %v2404_v0 = vpop.f32.mrb[151].mxu1 }
 0x207   :  { %v2806_v15 = vmax.f32 %v1751_v57, 0.0  ;;  %v1755_v29 = vadd.f32 %v1754_v22, %v4841_v2  ;;  %v3066_v34 = vmax.f32 %v2401_v54, 0.0  ;;  %v2405_v41 = vadd.f32 %v2404_v0, %v4841_v2 }
 0x208   :  { %v3328_v39 = vadd.f32 %v3327_v23, %v2805_v42  ;;  %v2807_v18 = vmax.f32 %v1753_v60, 0.0  ;;  %4236 = vmatmul.mubr.msk.bf16.gmra.mrb[0].mxu0 %vm952_vm1, %v4480_v62  ;;  %v3626_v27 = vadd.f32 %v3625_v3, %v3065_v4  ;;  %v3067_v31 = vmax.f32 %v2403_v21, 0.0 }
 0x209   :  { %v3365_v63 = vadd.f32 %v3364_v12, %v2806_v15  ;;  %v2808_v8 = vmax.f32 %v1755_v29, 0.0  ;;  %v3663_v45 = vadd.f32 %v3662_v56, %v3066_v34  ;;  %v3068_v58 = vmax.f32 %v2405_v41, 0.0 }
 0x20a   :  { %v3329_v32 = vadd.f32 %v3328_v39, %v2807_v18  ;;  %v3627_v11 = vadd.f32 %v3626_v27, %v3067_v31 }
 0x20b   :  { %v3366_v28 = vadd.f32 %v3365_v63, %v2808_v8  ;;  %v1758_v49 = vpop.f32.mrb[152].mxu0  ;;  %v3664_v50 = vadd.f32 %v3663_v45, %v3068_v58  ;;  %v2408_v36 = vpop.f32.mrb[152].mxu1 }
 0x20c   :  { %v1759_v57 = vadd.f32 %v1758_v49, %v4838_v1  ;;  %v1760_v35 = vpop.f32.mrb[153].mxu0  ;;  %v2409_v23 = vadd.f32 %v2408_v36, %v4838_v1  ;;  %v2410_v54 = vpop.f32.mrb[153].mxu1 }
 0x20d   :  { %v1761_v62 = vadd.f32 %v1760_v35, %v4841_v2  ;;  %v1762_v3 = vpop.f32.mrb[154].mxu0  ;;  %v2411_v12 = vadd.f32 %v2410_v54, %v4841_v2  ;;  %v2412_v44 = vpop.f32.mrb[154].mxu1 }
 0x20e   :  { %v2809_v56 = vmax.f32 %v1759_v57, 0.0  ;;  %v1763_v42 = vadd.f32 %v1762_v3, %v4838_v1  ;;  %v1764_v60 = vpop.f32.mrb[155].mxu0  ;;  %v3069_v22 = vmax.f32 %v2409_v23, 0.0  ;;  %v2413_v4 = vadd.f32 %v2412_v44, %v4838_v1  ;;  %v2414_v21 = vpop.f32.mrb[155].mxu1 }
 0x20f   :  { %v2810_v0 = vmax.f32 %v1761_v62, 0.0  ;;  %v1765_v15 = vadd.f32 %v1764_v60, %v4841_v2  ;;  %v3070_v29 = vmax.f32 %v2411_v12, 0.0  ;;  %v2415_v34 = vadd.f32 %v2414_v21, %v4841_v2 }
 0x210   :  { %v3330_v41 = vadd.f32 %v3329_v32, %v2809_v56  ;;  %v2811_v39 = vmax.f32 %v1763_v42, 0.0  ;;  %v3628_v18 = vadd.f32 %v3627_v11, %v3069_v22  ;;  %v3071_v27 = vmax.f32 %v2413_v4, 0.0 }
 0x211   :  { %v3367_v31 = vadd.f32 %v3366_v28, %v2810_v0  ;;  %v2812_v63 = vmax.f32 %v1765_v15, 0.0  ;;  %v3665_v8 = vadd.f32 %v3664_v50, %v3070_v29  ;;  %v3072_v45 = vmax.f32 %v2415_v34, 0.0 }
 0x212   :  { %v3331_v58 = vadd.f32 %v3330_v41, %v2811_v39  ;;  %v3629_v49 = vadd.f32 %v3628_v18, %v3071_v27 }
 0x213   :  { %v3368_v36 = vadd.f32 %v3367_v31, %v2812_v63  ;;  %v1768_v57 = vpop.f32.mrb[156].mxu0  ;;  %v3666_v35 = vadd.f32 %v3665_v8, %v3072_v45  ;;  %v2418_v23 = vpop.f32.mrb[156].mxu1 }
 0x214   :  { %v1769_v54 = vadd.f32 %v1768_v57, %v4838_v1  ;;  %v1770_v62 = vpop.f32.mrb[157].mxu0  ;;  %v2419_v3 = vadd.f32 %v2418_v23, %v4838_v1  ;;  %v2420_v12 = vpop.f32.mrb[157].mxu1 }
 0x215   :  { %v1771_v32 = vadd.f32 %v1770_v62, %v4841_v2  ;;  %v1772_v11 = vpop.f32.mrb[158].mxu0  ;;  %v2421_v28 = vadd.f32 %v2420_v12, %v4841_v2  ;;  %v2422_v44 = vpop.f32.mrb[158].mxu1 }
 0x216   :  { %v2813_v50 = vmax.f32 %v1769_v54, 0.0  ;;  %v1773_v56 = vadd.f32 %v1772_v11, %v4838_v1  ;;  %v1774_v42 = vpop.f32.mrb[159].mxu0  ;;  %v3073_v60 = vmax.f32 %v2419_v3, 0.0  ;;  %v2423_v22 = vadd.f32 %v2422_v44, %v4838_v1  ;;  %v2424_v4 = vpop.f32.mrb[159].mxu1 }
 0x217   :  { %v2814_v21 = vmax.f32 %v1771_v32, 0.0  ;;  %v1775_v0 = vadd.f32 %v1774_v42, %v4841_v2  ;;  %v3074_v15 = vmax.f32 %v2421_v28, 0.0  ;;  %v2425_v29 = vadd.f32 %v2424_v4, %v4841_v2 }
 0x218   :  { %v3332_v34 = vadd.f32 %v3331_v58, %v2813_v50  ;;  %v2815_v41 = vmax.f32 %v1773_v56, 0.0  ;;  %v3630_v39 = vadd.f32 %v3629_v49, %v3073_v60  ;;  %v3075_v18 = vmax.f32 %v2423_v22, 0.0 }
 0x219   :  { %v3369_v27 = vadd.f32 %v3368_v36, %v2814_v21  ;;  %v2816_v31 = vmax.f32 %v1775_v0, 0.0  ;;  %v3667_v63 = vadd.f32 %v3666_v35, %v3074_v15  ;;  %v3076_v8 = vmax.f32 %v2425_v29, 0.0 }
 0x21a   :  { %v3333_v45 = vadd.f32 %v3332_v34, %v2815_v41  ;;  %v3631_v57 = vadd.f32 %v3630_v39, %v3075_v18 }
 0x21b   :  { %v3370_v23 = vadd.f32 %v3369_v27, %v2816_v31  ;;  %v1778_v54 = vpop.f32.mrb[160].mxu0  ;;  %v3668_v62 = vadd.f32 %v3667_v63, %v3076_v8  ;;  %v2428_v3 = vpop.f32.mrb[160].mxu1 }
 0x21c   :  { %v1779_v12 = vadd.f32 %v1778_v54, %v4838_v1  ;;  %v1780_v32 = vpop.f32.mrb[161].mxu0  ;;  %v2429_v11 = vadd.f32 %v2428_v3, %v4838_v1  ;;  %v2430_v28 = vpop.f32.mrb[161].mxu1 }
 0x21d   :  { %v1781_v58 = vadd.f32 %v1780_v32, %v4841_v2  ;;  %v1782_v49 = vpop.f32.mrb[162].mxu0  ;;  %v2431_v36 = vadd.f32 %v2430_v28, %v4841_v2  ;;  %v2432_v44 = vpop.f32.mrb[162].mxu1 }
 0x21e   :  { %v2817_v35 = vmax.f32 %v1779_v12, 0.0  ;;  %v1783_v50 = vadd.f32 %v1782_v49, %v4838_v1  ;;  %v1784_v56 = vpop.f32.mrb[163].mxu0  ;;  %v3077_v42 = vmax.f32 %v2429_v11, 0.0  ;;  %v2433_v60 = vadd.f32 %v2432_v44, %v4838_v1  ;;  %v2434_v22 = vpop.f32.mrb[163].mxu1 }
 0x21f   :  { %v2818_v4 = vmax.f32 %v1781_v58, 0.0  ;;  %v1785_v21 = vadd.f32 %v1784_v56, %v4841_v2  ;;  %v3078_v0 = vmax.f32 %v2431_v36, 0.0  ;;  %v2435_v15 = vadd.f32 %v2434_v22, %v4841_v2 }
 0x220   :  { %v3334_v29 = vadd.f32 %v3333_v45, %v2817_v35  ;;  %v2819_v34 = vmax.f32 %v1783_v50, 0.0  ;;  %v3632_v41 = vadd.f32 %v3631_v57, %v3077_v42  ;;  %v3079_v39 = vmax.f32 %v2433_v60, 0.0 }
 0x221   :  { %v3371_v18 = vadd.f32 %v3370_v23, %v2818_v4  ;;  %v2820_v27 = vmax.f32 %v1785_v21, 0.0  ;;  %v3669_v31 = vadd.f32 %v3668_v62, %v3078_v0  ;;  %v3080_v63 = vmax.f32 %v2435_v15, 0.0 }
 0x222   :  { %v3335_v8 = vadd.f32 %v3334_v29, %v2819_v34  ;;  %v3633_v54 = vadd.f32 %v3632_v41, %v3079_v39 }
 0x223   :  { %v3372_v3 = vadd.f32 %v3371_v18, %v2820_v27  ;;  %v1788_v12 = vpop.f32.mrb[164].mxu0  ;;  %v3670_v32 = vadd.f32 %v3669_v31, %v3080_v63  ;;  %v2438_v11 = vpop.f32.mrb[164].mxu1 }
 0x224   :  { %v1789_v28 = vadd.f32 %v1788_v12, %v4838_v1  ;;  %v1790_v58 = vpop.f32.mrb[165].mxu0  ;;  %v2439_v49 = vadd.f32 %v2438_v11, %v4838_v1  ;;  %v2440_v36 = vpop.f32.mrb[165].mxu1 }
 0x225   :  { %v1791_v45 = vadd.f32 %v1790_v58, %v4841_v2  ;;  %v1792_v57 = vpop.f32.mrb[166].mxu0  ;;  %v2441_v23 = vadd.f32 %v2440_v36, %v4841_v2  ;;  %v2442_v44 = vpop.f32.mrb[166].mxu1 }
 0x226   :  { %v2821_v62 = vmax.f32 %v1789_v28, 0.0  ;;  %v1793_v35 = vadd.f32 %v1792_v57, %v4838_v1  ;;  %v1794_v50 = vpop.f32.mrb[167].mxu0  ;;  %v3081_v56 = vmax.f32 %v2439_v49, 0.0  ;;  %v2443_v42 = vadd.f32 %v2442_v44, %v4838_v1  ;;  %v2444_v60 = vpop.f32.mrb[167].mxu1 }
 0x227   :  { %v2822_v22 = vmax.f32 %v1791_v45, 0.0  ;;  %v1795_v4 = vadd.f32 %v1794_v50, %v4841_v2  ;;  %v3082_v21 = vmax.f32 %v2441_v23, 0.0  ;;  %v2445_v0 = vadd.f32 %v2444_v60, %v4841_v2 }
 0x228   :  { %v3336_v15 = vadd.f32 %v3335_v8, %v2821_v62  ;;  %v2823_v29 = vmax.f32 %v1793_v35, 0.0  ;;  %v3634_v34 = vadd.f32 %v3633_v54, %v3081_v56  ;;  %v3083_v41 = vmax.f32 %v2443_v42, 0.0 }
 0x229   :  { %v3373_v39 = vadd.f32 %v3372_v3, %v2822_v22  ;;  %v2824_v18 = vmax.f32 %v1795_v4, 0.0  ;;  %v3671_v27 = vadd.f32 %v3670_v32, %v3082_v21  ;;  %v3084_v31 = vmax.f32 %v2445_v0, 0.0 }
 0x22a   :  { %v3337_v63 = vadd.f32 %v3336_v15, %v2823_v29  ;;  %v3635_v12 = vadd.f32 %v3634_v34, %v3083_v41 }
 0x22b   :  { %v3374_v11 = vadd.f32 %v3373_v39, %v2824_v18  ;;  %v1798_v28 = vpop.f32.mrb[168].mxu0  ;;  %v3672_v58 = vadd.f32 %v3671_v27, %v3084_v31  ;;  %v2448_v49 = vpop.f32.mrb[168].mxu1 }
 0x22c   :  { %v1799_v36 = vadd.f32 %v1798_v28, %v4838_v1  ;;  %v1800_v45 = vpop.f32.mrb[169].mxu0  ;;  %v2449_v57 = vadd.f32 %v2448_v49, %v4838_v1  ;;  %v2450_v23 = vpop.f32.mrb[169].mxu1 }
 0x22d   :  { %v1801_v8 = vadd.f32 %v1800_v45, %v4841_v2  ;;  %v1802_v54 = vpop.f32.mrb[170].mxu0  ;;  %v2451_v3 = vadd.f32 %v2450_v23, %v4841_v2  ;;  %v2452_v44 = vpop.f32.mrb[170].mxu1 }
 0x22e   :  { %v2825_v32 = vmax.f32 %v1799_v36, 0.0  ;;  %v1803_v62 = vadd.f32 %v1802_v54, %v4838_v1  ;;  %v1804_v35 = vpop.f32.mrb[171].mxu0  ;;  %v3085_v50 = vmax.f32 %v2449_v57, 0.0  ;;  %v2453_v56 = vadd.f32 %v2452_v44, %v4838_v1  ;;  %v2454_v42 = vpop.f32.mrb[171].mxu1 }
 0x22f   :  { %v2826_v60 = vmax.f32 %v1801_v8, 0.0  ;;  %v1805_v22 = vadd.f32 %v1804_v35, %v4841_v2  ;;  %v3086_v4 = vmax.f32 %v2451_v3, 0.0  ;;  %v2455_v21 = vadd.f32 %v2454_v42, %v4841_v2 }
 0x230   :  { %v3338_v0 = vadd.f32 %v3337_v63, %v2825_v32  ;;  %v2827_v15 = vmax.f32 %v1803_v62, 0.0  ;;  %v3636_v29 = vadd.f32 %v3635_v12, %v3085_v50  ;;  %v3087_v34 = vmax.f32 %v2453_v56, 0.0 }
 0x231   :  { %v3375_v41 = vadd.f32 %v3374_v11, %v2826_v60  ;;  %v2828_v39 = vmax.f32 %v1805_v22, 0.0  ;;  %v3673_v18 = vadd.f32 %v3672_v58, %v3086_v4  ;;  %v3088_v27 = vmax.f32 %v2455_v21, 0.0 }
 0x232   :  { %v3339_v31 = vadd.f32 %v3338_v0, %v2827_v15  ;;  %v3637_v28 = vadd.f32 %v3636_v29, %v3087_v34 }
 0x233   :  { %v3376_v49 = vadd.f32 %v3375_v41, %v2828_v39  ;;  %v1808_v36 = vpop.f32.mrb[172].mxu0  ;;  %v3674_v45 = vadd.f32 %v3673_v18, %v3088_v27  ;;  %v2458_v57 = vpop.f32.mrb[172].mxu1 }
 0x234   :  { %v1809_v23 = vadd.f32 %v1808_v36, %v4838_v1  ;;  %v1810_v8 = vpop.f32.mrb[173].mxu0  ;;  %v2459_v54 = vadd.f32 %v2458_v57, %v4838_v1  ;;  %v2460_v3 = vpop.f32.mrb[173].mxu1 }
 0x235   :  { %v1811_v63 = vadd.f32 %v1810_v8, %v4841_v2  ;;  %v1812_v12 = vpop.f32.mrb[174].mxu0  ;;  %v2461_v11 = vadd.f32 %v2460_v3, %v4841_v2  ;;  %v2462_v44 = vpop.f32.mrb[174].mxu1  ;;  %v4485_v3 = vld [vmem:[%s6037_s3 + $0x70] sm:$0xff]  }
 0x236   :  { %v2829_v58 = vmax.f32 %v1809_v23, 0.0  ;;  %v1813_v32 = vadd.f32 %v1812_v12, %v4838_v1  ;;  %v1814_v62 = vpop.f32.mrb[175].mxu0  ;;  %v3089_v35 = vmax.f32 %v2459_v54, 0.0  ;;  %v2463_v50 = vadd.f32 %v2462_v44, %v4838_v1  ;;  %v2464_v56 = vpop.f32.mrb[175].mxu1  ;;  %4331 = vmatprep.subr.bf16.mxu1 %v4485_v3 }
 0x237   :  { %v2830_v42 = vmax.f32 %v1811_v63, 0.0  ;;  %v1815_v60 = vadd.f32 %v1814_v62, %v4841_v2  ;;  %v3090_v22 = vmax.f32 %v2461_v11, 0.0  ;;  %v2465_v4 = vadd.f32 %v2464_v56, %v4841_v2 }
 0x238   :  { %v3340_v21 = vadd.f32 %v3339_v31, %v2829_v58  ;;  %v2831_v0 = vmax.f32 %v1813_v32, 0.0  ;;  %v3638_v15 = vadd.f32 %v3637_v28, %v3089_v35  ;;  %v3091_v29 = vmax.f32 %v2463_v50, 0.0  ;;  %v4486_v31 = vld [vmem:[%s6037_s3 + $0x30] sm:$0xff]  }
 0x239   :  { %v3377_v34 = vadd.f32 %v3376_v49, %v2830_v42  ;;  %v2832_v41 = vmax.f32 %v1815_v60, 0.0  ;;  %v3675_v39 = vadd.f32 %v3674_v45, %v3090_v22  ;;  %v3092_v18 = vmax.f32 %v2465_v4, 0.0  ;;  %4332 = vmatpush3.bf16.msra.mxu1 %v4486_v31 }
 0x23a   :  { %v3341_v27 = vadd.f32 %v3340_v21, %v2831_v0  ;;  %v3639_v36 = vadd.f32 %v3638_v15, %v3091_v29 }
 0x23b   :  { %v3378_v57 = vadd.f32 %v3377_v34, %v2832_v41  ;;  %v1818_v23 = vpop.f32.mrb[176].mxu0  ;;  %v3676_v8 = vadd.f32 %v3675_v39, %v3092_v18  ;;  %v2468_v54 = vpop.f32.mrb[176].mxu1 }
 0x23c   :  { %v1819_v28 = vadd.f32 %v1818_v23, %v4838_v1  ;;  %v1820_v49 = vpop.f32.mrb[177].mxu0  ;;  %v2469_v45 = vadd.f32 %v2468_v54, %v4838_v1  ;;  %v2470_v63 = vpop.f32.mrb[177].mxu1 }
 0x23d   :  { %v1821_v12 = vadd.f32 %v1820_v49, %v4841_v2  ;;  %v1822_v11 = vpop.f32.mrb[178].mxu0  ;;  %v2471_v44 = vadd.f32 %v2470_v63, %v4841_v2  ;;  %v2472_v58 = vpop.f32.mrb[178].mxu1 }
 0x23e   :  { %v2833_v32 = vmax.f32 %v1819_v28, 0.0  ;;  %v1823_v62 = vadd.f32 %v1822_v11, %v4838_v1  ;;  %v1824_v35 = vpop.f32.mrb[179].mxu0  ;;  %v3093_v50 = vmax.f32 %v2469_v45, 0.0  ;;  %v2473_v56 = vadd.f32 %v2472_v58, %v4838_v1  ;;  %v2474_v42 = vpop.f32.mrb[179].mxu1 }
 0x23f   :  { %v2834_v60 = vmax.f32 %v1821_v12, 0.0  ;;  %v1825_v22 = vadd.f32 %v1824_v35, %v4841_v2  ;;  %v3094_v4 = vmax.f32 %v2471_v44, 0.0  ;;  %v2475_v21 = vadd.f32 %v2474_v42, %v4841_v2 }
 0x240   :  { %v3342_v0 = vadd.f32 %v3341_v27, %v2833_v32  ;;  %v2835_v15 = vmax.f32 %v1823_v62, 0.0  ;;  %v3640_v29 = vadd.f32 %v3639_v36, %v3093_v50  ;;  %v3095_v34 = vmax.f32 %v2473_v56, 0.0 }
 0x241   :  { %v3379_v41 = vadd.f32 %v3378_v57, %v2834_v60  ;;  %v2836_v39 = vmax.f32 %v1825_v22, 0.0  ;;  %v3677_v18 = vadd.f32 %v3676_v8, %v3094_v4  ;;  %v3096_v23 = vmax.f32 %v2475_v21, 0.0 }
 0x242   :  { %v3343_v54 = vadd.f32 %v3342_v0, %v2835_v15  ;;  %v3641_v3 = vadd.f32 %v3640_v29, %v3095_v34 }
 0x243   :  { %v3380_v28 = vadd.f32 %v3379_v41, %v2836_v39  ;;  %v1828_v49 = vpop.f32.mrb[180].mxu0  ;;  %v3678_v45 = vadd.f32 %v3677_v18, %v3096_v23  ;;  %v2478_v31 = vpop.f32.mrb[180].mxu1 }
 0x244   :  { %v1829_v63 = vadd.f32 %v1828_v49, %v4838_v1  ;;  %v1830_v12 = vpop.f32.mrb[181].mxu0  ;;  %v2479_v11 = vadd.f32 %v2478_v31, %v4838_v1  ;;  %v2480_v44 = vpop.f32.mrb[181].mxu1 }
 0x245   :  { %v1831_v27 = vadd.f32 %v1830_v12, %v4841_v2  ;;  %v1832_v36 = vpop.f32.mrb[182].mxu0  ;;  %v2481_v57 = vadd.f32 %v2480_v44, %v4841_v2  ;;  %v2482_v58 = vpop.f32.mrb[182].mxu1 }
 0x246   :  { %v2837_v8 = vmax.f32 %v1829_v63, 0.0  ;;  %v1833_v32 = vadd.f32 %v1832_v36, %v4838_v1  ;;  %v1834_v62 = vpop.f32.mrb[183].mxu0  ;;  %v3097_v35 = vmax.f32 %v2479_v11, 0.0  ;;  %v2483_v50 = vadd.f32 %v2482_v58, %v4838_v1  ;;  %v2484_v56 = vpop.f32.mrb[183].mxu1 }
 0x247   :  { %v2838_v42 = vmax.f32 %v1831_v27, 0.0  ;;  %v1835_v60 = vadd.f32 %v1834_v62, %v4841_v2  ;;  %v3098_v22 = vmax.f32 %v2481_v57, 0.0  ;;  %v2485_v4 = vadd.f32 %v2484_v56, %v4841_v2 }
 0x248   :  { %v3344_v21 = vadd.f32 %v3343_v54, %v2837_v8  ;;  %v2839_v0 = vmax.f32 %v1833_v32, 0.0  ;;  %v3642_v15 = vadd.f32 %v3641_v3, %v3097_v35  ;;  %v3099_v29 = vmax.f32 %v2483_v50, 0.0 }
 0x249   :  { %v3381_v34 = vadd.f32 %v3380_v28, %v2838_v42  ;;  %v2840_v41 = vmax.f32 %v1835_v60, 0.0  ;;  %v3679_v39 = vadd.f32 %v3678_v45, %v3098_v22  ;;  %v3100_v18 = vmax.f32 %v2485_v4, 0.0 }
 0x24a   :  { %v3345_v23 = vadd.f32 %v3344_v21, %v2839_v0  ;;  %v3643_v49 = vadd.f32 %v3642_v15, %v3099_v29 }
 0x24b   :  { %v3382_v31 = vadd.f32 %v3381_v34, %v2840_v41  ;;  %v1838_v63 = vpop.f32.mrb[184].mxu0  ;;  %v3680_v12 = vadd.f32 %v3679_v39, %v3100_v18  ;;  %v2488_v11 = vpop.f32.mrb[184].mxu1 }
 0x24c   :  { %v1839_v44 = vadd.f32 %v1838_v63, %v4838_v1  ;;  %v1840_v27 = vpop.f32.mrb[185].mxu0  ;;  %v2489_v36 = vadd.f32 %v2488_v11, %v4838_v1  ;;  %v2490_v57 = vpop.f32.mrb[185].mxu1 }
 0x24d   :  { %v1841_v54 = vadd.f32 %v1840_v27, %v4841_v2  ;;  %v1842_v3 = vpop.f32.mrb[186].mxu0  ;;  %v2491_v28 = vadd.f32 %v2490_v57, %v4841_v2  ;;  %v2492_v58 = vpop.f32.mrb[186].mxu1 }
 0x24e   :  { %v2841_v45 = vmax.f32 %v1839_v44, 0.0  ;;  %v1843_v8 = vadd.f32 %v1842_v3, %v4838_v1  ;;  %v1844_v32 = vpop.f32.mrb[187].mxu0  ;;  %v3101_v62 = vmax.f32 %v2489_v36, 0.0  ;;  %v2493_v35 = vadd.f32 %v2492_v58, %v4838_v1  ;;  %v2494_v50 = vpop.f32.mrb[187].mxu1 }
 0x24f   :  { %v2842_v56 = vmax.f32 %v1841_v54, 0.0  ;;  %v1845_v42 = vadd.f32 %v1844_v32, %v4841_v2  ;;  %v3102_v60 = vmax.f32 %v2491_v28, 0.0  ;;  %v2495_v22 = vadd.f32 %v2494_v50, %v4841_v2 }
 0x250   :  { %v3346_v4 = vadd.f32 %v3345_v23, %v2841_v45  ;;  %v2843_v21 = vmax.f32 %v1843_v8, 0.0  ;;  %v3644_v0 = vadd.f32 %v3643_v49, %v3101_v62  ;;  %v3103_v15 = vmax.f32 %v2493_v35, 0.0 }
 0x251   :  { %v3383_v29 = vadd.f32 %v3382_v31, %v2842_v56  ;;  %v2844_v34 = vmax.f32 %v1845_v42, 0.0  ;;  %v3681_v41 = vadd.f32 %v3680_v12, %v3102_v60  ;;  %v3104_v39 = vmax.f32 %v2495_v22, 0.0 }
 0x252   :  { %v3347_v18 = vadd.f32 %v3346_v4, %v2843_v21  ;;  %v5713_v63 = vadd.f32 %v3644_v0, %v3103_v15 }
 0x253   :  { %v3384_v11 = vadd.f32 %v3383_v29, %v2844_v34  ;;  %v1848_v44 = vpop.f32.mrb[188].mxu0  ;;  %v5715_v27 = vadd.f32 %v3681_v41, %v3104_v39  ;;  %v2498_v36 = vpop.f32.mrb[188].mxu1 }
 0x254   :  { %v1849_v57 = vadd.f32 %v1848_v44, %v4838_v1  ;;  %v1850_v54 = vpop.f32.mrb[189].mxu0  ;;  %v2499_v23 = vadd.f32 %v2498_v36, %v4838_v1  ;;  %v2500_v3 = vpop.f32.mrb[189].mxu1 }
 0x255   :  { %6083 = vst [vmem:[#allocation41_spill] sm:$0xff] %v5715_v27  ;;  %v1851_v49 = vadd.f32 %v1850_v54, %v4841_v2  ;;  %v1852_v31 = vpop.f32.mrb[190].mxu0  ;;  %v2501_v12 = vadd.f32 %v2500_v3, %v4841_v2  ;;  %v2502_v28 = vpop.f32.mrb[190].mxu1 }
 0x256   :  { %v2845_v58 = vmax.f32 %v1849_v57, 0.0  ;;  %v1853_v45 = vadd.f32 %v1852_v31, %v4838_v1  ;;  %v1854_v8 = vpop.f32.mrb[191].mxu0  ;;  %v2504_v32 = vpop.f32.mrb[191].mxu1  ;;  %v3105_v42 = vmax.f32 %v2499_v23, 0.0  ;;  %v2503_v60 = vadd.f32 %v2502_v28, %v4838_v1 }
 0x257   :  { %v2846_v62 = vmax.f32 %v1851_v49, 0.0  ;;  %v1855_v35 = vadd.f32 %v1854_v8, %v4841_v2  ;;  %v3106_v21 = vmax.f32 %v2501_v12, 0.0  ;;  %v2505_v0 = vadd.f32 %v2504_v32, %v4841_v2 }
 0x258   :  { %v3348_v50 = vadd.f32 %v3347_v18, %v2845_v58  ;;  %v2847_v56 = vmax.f32 %v1853_v45, 0.0  ;;  %v3107_v29 = vmax.f32 %v2503_v60, 0.0 }
 0x259   :  { %v3385_v22 = vadd.f32 %v3384_v11, %v2846_v62  ;;  %v2848_v4 = vmax.f32 %v1855_v35, 0.0  ;;  %v3108_v39 = vmax.f32 %v2505_v0, 0.0 }
 0x25a   :  { %v3349_v15 = vadd.f32 %v3348_v50, %v2847_v56  ;;  %v3689_v18 = vadd.f32 %v3107_v29, %v3105_v42 }
 0x25b   :  { %v3386_v34 = vadd.f32 %v3385_v22, %v2848_v4  ;;  %v1858_v41 = vpop.f32.mrb[192].mxu0  ;;  %v2508_v44 = vpop.f32.mrb[192].mxu1  ;;  %v3726_v31 = vadd.f32 %v3108_v39, %v3106_v21 }
 0x25c   :  { %v3350_v36 = vrot.slane %v3349_v15, 4  ;;  %v1859_v57 = vadd.f32 %v1858_v41, %v4838_v1  ;;  %v1860_v54 = vpop.f32.mrb[193].mxu0  ;;  %v2510_v3 = vpop.f32.mrb[193].mxu1  ;;  %v2509_v60 = vadd.f32 %v2508_v44, %v4838_v1 }
 0x25d   :  { %v3387_v23 = vrot.slane %v3386_v34, 4  ;;  %v1861_v49 = vadd.f32 %v1860_v54, %v4841_v2  ;;  %v1862_v11 = vpop.f32.mrb[194].mxu0  ;;  %v2512_v12 = vpop.f32.mrb[194].mxu1  ;;  %v2511_v22 = vadd.f32 %v2510_v3, %v4841_v2 }
 0x25e   :  { %v3351_v28 = vadd.f32 %v3350_v36, %v3349_v15  ;;  %v1863_v58 = vadd.f32 %v1862_v11, %v4838_v1  ;;  %v1864_v45 = vpop.f32.mrb[195].mxu0  ;;  %v2514_v8 = vpop.f32.mrb[195].mxu1  ;;  %v2849_v62 = vmax.f32 %v1859_v57, 0.0  ;;  %v2513_v0 = vadd.f32 %v2512_v12, %v4838_v1 }
 0x25f   :  { %v3388_v32 = vadd.f32 %v3387_v23, %v3386_v34  ;;  %v2850_v35 = vmax.f32 %v1861_v49, 0.0  ;;  %v1865_v50 = vadd.f32 %v1864_v45, %v4841_v2  ;;  %v2515_v15 = vadd.f32 %v2514_v8, %v4841_v2 }
 0x260   :  { %v3352_v56 = vrot.slane %v3351_v28, 2  ;;  %v2851_v42 = vmax.f32 %v1863_v58, 0.0  ;;  %v3109_v39 = vmax.f32 %v2509_v60, 0.0  ;;  %v3110_v34 = vmax.f32 %v2511_v22, 0.0 }
 0x261   :  { %v3389_v4 = vrot.slane %v3388_v32, 2  ;;  %v2852_v21 = vmax.f32 %v1865_v50, 0.0  ;;  %v3111_v23 = vmax.f32 %v2513_v0, 0.0  ;;  %v3112_v49 = vmax.f32 %v2515_v15, 0.0 }
 0x262   :  { %v3353_v29 = vadd.f32 %v3352_v56, %v3351_v28  ;;  %v3393_v41 = vadd.f32 %v2851_v42, %v2849_v62  ;;  %v3690_v45 = vadd.f32 %v3689_v18, %v3109_v39  ;;  %v3727_v50 = vadd.f32 %v3726_v31, %v3110_v34 }
 0x263   :  { %v3390_v36 = vadd.f32 %v3389_v4, %v3388_v32  ;;  %v3430_v57 = vadd.f32 %v2852_v21, %v2850_v35  ;;  %v1868_v54 = vpop.f32.mrb[196].mxu0  ;;  %v2518_v11 = vpop.f32.mrb[196].mxu1 }
 0x264   :  { %v3354_v58 = vrot.slane %v3353_v29, 1  ;;  %v1869_v44 = vadd.f32 %v1868_v54, %v4838_v1  ;;  %v1870_v3 = vpop.f32.mrb[197].mxu0  ;;  %v2520_v27 = vpop.f32.mrb[197].mxu1  ;;  %v2519_v62 = vadd.f32 %v2518_v11, %v4838_v1  ;;  %v3691_v4 = vadd.f32 %v3690_v45, %v3111_v23 }
 0x265   :  { %v3391_v12 = vrot.slane %v3390_v36, 1  ;;  %v1871_v8 = vadd.f32 %v1870_v3, %v4841_v2  ;;  %v1872_v28 = vpop.f32.mrb[198].mxu0  ;;  %v2521_v32 = vadd.f32 %v2520_v27, %v4841_v2  ;;  %v2522_v35 = vpop.f32.mrb[198].mxu1  ;;  %v3728_v15 = vadd.f32 %v3727_v50, %v3112_v49 }
 0x266   :  { %v3355_v56 = vadd.f32 %v3354_v58, %v3353_v29  ;;  %v2853_v42 = vmax.f32 %v1869_v44, 0.0  ;;  %v1873_v60 = vadd.f32 %v1872_v28, %v4838_v1  ;;  %v1874_v22 = vpop.f32.mrb[199].mxu0  ;;  %v2524_v21 = vpop.f32.mrb[199].mxu1  ;;  %v3113_v27 = vmax.f32 %v2519_v62, 0.0 }
 0x267   :  { %v3392_v0 = vadd.f32 %v3391_v12, %v3390_v36  ;;  %v2854_v18 = vmax.f32 %v1871_v8, 0.0  ;;  %v1875_v31 = vadd.f32 %v1874_v22, %v4841_v2  ;;  %v3114_v23 = vmax.f32 %v2521_v32, 0.0 }
 0x268   :  { %v5741_v39 = vsel %vm3781_vm3, %v3355_v56, %v5557_v7  ;;  %v3394_v34 = vadd.f32 %v3393_v41, %v2853_v42  ;;  %v2855_v54 = vmax.f32 %v1873_v60, 0.0  ;;  %v3692_v36 = vadd.f32 %v3691_v4, %v3113_v27 }
 0x269   :  { %v5745_v29 = vsel %vm3781_vm3, %v3392_v0, %v5563_v61  ;;  %v3431_v11 = vadd.f32 %v3430_v57, %v2854_v18  ;;  %v2856_v58 = vmax.f32 %v1875_v31, 0.0  ;;  %v2523_v3 = vadd.f32 %v2522_v35, %v4838_v1 }
 0x26a   :  { %v3395_v44 = vadd.f32 %v3394_v34, %v2855_v54  ;;  %v2525_v49 = vadd.f32 %v2524_v21, %v4841_v2  ;;  %v3729_v7 = vadd.f32 %v3728_v15, %v3114_v23 }
 0x26b   :  { %v3432_v45 = vadd.f32 %v3431_v11, %v2856_v58  ;;  %v1878_v50 = vpop.f32.mrb[200].mxu0  ;;  %v2528_v12 = vpop.f32.mrb[200].mxu1  ;;  %v3115_v28 = vmax.f32 %v2523_v3, 0.0 }
 0x26c   :  { %v1879_v41 = vadd.f32 %v1878_v50, %v4838_v1  ;;  %v1880_v8 = vpop.f32.mrb[201].mxu0  ;;  %v3116_v62 = vmax.f32 %v2525_v49, 0.0  ;;  %v2529_v61 = vadd.f32 %v2528_v12, %v4838_v1  ;;  %v2530_v57 = vpop.f32.mrb[201].mxu1 }
 0x26d   :  { %v1881_v32 = vadd.f32 %v1880_v8, %v4841_v2  ;;  %v1882_v56 = vpop.f32.mrb[202].mxu0  ;;  %v2531_v42 = vadd.f32 %v2530_v57, %v4841_v2  ;;  %v2532_v35 = vpop.f32.mrb[202].mxu1  ;;  %v3693_v21 = vadd.f32 %v3692_v36, %v3115_v28 }
 0x26e   :  { %v2857_v60 = vmax.f32 %v1879_v41, 0.0  ;;  %v1883_v22 = vadd.f32 %v1882_v56, %v4838_v1  ;;  %v1884_v4 = vpop.f32.mrb[203].mxu0  ;;  %v3730_v0 = vadd.f32 %v3729_v7, %v3116_v62  ;;  %v2534_v18 = vpop.f32.mrb[203].mxu1  ;;  %v3117_v34 = vmax.f32 %v2529_v61, 0.0 }
 0x26f   :  { %v2858_v31 = vmax.f32 %v1881_v32, 0.0  ;;  %v1885_v15 = vadd.f32 %v1884_v4, %v4841_v2  ;;  %v3118_v54 = vmax.f32 %v2531_v42, 0.0  ;;  %v2533_v58 = vadd.f32 %v2532_v35, %v4838_v1 }
 0x270   :  { %v3396_v27 = vadd.f32 %v3395_v44, %v2857_v60  ;;  %v2859_v11 = vmax.f32 %v1883_v22, 0.0  ;;  %v2535_v23 = vadd.f32 %v2534_v18, %v4841_v2  ;;  %v3694_v50 = vadd.f32 %v3693_v21, %v3117_v34 }
 0x271   :  { %v3433_v3 = vadd.f32 %v3432_v45, %v2858_v31  ;;  %v2860_v49 = vmax.f32 %v1885_v15, 0.0  ;;  %v3731_v12 = vadd.f32 %v3730_v0, %v3118_v54  ;;  %v3119_v8 = vmax.f32 %v2533_v58, 0.0 }
 0x272   :  { %v3397_v41 = vadd.f32 %v3396_v27, %v2859_v11  ;;  %v3120_v36 = vmax.f32 %v2535_v23, 0.0 }
 0x273   :  { %v3434_v7 = vadd.f32 %v3433_v3, %v2860_v49  ;;  %v1888_v28 = vpop.f32.mrb[204].mxu0  ;;  %v2538_v62 = vpop.f32.mrb[204].mxu1  ;;  %v3695_v32 = vadd.f32 %v3694_v50, %v3119_v8 }
 0x274   :  { %v1889_v57 = vadd.f32 %v1888_v28, %v4838_v1  ;;  %v1890_v61 = vpop.f32.mrb[205].mxu0  ;;  %v3732_v44 = vadd.f32 %v3731_v12, %v3120_v36  ;;  %v2539_v56 = vadd.f32 %v2538_v62, %v4838_v1  ;;  %v2540_v42 = vpop.f32.mrb[205].mxu1 }
 0x275   :  { %v1891_v35 = vadd.f32 %v1890_v61, %v4841_v2  ;;  %v1892_v45 = vpop.f32.mrb[206].mxu0  ;;  %v2541_v60 = vadd.f32 %v2540_v42, %v4841_v2  ;;  %v2542_v22 = vpop.f32.mrb[206].mxu1 }
 0x276   :  { %v2861_v4 = vmax.f32 %v1889_v57, 0.0  ;;  %v1893_v21 = vadd.f32 %v1892_v45, %v4838_v1  ;;  %v1894_v0 = vpop.f32.mrb[207].mxu0  ;;  %v3121_v18 = vmax.f32 %v2539_v56, 0.0  ;;  %v2543_v31 = vadd.f32 %v2542_v22, %v4838_v1  ;;  %v2544_v15 = vpop.f32.mrb[207].mxu1 }
 0x277   :  { %v2862_v34 = vmax.f32 %v1891_v35, 0.0  ;;  %v1895_v54 = vadd.f32 %v1894_v0, %v4841_v2  ;;  %v3122_v27 = vmax.f32 %v2541_v60, 0.0  ;;  %v2545_v11 = vadd.f32 %v2544_v15, %v4841_v2 }
 0x278   :  { %v3398_v58 = vadd.f32 %v3397_v41, %v2861_v4  ;;  %v2863_v23 = vmax.f32 %v1893_v21, 0.0  ;;  %v3696_v3 = vadd.f32 %v3695_v32, %v3121_v18  ;;  %v3123_v49 = vmax.f32 %v2543_v31, 0.0 }
 0x279   :  { %v3435_v50 = vadd.f32 %v3434_v7, %v2862_v34  ;;  %v2864_v12 = vmax.f32 %v1895_v54, 0.0  ;;  %v3733_v8 = vadd.f32 %v3732_v44, %v3122_v27  ;;  %v3124_v36 = vmax.f32 %v2545_v11, 0.0 }
 0x27a   :  { %v3399_v28 = vadd.f32 %v3398_v58, %v2863_v23  ;;  %v3697_v62 = vadd.f32 %v3696_v3, %v3123_v49 }
 0x27b   :  { %v3436_v57 = vadd.f32 %v3435_v50, %v2864_v12  ;;  %v1898_v61 = vpop.f32.mrb[208].mxu0  ;;  %v3734_v56 = vadd.f32 %v3733_v8, %v3124_v36  ;;  %v2548_v42 = vpop.f32.mrb[208].mxu1 }
 0x27c   :  { %v1899_v35 = vadd.f32 %v1898_v61, %v4838_v1  ;;  %v1900_v45 = vpop.f32.mrb[209].mxu0  ;;  %v2549_v60 = vadd.f32 %v2548_v42, %v4838_v1  ;;  %v2550_v22 = vpop.f32.mrb[209].mxu1 }
 0x27d   :  { %v1901_v41 = vadd.f32 %v1900_v45, %v4841_v2  ;;  %v1902_v32 = vpop.f32.mrb[210].mxu0  ;;  %v2551_v7 = vadd.f32 %v2550_v22, %v4841_v2  ;;  %v2552_v4 = vpop.f32.mrb[210].mxu1 }
 0x27e   :  { %v2865_v44 = vmax.f32 %v1899_v35, 0.0  ;;  %v1903_v21 = vadd.f32 %v1902_v32, %v4838_v1  ;;  %v1904_v0 = vpop.f32.mrb[211].mxu0  ;;  %v3125_v18 = vmax.f32 %v2549_v60, 0.0  ;;  %v2553_v31 = vadd.f32 %v2552_v4, %v4838_v1  ;;  %v2554_v15 = vpop.f32.mrb[211].mxu1 }
 0x27f   :  { %v2866_v34 = vmax.f32 %v1901_v41, 0.0  ;;  %v1905_v54 = vadd.f32 %v1904_v0, %v4841_v2  ;;  %v3126_v27 = vmax.f32 %v2551_v7, 0.0  ;;  %v2555_v11 = vadd.f32 %v2554_v15, %v4841_v2 }
 0x280   :  { %v3400_v58 = vadd.f32 %v3399_v28, %v2865_v44  ;;  %v2867_v23 = vmax.f32 %v1903_v21, 0.0  ;;  %v3698_v3 = vadd.f32 %v3697_v62, %v3125_v18  ;;  %v3127_v49 = vmax.f32 %v2553_v31, 0.0 }
 0x281   :  { %v3437_v50 = vadd.f32 %v3436_v57, %v2866_v34  ;;  %v2868_v12 = vmax.f32 %v1905_v54, 0.0  ;;  %v3735_v8 = vadd.f32 %v3734_v56, %v3126_v27  ;;  %v3128_v36 = vmax.f32 %v2555_v11, 0.0 }
 0x282   :  { %v3401_v61 = vadd.f32 %v3400_v58, %v2867_v23  ;;  %v3699_v42 = vadd.f32 %v3698_v3, %v3127_v49 }
 0x283   :  { %v3438_v35 = vadd.f32 %v3437_v50, %v2868_v12  ;;  %v1908_v45 = vpop.f32.mrb[212].mxu0  ;;  %v3736_v60 = vadd.f32 %v3735_v8, %v3128_v36  ;;  %v2558_v22 = vpop.f32.mrb[212].mxu1 }
 0x284   :  { %v1909_v41 = vadd.f32 %v1908_v45, %v4838_v1  ;;  %v1910_v32 = vpop.f32.mrb[213].mxu0  ;;  %v2559_v7 = vadd.f32 %v2558_v22, %v4838_v1  ;;  %v2560_v4 = vpop.f32.mrb[213].mxu1 }
 0x285   :  { %v1911_v28 = vadd.f32 %v1910_v32, %v4841_v2  ;;  %v1912_v62 = vpop.f32.mrb[214].mxu0  ;;  %v2561_v57 = vadd.f32 %v2560_v4, %v4841_v2  ;;  %v2562_v44 = vpop.f32.mrb[214].mxu1  ;;  %v4488_v32 = vld [vmem:[%s6037_s3 + $0x38] sm:$0xff]  }
 0x286   :  { %v2869_v56 = vmax.f32 %v1909_v41, 0.0  ;;  %v1913_v21 = vadd.f32 %v1912_v62, %v4838_v1  ;;  %v1914_v0 = vpop.f32.mrb[215].mxu0  ;;  %v3129_v18 = vmax.f32 %v2559_v7, 0.0  ;;  %v2563_v31 = vadd.f32 %v2562_v44, %v4838_v1  ;;  %v2564_v15 = vpop.f32.mrb[215].mxu1  ;;  %v4487_v41 = vld [vmem:[%s6037_s3 + $0x78] sm:$0xff]  }
 0x287   :  { %v2870_v34 = vmax.f32 %v1911_v28, 0.0  ;;  %v1915_v54 = vadd.f32 %v1914_v0, %v4841_v2  ;;  %v3130_v27 = vmax.f32 %v2561_v57, 0.0  ;;  %v2565_v11 = vadd.f32 %v2564_v15, %v4841_v2  ;;  %4333 = vmatprep.subr.bf16.mxu1 %v4487_v41 }
 0x288   :  { %v3402_v58 = vadd.f32 %v3401_v61, %v2869_v56  ;;  %v2871_v23 = vmax.f32 %v1913_v21, 0.0  ;;  %v3700_v3 = vadd.f32 %v3699_v42, %v3129_v18  ;;  %v3131_v49 = vmax.f32 %v2563_v31, 0.0  ;;  %4334 = vmatpush3.bf16.msra.mxu1 %v4488_v32 }
 0x289   :  { %v3439_v50 = vadd.f32 %v3438_v35, %v2870_v34  ;;  %v2872_v12 = vmax.f32 %v1915_v54, 0.0  ;;  %v3737_v8 = vadd.f32 %v3736_v60, %v3130_v27  ;;  %v3132_v36 = vmax.f32 %v2565_v11, 0.0 }
 0x28a   :  { %v3403_v45 = vadd.f32 %v3402_v58, %v2871_v23  ;;  %v3701_v22 = vadd.f32 %v3700_v3, %v3131_v49 }
 0x28b   :  { %v3440_v7 = vadd.f32 %v3439_v50, %v2872_v12  ;;  %v1918_v4 = vpop.f32.mrb[216].mxu0  ;;  %v3738_v61 = vadd.f32 %v3737_v8, %v3132_v36  ;;  %v2568_v28 = vpop.f32.mrb[216].mxu1 }
 0x28c   :  { %v1919_v42 = vadd.f32 %v1918_v4, %v4838_v1  ;;  %v1920_v35 = vpop.f32.mrb[217].mxu0  ;;  %v2569_v60 = vadd.f32 %v2568_v28, %v4838_v1  ;;  %v2570_v62 = vpop.f32.mrb[217].mxu1 }
 0x28d   :  { %v1921_v57 = vadd.f32 %v1920_v35, %v4841_v2  ;;  %v1922_v44 = vpop.f32.mrb[218].mxu0  ;;  %v2571_v56 = vadd.f32 %v2570_v62, %v4841_v2  ;;  %v2572_v21 = vpop.f32.mrb[218].mxu1 }
 0x28e   :  { %v2873_v0 = vmax.f32 %v1919_v42, 0.0  ;;  %v1923_v18 = vadd.f32 %v1922_v44, %v4838_v1  ;;  %v1924_v31 = vpop.f32.mrb[219].mxu0  ;;  %v3133_v15 = vmax.f32 %v2569_v60, 0.0  ;;  %v2573_v34 = vadd.f32 %v2572_v21, %v4838_v1  ;;  %v2574_v54 = vpop.f32.mrb[219].mxu1 }
 0x28f   :  { %v2874_v27 = vmax.f32 %v1921_v57, 0.0  ;;  %v1925_v11 = vadd.f32 %v1924_v31, %v4841_v2  ;;  %v3134_v58 = vmax.f32 %v2571_v56, 0.0  ;;  %v2575_v23 = vadd.f32 %v2574_v54, %v4841_v2 }
 0x290   :  { %v3404_v3 = vadd.f32 %v3403_v45, %v2873_v0  ;;  %v2875_v49 = vmax.f32 %v1923_v18, 0.0  ;;  %v3702_v50 = vadd.f32 %v3701_v22, %v3133_v15  ;;  %v3135_v12 = vmax.f32 %v2573_v34, 0.0 }
 0x291   :  { %v3441_v8 = vadd.f32 %v3440_v7, %v2874_v27  ;;  %v2876_v36 = vmax.f32 %v1925_v11, 0.0  ;;  %v3739_v41 = vadd.f32 %v3738_v61, %v3134_v58  ;;  %v3136_v32 = vmax.f32 %v2575_v23, 0.0 }
 0x292   :  { %v3405_v4 = vadd.f32 %v3404_v3, %v2875_v49  ;;  %v3703_v28 = vadd.f32 %v3702_v50, %v3135_v12 }
 0x293   :  { %v3442_v42 = vadd.f32 %v3441_v8, %v2876_v36  ;;  %v1928_v35 = vpop.f32.mrb[220].mxu0  ;;  %v3740_v60 = vadd.f32 %v3739_v41, %v3136_v32  ;;  %v2578_v62 = vpop.f32.mrb[220].mxu1 }
 0x294   :  { %v1929_v57 = vadd.f32 %v1928_v35, %v4838_v1  ;;  %v1930_v44 = vpop.f32.mrb[221].mxu0  ;;  %v2579_v56 = vadd.f32 %v2578_v62, %v4838_v1  ;;  %v2580_v21 = vpop.f32.mrb[221].mxu1 }
 0x295   :  { %v1931_v45 = vadd.f32 %v1930_v44, %v4841_v2  ;;  %v1932_v22 = vpop.f32.mrb[222].mxu0  ;;  %v2581_v7 = vadd.f32 %v2580_v21, %v4841_v2  ;;  %v2582_v0 = vpop.f32.mrb[222].mxu1 }
 0x296   :  { %v2877_v61 = vmax.f32 %v1929_v57, 0.0  ;;  %v1933_v18 = vadd.f32 %v1932_v22, %v4838_v1  ;;  %v1934_v31 = vpop.f32.mrb[223].mxu0  ;;  %v3137_v15 = vmax.f32 %v2579_v56, 0.0  ;;  %v2583_v34 = vadd.f32 %v2582_v0, %v4838_v1  ;;  %v2584_v54 = vpop.f32.mrb[223].mxu1 }
 0x297   :  { %v2878_v27 = vmax.f32 %v1931_v45, 0.0  ;;  %v1935_v11 = vadd.f32 %v1934_v31, %v4841_v2  ;;  %v3138_v58 = vmax.f32 %v2581_v7, 0.0  ;;  %v2585_v23 = vadd.f32 %v2584_v54, %v4841_v2 }
 0x298   :  { %v3406_v3 = vadd.f32 %v3405_v4, %v2877_v61  ;;  %v2879_v49 = vmax.f32 %v1933_v18, 0.0  ;;  %v3704_v50 = vadd.f32 %v3703_v28, %v3137_v15  ;;  %v3139_v12 = vmax.f32 %v2583_v34, 0.0 }
 0x299   :  { %v3443_v8 = vadd.f32 %v3442_v42, %v2878_v27  ;;  %v2880_v36 = vmax.f32 %v1935_v11, 0.0  ;;  %v3741_v41 = vadd.f32 %v3740_v60, %v3138_v58  ;;  %v3140_v32 = vmax.f32 %v2585_v23, 0.0 }
 0x29a   :  { %v3407_v35 = vadd.f32 %v3406_v3, %v2879_v49  ;;  %v3705_v62 = vadd.f32 %v3704_v50, %v3139_v12 }
 0x29b   :  { %v3444_v57 = vadd.f32 %v3443_v8, %v2880_v36  ;;  %v1938_v44 = vpop.f32.mrb[224].mxu0  ;;  %v3742_v56 = vadd.f32 %v3741_v41, %v3140_v32  ;;  %v2588_v21 = vpop.f32.mrb[224].mxu1 }
 0x29c   :  { %v1939_v45 = vadd.f32 %v1938_v44, %v4838_v1  ;;  %v1940_v22 = vpop.f32.mrb[225].mxu0  ;;  %v2589_v7 = vadd.f32 %v2588_v21, %v4838_v1  ;;  %v2590_v0 = vpop.f32.mrb[225].mxu1 }
 0x29d   :  { %v1941_v4 = vadd.f32 %v1940_v22, %v4841_v2  ;;  %v1942_v28 = vpop.f32.mrb[226].mxu0  ;;  %v2591_v42 = vadd.f32 %v2590_v0, %v4841_v2  ;;  %v2592_v61 = vpop.f32.mrb[226].mxu1 }
 0x29e   :  { %v2881_v60 = vmax.f32 %v1939_v45, 0.0  ;;  %v1943_v18 = vadd.f32 %v1942_v28, %v4838_v1  ;;  %v1944_v31 = vpop.f32.mrb[227].mxu0  ;;  %v3141_v15 = vmax.f32 %v2589_v7, 0.0  ;;  %v2593_v34 = vadd.f32 %v2592_v61, %v4838_v1  ;;  %v2594_v54 = vpop.f32.mrb[227].mxu1 }
 0x29f   :  { %v2882_v27 = vmax.f32 %v1941_v4, 0.0  ;;  %v1945_v11 = vadd.f32 %v1944_v31, %v4841_v2  ;;  %v3142_v58 = vmax.f32 %v2591_v42, 0.0  ;;  %v2595_v23 = vadd.f32 %v2594_v54, %v4841_v2 }
 0x2a0   :  { %v3408_v3 = vadd.f32 %v3407_v35, %v2881_v60  ;;  %v2883_v49 = vmax.f32 %v1943_v18, 0.0  ;;  %v3706_v50 = vadd.f32 %v3705_v62, %v3141_v15  ;;  %v3143_v12 = vmax.f32 %v2593_v34, 0.0 }
 0x2a1   :  { %v3445_v8 = vadd.f32 %v3444_v57, %v2882_v27  ;;  %v2884_v36 = vmax.f32 %v1945_v11, 0.0  ;;  %v3743_v41 = vadd.f32 %v3742_v56, %v3142_v58  ;;  %v3144_v32 = vmax.f32 %v2595_v23, 0.0 }
 0x2a2   :  { %v3409_v44 = vadd.f32 %v3408_v3, %v2883_v49  ;;  %v3707_v21 = vadd.f32 %v3706_v50, %v3143_v12 }
 0x2a3   :  { %v3446_v45 = vadd.f32 %v3445_v8, %v2884_v36  ;;  %v1948_v22 = vpop.f32.mrb[228].mxu0  ;;  %v3744_v7 = vadd.f32 %v3743_v41, %v3144_v32  ;;  %v2598_v0 = vpop.f32.mrb[228].mxu1 }
 0x2a4   :  { %v1949_v4 = vadd.f32 %v1948_v22, %v4838_v1  ;;  %v1950_v28 = vpop.f32.mrb[229].mxu0  ;;  %v2599_v42 = vadd.f32 %v2598_v0, %v4838_v1  ;;  %v2600_v61 = vpop.f32.mrb[229].mxu1 }
 0x2a5   :  { %v1951_v35 = vadd.f32 %v1950_v28, %v4841_v2  ;;  %v1952_v62 = vpop.f32.mrb[230].mxu0  ;;  %v2601_v57 = vadd.f32 %v2600_v61, %v4841_v2  ;;  %v2602_v60 = vpop.f32.mrb[230].mxu1 }
 0x2a6   :  { %v2885_v56 = vmax.f32 %v1949_v4, 0.0  ;;  %v1953_v18 = vadd.f32 %v1952_v62, %v4838_v1  ;;  %v1954_v31 = vpop.f32.mrb[231].mxu0  ;;  %v3145_v15 = vmax.f32 %v2599_v42, 0.0  ;;  %v2603_v34 = vadd.f32 %v2602_v60, %v4838_v1  ;;  %v2604_v54 = vpop.f32.mrb[231].mxu1 }
 0x2a7   :  { %v2886_v27 = vmax.f32 %v1951_v35, 0.0  ;;  %v1955_v11 = vadd.f32 %v1954_v31, %v4841_v2  ;;  %v3146_v58 = vmax.f32 %v2601_v57, 0.0  ;;  %v2605_v23 = vadd.f32 %v2604_v54, %v4841_v2 }
 0x2a8   :  { %v3410_v3 = vadd.f32 %v3409_v44, %v2885_v56  ;;  %v2887_v49 = vmax.f32 %v1953_v18, 0.0  ;;  %v3708_v50 = vadd.f32 %v3707_v21, %v3145_v15  ;;  %v3147_v12 = vmax.f32 %v2603_v34, 0.0 }
 0x2a9   :  { %v3447_v8 = vadd.f32 %v3446_v45, %v2886_v27  ;;  %v2888_v36 = vmax.f32 %v1955_v11, 0.0  ;;  %v3745_v41 = vadd.f32 %v3744_v7, %v3146_v58  ;;  %v3148_v32 = vmax.f32 %v2605_v23, 0.0 }
 0x2aa   :  { %v3411_v22 = vadd.f32 %v3410_v3, %v2887_v49  ;;  %v3709_v0 = vadd.f32 %v3708_v50, %v3147_v12 }
 0x2ab   :  { %v3448_v4 = vadd.f32 %v3447_v8, %v2888_v36  ;;  %v1958_v28 = vpop.f32.mrb[232].mxu0  ;;  %v3746_v42 = vadd.f32 %v3745_v41, %v3148_v32  ;;  %v2608_v61 = vpop.f32.mrb[232].mxu1 }
 0x2ac   :  { %v1959_v35 = vadd.f32 %v1958_v28, %v4838_v1  ;;  %v1960_v62 = vpop.f32.mrb[233].mxu0  ;;  %v2609_v57 = vadd.f32 %v2608_v61, %v4838_v1  ;;  %v2610_v60 = vpop.f32.mrb[233].mxu1 }
 0x2ad   :  { %v1961_v44 = vadd.f32 %v1960_v62, %v4841_v2  ;;  %v1962_v21 = vpop.f32.mrb[234].mxu0  ;;  %v2611_v45 = vadd.f32 %v2610_v60, %v4841_v2  ;;  %v2612_v56 = vpop.f32.mrb[234].mxu1 }
 0x2ae   :  { %v2889_v7 = vmax.f32 %v1959_v35, 0.0  ;;  %v1963_v18 = vadd.f32 %v1962_v21, %v4838_v1  ;;  %v1964_v31 = vpop.f32.mrb[235].mxu0  ;;  %v3149_v15 = vmax.f32 %v2609_v57, 0.0  ;;  %v2613_v34 = vadd.f32 %v2612_v56, %v4838_v1  ;;  %v2614_v54 = vpop.f32.mrb[235].mxu1 }
 0x2af   :  { %v2890_v27 = vmax.f32 %v1961_v44, 0.0  ;;  %v1965_v11 = vadd.f32 %v1964_v31, %v4841_v2  ;;  %v3150_v58 = vmax.f32 %v2611_v45, 0.0  ;;  %v2615_v23 = vadd.f32 %v2614_v54, %v4841_v2 }
 0x2b0   :  { %v3412_v3 = vadd.f32 %v3411_v22, %v2889_v7  ;;  %v2891_v49 = vmax.f32 %v1963_v18, 0.0  ;;  %v3710_v50 = vadd.f32 %v3709_v0, %v3149_v15  ;;  %v3151_v12 = vmax.f32 %v2613_v34, 0.0 }
 0x2b1   :  { %v3449_v8 = vadd.f32 %v3448_v4, %v2890_v27  ;;  %v2892_v36 = vmax.f32 %v1965_v11, 0.0  ;;  %v3747_v41 = vadd.f32 %v3746_v42, %v3150_v58  ;;  %v3152_v32 = vmax.f32 %v2615_v23, 0.0 }
 0x2b2   :  { %v3413_v28 = vadd.f32 %v3412_v3, %v2891_v49  ;;  %v3711_v61 = vadd.f32 %v3710_v50, %v3151_v12 }
 0x2b3   :  { %v3450_v35 = vadd.f32 %v3449_v8, %v2892_v36  ;;  %v1968_v62 = vpop.f32.mrb[236].mxu0  ;;  %v3748_v57 = vadd.f32 %v3747_v41, %v3152_v32  ;;  %v2618_v60 = vpop.f32.mrb[236].mxu1 }
 0x2b4   :  { %v1969_v44 = vadd.f32 %v1968_v62, %v4838_v1  ;;  %v1970_v21 = vpop.f32.mrb[237].mxu0  ;;  %v2619_v45 = vadd.f32 %v2618_v60, %v4838_v1  ;;  %v2620_v56 = vpop.f32.mrb[237].mxu1 }
 0x2b5   :  { %v1971_v22 = vadd.f32 %v1970_v21, %v4841_v2  ;;  %v1972_v0 = vpop.f32.mrb[238].mxu0  ;;  %v2621_v4 = vadd.f32 %v2620_v56, %v4841_v2  ;;  %v2622_v7 = vpop.f32.mrb[238].mxu1 }
 0x2b6   :  { %v2893_v42 = vmax.f32 %v1969_v44, 0.0  ;;  %v1973_v18 = vadd.f32 %v1972_v0, %v4838_v1  ;;  %v1974_v31 = vpop.f32.mrb[239].mxu0  ;;  %v3153_v15 = vmax.f32 %v2619_v45, 0.0  ;;  %v2623_v34 = vadd.f32 %v2622_v7, %v4838_v1  ;;  %v2624_v54 = vpop.f32.mrb[239].mxu1 }
 0x2b7   :  { %v2894_v27 = vmax.f32 %v1971_v22, 0.0  ;;  %v1975_v11 = vadd.f32 %v1974_v31, %v4841_v2  ;;  %v3154_v58 = vmax.f32 %v2621_v4, 0.0  ;;  %v2625_v23 = vadd.f32 %v2624_v54, %v4841_v2 }
 0x2b8   :  { %v3414_v3 = vadd.f32 %v3413_v28, %v2893_v42  ;;  %v2895_v49 = vmax.f32 %v1973_v18, 0.0  ;;  %v3712_v50 = vadd.f32 %v3711_v61, %v3153_v15  ;;  %v3155_v12 = vmax.f32 %v2623_v34, 0.0 }
 0x2b9   :  { %v3451_v8 = vadd.f32 %v3450_v35, %v2894_v27  ;;  %v2896_v36 = vmax.f32 %v1975_v11, 0.0  ;;  %v3749_v41 = vadd.f32 %v3748_v57, %v3154_v58  ;;  %v3156_v32 = vmax.f32 %v2625_v23, 0.0 }
 0x2ba   :  { %v3415_v62 = vadd.f32 %v3414_v3, %v2895_v49  ;;  %v3713_v60 = vadd.f32 %v3712_v50, %v3155_v12 }
 0x2bb   :  { %v3452_v44 = vadd.f32 %v3451_v8, %v2896_v36  ;;  %v1978_v21 = vpop.f32.mrb[240].mxu0  ;;  %v3750_v45 = vadd.f32 %v3749_v41, %v3156_v32  ;;  %v2628_v56 = vpop.f32.mrb[240].mxu1 }
 0x2bc   :  { %v1979_v22 = vadd.f32 %v1978_v21, %v4838_v1  ;;  %v1980_v0 = vpop.f32.mrb[241].mxu0  ;;  %v2629_v4 = vadd.f32 %v2628_v56, %v4838_v1  ;;  %v2630_v7 = vpop.f32.mrb[241].mxu1 }
 0x2bd   :  { %v1981_v28 = vadd.f32 %v1980_v0, %v4841_v2  ;;  %v1982_v61 = vpop.f32.mrb[242].mxu0  ;;  %v2631_v35 = vadd.f32 %v2630_v7, %v4841_v2  ;;  %v2632_v42 = vpop.f32.mrb[242].mxu1 }
 0x2be   :  { %v2897_v57 = vmax.f32 %v1979_v22, 0.0  ;;  %v1983_v18 = vadd.f32 %v1982_v61, %v4838_v1  ;;  %v1984_v31 = vpop.f32.mrb[243].mxu0  ;;  %v3157_v15 = vmax.f32 %v2629_v4, 0.0  ;;  %v2633_v34 = vadd.f32 %v2632_v42, %v4838_v1  ;;  %v2634_v54 = vpop.f32.mrb[243].mxu1 }
 0x2bf   :  { %v2898_v27 = vmax.f32 %v1981_v28, 0.0  ;;  %v1985_v11 = vadd.f32 %v1984_v31, %v4841_v2  ;;  %v3158_v58 = vmax.f32 %v2631_v35, 0.0  ;;  %v2635_v23 = vadd.f32 %v2634_v54, %v4841_v2 }
 0x2c0   :  { %v3416_v3 = vadd.f32 %v3415_v62, %v2897_v57  ;;  %v2899_v49 = vmax.f32 %v1983_v18, 0.0  ;;  %v3714_v50 = vadd.f32 %v3713_v60, %v3157_v15  ;;  %v3159_v12 = vmax.f32 %v2633_v34, 0.0 }
 0x2c1   :  { %v3453_v8 = vadd.f32 %v3452_v44, %v2898_v27  ;;  %v2900_v36 = vmax.f32 %v1985_v11, 0.0  ;;  %v3751_v41 = vadd.f32 %v3750_v45, %v3158_v58  ;;  %v3160_v32 = vmax.f32 %v2635_v23, 0.0 }
 0x2c2   :  { %v3417_v21 = vadd.f32 %v3416_v3, %v2899_v49  ;;  %v3715_v56 = vadd.f32 %v3714_v50, %v3159_v12 }
 0x2c3   :  { %v3454_v22 = vadd.f32 %v3453_v8, %v2900_v36  ;;  %v1988_v0 = vpop.f32.mrb[244].mxu0  ;;  %v3752_v4 = vadd.f32 %v3751_v41, %v3160_v32  ;;  %v2638_v7 = vpop.f32.mrb[244].mxu1 }
 0x2c4   :  { %v1989_v28 = vadd.f32 %v1988_v0, %v4838_v1  ;;  %v1990_v61 = vpop.f32.mrb[245].mxu0  ;;  %v2639_v35 = vadd.f32 %v2638_v7, %v4838_v1  ;;  %v2640_v42 = vpop.f32.mrb[245].mxu1 }
 0x2c5   :  { %v1991_v62 = vadd.f32 %v1990_v61, %v4841_v2  ;;  %v1992_v60 = vpop.f32.mrb[246].mxu0  ;;  %v2641_v44 = vadd.f32 %v2640_v42, %v4841_v2  ;;  %v2642_v57 = vpop.f32.mrb[246].mxu1 }
 0x2c6   :  { %v2901_v45 = vmax.f32 %v1989_v28, 0.0  ;;  %v1993_v18 = vadd.f32 %v1992_v60, %v4838_v1  ;;  %v1994_v31 = vpop.f32.mrb[247].mxu0  ;;  %v3161_v15 = vmax.f32 %v2639_v35, 0.0  ;;  %v2643_v34 = vadd.f32 %v2642_v57, %v4838_v1  ;;  %v2644_v54 = vpop.f32.mrb[247].mxu1 }
 0x2c7   :  { %v2902_v27 = vmax.f32 %v1991_v62, 0.0  ;;  %v1995_v11 = vadd.f32 %v1994_v31, %v4841_v2  ;;  %v3162_v58 = vmax.f32 %v2641_v44, 0.0  ;;  %v2645_v23 = vadd.f32 %v2644_v54, %v4841_v2 }
 0x2c8   :  { %v3418_v3 = vadd.f32 %v3417_v21, %v2901_v45  ;;  %v2903_v49 = vmax.f32 %v1993_v18, 0.0  ;;  %v3716_v50 = vadd.f32 %v3715_v56, %v3161_v15  ;;  %v3163_v12 = vmax.f32 %v2643_v34, 0.0 }
 0x2c9   :  { %v3455_v8 = vadd.f32 %v3454_v22, %v2902_v27  ;;  %v2904_v36 = vmax.f32 %v1995_v11, 0.0  ;;  %v3753_v41 = vadd.f32 %v3752_v4, %v3162_v58  ;;  %v3164_v32 = vmax.f32 %v2645_v23, 0.0 }
 0x2ca   :  { %v3419_v0 = vadd.f32 %v3418_v3, %v2903_v49  ;;  %v3717_v7 = vadd.f32 %v3716_v50, %v3163_v12 }
 0x2cb   :  { %v3456_v28 = vadd.f32 %v3455_v8, %v2904_v36  ;;  %v1998_v61 = vpop.f32.mrb[248].mxu0  ;;  %v3754_v35 = vadd.f32 %v3753_v41, %v3164_v32  ;;  %v2648_v42 = vpop.f32.mrb[248].mxu1 }
 0x2cc   :  { %v1999_v62 = vadd.f32 %v1998_v61, %v4838_v1  ;;  %v2000_v60 = vpop.f32.mrb[249].mxu0  ;;  %v2649_v44 = vadd.f32 %v2648_v42, %v4838_v1  ;;  %v2650_v57 = vpop.f32.mrb[249].mxu1 }
 0x2cd   :  { %v2001_v21 = vadd.f32 %v2000_v60, %v4841_v2  ;;  %v2002_v56 = vpop.f32.mrb[250].mxu0  ;;  %v2651_v22 = vadd.f32 %v2650_v57, %v4841_v2  ;;  %v2652_v45 = vpop.f32.mrb[250].mxu1 }
 0x2ce   :  { %v2905_v4 = vmax.f32 %v1999_v62, 0.0  ;;  %v2003_v18 = vadd.f32 %v2002_v56, %v4838_v1  ;;  %v2004_v31 = vpop.f32.mrb[251].mxu0  ;;  %v3165_v15 = vmax.f32 %v2649_v44, 0.0  ;;  %v2653_v34 = vadd.f32 %v2652_v45, %v4838_v1  ;;  %v2654_v54 = vpop.f32.mrb[251].mxu1 }
 0x2cf   :  { %v2906_v27 = vmax.f32 %v2001_v21, 0.0  ;;  %v2005_v11 = vadd.f32 %v2004_v31, %v4841_v2  ;;  %v3166_v58 = vmax.f32 %v2651_v22, 0.0  ;;  %v2655_v23 = vadd.f32 %v2654_v54, %v4841_v2 }
 0x2d0   :  { %v3420_v3 = vadd.f32 %v3419_v0, %v2905_v4  ;;  %v2907_v49 = vmax.f32 %v2003_v18, 0.0  ;;  %v3718_v50 = vadd.f32 %v3717_v7, %v3165_v15  ;;  %v3167_v12 = vmax.f32 %v2653_v34, 0.0 }
 0x2d1   :  { %v3457_v8 = vadd.f32 %v3456_v28, %v2906_v27  ;;  %v2908_v36 = vmax.f32 %v2005_v11, 0.0  ;;  %v3755_v41 = vadd.f32 %v3754_v35, %v3166_v58  ;;  %v3168_v32 = vmax.f32 %v2655_v23, 0.0 }
 0x2d2   :  { %v3421_v61 = vadd.f32 %v3420_v3, %v2907_v49  ;;  %v5859_v42 = vadd.f32 %v3718_v50, %v3167_v12  ;;  %v2029_v3 = vadd.f32 %v4845_v5, %v4838_v1  ;;  %v2035_v5 = vadd.f32 %v4860_v16, %v4841_v2 }
 0x2d3   :  { %v3458_v62 = vadd.f32 %v3457_v8, %v2908_v36  ;;  %v2008_v60 = vpop.f32.mrb[252].mxu0  ;;  %v5861_v44 = vadd.f32 %v3755_v41, %v3168_v32  ;;  %v2031_v8 = vadd.f32 %v4854_v10, %v4841_v2 }
 0x2d4   :  { %v2009_v57 = vadd.f32 %v2008_v60, %v4838_v1  ;;  %v2010_v21 = vpop.f32.mrb[253].mxu0  ;;  %v2920_v16 = vmax.f32 %v2035_v5, 0.0  ;;  %v2059_v5 = vadd.f32 %v4911_v9, %v4838_v1  ;;  %v2069_v9 = vadd.f32 %v4933_v38, %v4838_v1 }
 0x2d5   :  { %v2011_v56 = vadd.f32 %v2010_v21, %v4841_v2  ;;  %v2012_v0 = vpop.f32.mrb[254].mxu0  ;;  %v2079_v38 = vadd.f32 %v4961_v6, %v4838_v1  ;;  %v2089_v6 = vadd.f32 %v4983_v40, %v4838_v1 }
 0x2d6   :  { %v2909_v22 = vmax.f32 %v2009_v57, 0.0  ;;  %v2013_v7 = vadd.f32 %v2012_v0, %v4838_v1  ;;  %v2014_v28 = vpop.f32.mrb[255].mxu0  ;;  %v2917_v0 = vmax.f32 %v2029_v3, 0.0  ;;  %v2049_v3 = vadd.f32 %v4889_v47, %v4838_v1 }
 0x2d7   :  { %v2910_v45 = vmax.f32 %v2011_v56, 0.0  ;;  %v2015_v35 = vadd.f32 %v2014_v28, %v4841_v2  ;;  %v2918_v28 = vmax.f32 %v2031_v8, 0.0  ;;  %v2055_v47 = vadd.f32 %v4904_v59, %v4841_v2 }
 0x2d8   :  { %v3422_v4 = vadd.f32 %v3421_v61, %v2909_v22  ;;  %v2911_v18 = vmax.f32 %v2013_v7, 0.0  ;;  %v2033_v61 = vadd.f32 %v4857_v13, %v4838_v1 }
 0x2d9   :  { %v3459_v31 = vadd.f32 %v3458_v62, %v2910_v45  ;;  %v2912_v15 = vmax.f32 %v2015_v35, 0.0  ;;  %v2039_v45 = vadd.f32 %v4867_v25, %v4838_v1 }
 0x2da   :  { %v3423_v34 = vadd.f32 %v3422_v4, %v2911_v18  ;;  %v2919_v13 = vmax.f32 %v2033_v61, 0.0  ;;  %v2041_v18 = vadd.f32 %v4876_v30, %v4841_v2 }
 0x2db   :  { %v3460_v54 = vadd.f32 %v3459_v31, %v2912_v15  ;;  %v2018_v27 = vpop.f32.mrb[0].mxu0 }
 0x2dc   :  { %v3424_v11 = vrot.slane %v3423_v34, 4  ;;  %v2019_v58 = vadd.f32 %v2018_v27, %v4838_v1  ;;  %v2020_v23 = vpop.f32.mrb[1].mxu0 }
 0x2dd   :  { %v3461_v49 = vrot.slane %v3460_v54, 4  ;;  %v2021_v50 = vadd.f32 %v2020_v23, %v4841_v2  ;;  %v2022_v12 = vpop.f32.mrb[2].mxu0  ;;  %v2921_v23 = vmax.f32 %v2039_v45, 0.0 }
 0x2de   :  { %v3425_v36 = vadd.f32 %v3424_v11, %v3423_v34  ;;  %v2023_v41 = vadd.f32 %v2022_v12, %v4838_v1  ;;  %v2024_v32 = vpop.f32.mrb[3].mxu0  ;;  %v2913_v21 = vmax.f32 %v2019_v58, 0.0  ;;  %v2043_v34 = vadd.f32 %v4879_v33, %v4838_v1 }
 0x2df   :  { %v3462_v62 = vadd.f32 %v3461_v49, %v3460_v54  ;;  %v2025_v60 = vadd.f32 %v2024_v32, %v4841_v2  ;;  %v2914_v7 = vmax.f32 %v2021_v50, 0.0  ;;  %v2045_v11 = vadd.f32 %v4882_v37, %v4841_v2 }
 0x2e0   :  { %v3426_v57 = vrot.slane %v3425_v36, 2  ;;  %v2915_v56 = vmax.f32 %v2023_v41, 0.0  ;;  %v2922_v50 = vmax.f32 %v2041_v18, 0.0  ;;  %v2051_v12 = vadd.f32 %v4898_v52, %v4841_v2 }
 0x2e1   :  { %v3463_v22 = vrot.slane %v3462_v62, 2  ;;  %v2916_v10 = vmax.f32 %v2025_v60, 0.0  ;;  %v2053_v41 = vadd.f32 %v4901_v55, %v4838_v1  ;;  %v2924_v61 = vmax.f32 %v2045_v11, 0.0 }
 0x2e2   :  { %v3427_v35 = vadd.f32 %v3426_v57, %v3425_v36  ;;  %v3467_v4 = vadd.f32 %v2915_v56, %v2913_v21  ;;  %v2923_v36 = vmax.f32 %v2043_v34, 0.0  ;;  %v2925_v60 = vmax.f32 %v2049_v3, 0.0 }
 0x2e3   :  { %v3464_v31 = vadd.f32 %v3463_v22, %v3462_v62  ;;  %v3504_v15 = vadd.f32 %v2916_v10, %v2914_v7  ;;  %v2926_v55 = vmax.f32 %v2051_v12, 0.0  ;;  %v2927_v56 = vmax.f32 %v2053_v41, 0.0 }
 0x2e4   :  { %v3428_v54 = vrot.slane %v3427_v35, 1  ;;  %v3468_v27 = vadd.f32 %v3467_v4, %v2917_v0  ;;  %v2063_v0 = vadd.f32 %v4923_v20, %v4838_v1  ;;  %v2928_v22 = vmax.f32 %v2055_v47, 0.0 }
 0x2e5   :  { %v3465_v58 = vrot.slane %v3464_v31, 1  ;;  %v3505_v25 = vadd.f32 %v3504_v15, %v2918_v28  ;;  %v2929_v10 = vmax.f32 %v2059_v5, 0.0  ;;  %v2073_v20 = vadd.f32 %v4945_v46, %v4838_v1 }
 0x2e6   :  { %v3429_v49 = vadd.f32 %v3428_v54, %v3427_v35  ;;  %v3469_v30 = vadd.f32 %v3468_v27, %v2919_v13  ;;  %v2931_v4 = vmax.f32 %v2063_v0, 0.0  ;;  %v2933_v15 = vmax.f32 %v2069_v9, 0.0  ;;  %v6090_v9 = vld [vmem:[#allocation12_spill] sm:$0xff] }
 0x2e7   :  { %v3466_v8 = vadd.f32 %v3465_v58, %v3464_v31  ;;  %v3506_v33 = vadd.f32 %v3505_v25, %v2920_v16  ;;  %v2935_v27 = vmax.f32 %v2073_v20, 0.0  ;;  %v2083_v46 = vadd.f32 %v4973_v19, %v4838_v1 }
 0x2e8   :  { %v5895_v37 = vsel %vm3783_vm4, %v3429_v49, %v5741_v39  ;;  %v3470_v32 = vadd.f32 %v3469_v30, %v2921_v23  ;;  %v2061_v39 = vadd.f32 %v4920_v17, %v4841_v2  ;;  %v2071_v17 = vadd.f32 %v4942_v43, %v4841_v2 }
 0x2e9   :  { %v5901_v62 = vsel %vm3783_vm4, %v3466_v8, %v5745_v29  ;;  %v3507_v52 = vadd.f32 %v3506_v33, %v2922_v50  ;;  %v2065_v29 = vadd.f32 %v4926_v24, %v4841_v2  ;;  %v2075_v24 = vadd.f32 %v4948_v51, %v4841_v2  ;;  %v6084_v33 = vld [vmem:[#allocation6_spill] sm:$0xff] }
 0x2ea   :  { %v3471_v57 = vadd.f32 %v3470_v32, %v2923_v36  ;;  %v2930_v45 = vmax.f32 %v2061_v39, 0.0  ;;  %v2934_v34 = vmax.f32 %v2071_v17, 0.0  ;;  %v2081_v43 = vadd.f32 %v4970_v14, %v4841_v2  ;;  %v6085_v32 = vld [vmem:[#allocation7_spill] sm:$0xff] }
 0x2eb   :  { %v3508_v21 = vadd.f32 %v3507_v52, %v2924_v61  ;;  %v2932_v18 = vmax.f32 %v2065_v29, 0.0  ;;  %v2936_v58 = vmax.f32 %v2075_v24, 0.0  ;;  %v2085_v51 = vadd.f32 %v4976_v26, %v4841_v2  ;;  %v6086_v52 = vld [vmem:[#allocation8_spill] sm:$0xff] }
 0x2ec   :  { %v3472_v59 = vadd.f32 %v3471_v57, %v2925_v60  ;;  %v2937_v23 = vmax.f32 %v2079_v38, 0.0  ;;  %v2938_v49 = vmax.f32 %v2081_v43, 0.0  ;;  %v2091_v14 = vadd.f32 %v4992_v48, %v4841_v2  ;;  %v6087_v57 = vld [vmem:[#allocation9_spill] sm:$0xff]  ;;  %v6093_v38 = vld [vmem:[#allocation15_spill] sm:$0xff] }
 0x2ed   :  { %v3509_v7 = vadd.f32 %v3508_v21, %v2926_v55  ;;  %v2939_v50 = vmax.f32 %v2083_v46, 0.0  ;;  %v2093_v19 = vadd.f32 %v4995_v53, %v4838_v1  ;;  %v2940_v8 = vmax.f32 %v2085_v51, 0.0  ;;  %v6088_v21 = vld [vmem:[#allocation10_spill] sm:$0xff] }
 0x2ee   :  { %v3473_v28 = vadd.f32 %v3472_v59, %v2927_v56  ;;  %v2095_v26 = vadd.f32 %v6084_v33, %v4841_v2  ;;  %v2941_v41 = vmax.f32 %v2089_v6, 0.0  ;;  %v2099_v40 = vadd.f32 %v6085_v32, %v4838_v1  ;;  %v6096_v6 = vld [vmem:[#allocation18_spill] sm:$0xff] }
 0x2ef   :  { %v3510_v35 = vadd.f32 %v3509_v7, %v2928_v22  ;;  %v2942_v47 = vmax.f32 %v2091_v14, 0.0  ;;  %v2101_v48 = vadd.f32 %v6086_v52, %v4841_v2  ;;  %v2943_v5 = vmax.f32 %v2093_v19, 0.0  ;;  %v6089_v22 = vld [vmem:[#allocation11_spill] sm:$0xff] }
 0x2f0   :  { %v3474_v13 = vadd.f32 %v3473_v28, %v2929_v10  ;;  %v2103_v53 = vadd.f32 %v6087_v57, %v4838_v1  ;;  %v2944_v39 = vmax.f32 %v2095_v26, 0.0  ;;  %v2105_v56 = vadd.f32 %v6088_v21, %v4841_v2 }
 0x2f1   :  { %v3511_v31 = vadd.f32 %v3510_v35, %v2930_v45  ;;  %v2945_v59 = vmax.f32 %v2099_v40, 0.0  ;;  %v2109_v29 = vadd.f32 %v6089_v22, %v4838_v1  ;;  %v2946_v10 = vmax.f32 %v2101_v48, 0.0  ;;  %v6091_v35 = vld [vmem:[#allocation13_spill] sm:$0xff] }
 0x2f2   :  { %v3475_v16 = vadd.f32 %v3474_v13, %v2931_v4  ;;  %v2111_v28 = vadd.f32 %v6090_v9, %v4841_v2  ;;  %v2947_v17 = vmax.f32 %v2103_v53, 0.0  ;;  %v2113_v4 = vadd.f32 %v6091_v35, %v4838_v1 }
 0x2f3   :  { %v3512_v54 = vadd.f32 %v3511_v31, %v2932_v18  ;;  %v2948_v13 = vmax.f32 %v2105_v56, 0.0  ;;  %v6092_v18 = vld [vmem:[#allocation14_spill] sm:$0xff] }
 0x2f4   :  { %v3476_v11 = vadd.f32 %v3475_v16, %v2933_v15  ;;  %v2115_v24 = vadd.f32 %v6092_v18, %v4841_v2  ;;  %v2949_v15 = vmax.f32 %v2109_v29, 0.0  ;;  %v2119_v16 = vadd.f32 %v6093_v38, %v4838_v1 }
 0x2f5   :  { %v3513_v25 = vadd.f32 %v3512_v54, %v2934_v34  ;;  %v2950_v43 = vmax.f32 %v2111_v28, 0.0  ;;  %v6094_v54 = vld [vmem:[#allocation16_spill] sm:$0xff] }
 0x2f6   :  { %v3477_v3 = vadd.f32 %v3476_v11, %v2935_v27  ;;  %v2121_v27 = vadd.f32 %v6094_v54, %v4841_v2  ;;  %v2951_v11 = vmax.f32 %v2113_v4, 0.0  ;;  %v2953_v14 = vmax.f32 %v2119_v16, 0.0 }
 0x2f7   :  { %v3514_v30 = vadd.f32 %v3513_v25, %v2936_v58  ;;  %v6095_v58 = vld [vmem:[#allocation17_spill] sm:$0xff] }
 0x2f8   :  { %v3478_v12 = vadd.f32 %v3477_v3, %v2937_v23  ;;  %v2123_v51 = vadd.f32 %v6095_v58, %v4838_v1  ;;  %v2952_v23 = vmax.f32 %v2115_v24, 0.0  ;;  %v2125_v3 = vadd.f32 %v6096_v6, %v4841_v2 }
 0x2f9   :  { %v3515_v36 = vadd.f32 %v3514_v30, %v2938_v49  ;;  %v6097_v30 = vld [vmem:[#allocation19_spill] sm:$0xff] }
 0x2fa   :  { %v3479_v61 = vadd.f32 %v3478_v12, %v2939_v50  ;;  %v2129_v50 = vadd.f32 %v6097_v30, %v4838_v1  ;;  %v2954_v12 = vmax.f32 %v2121_v27, 0.0  ;;  %v6109_v27 = vld [vmem:[#allocation31_spill] sm:$0xff] }
 0x2fb   :  { %v3516_v60 = vadd.f32 %v3515_v36, %v2940_v8  ;;  %v6098_v8 = vld [vmem:[#allocation20_spill] sm:$0xff]  ;;  %v2955_v36 = vmax.f32 %v2123_v51, 0.0 }
 0x2fc   :  { %v3480_v55 = vadd.f32 %v3479_v61, %v2941_v41  ;;  %v2131_v33 = vadd.f32 %v6098_v8, %v4841_v2  ;;  %v6099_v41 = vld [vmem:[#allocation21_spill] sm:$0xff]  ;;  %v2956_v61 = vmax.f32 %v2125_v3, 0.0  ;;  %v6110_v51 = vld [vmem:[#allocation32_spill] sm:$0xff] }
 0x2fd   :  { %v3517_v0 = vadd.f32 %v3516_v60, %v2942_v47  ;;  %v2133_v32 = vadd.f32 %v6099_v41, %v4838_v1  ;;  %v6100_v47 = vld [vmem:[#allocation22_spill] sm:$0xff]  ;;  %v2957_v60 = vmax.f32 %v2129_v50, 0.0 }
 0x2fe   :  { %v3481_v7 = vadd.f32 %v3480_v55, %v2943_v5  ;;  %v2135_v52 = vadd.f32 %v6100_v47, %v4841_v2  ;;  %v6101_v5 = vld [vmem:[#allocation23_spill] sm:$0xff]  ;;  %v2958_v55 = vmax.f32 %v2131_v33, 0.0 }
 0x2ff   :  { %v3518_v45 = vadd.f32 %v3517_v0, %v2944_v39  ;;  %v2139_v57 = vadd.f32 %v6101_v5, %v4838_v1  ;;  %v6102_v39 = vld [vmem:[#allocation24_spill] sm:$0xff]  ;;  %v2959_v0 = vmax.f32 %v2133_v32, 0.0  ;;  %v6113_v32 = vld [vmem:[#allocation35_spill] sm:$0xff] }
 0x300   :  { %v3482_v20 = vadd.f32 %v3481_v7, %v2945_v59  ;;  %v2141_v21 = vadd.f32 %v6102_v39, %v4841_v2  ;;  %v6103_v59 = vld [vmem:[#allocation25_spill] sm:$0xff]  ;;  %v2960_v7 = vmax.f32 %v2135_v52, 0.0  ;;  %v6114_v52 = vld [vmem:[#allocation36_spill] sm:$0xff] }
 0x301   :  { %v3519_v31 = vadd.f32 %v3518_v45, %v2946_v10  ;;  %v2143_v22 = vadd.f32 %v6103_v59, %v4838_v1  ;;  %v6104_v10 = vld [vmem:[#allocation26_spill] sm:$0xff]  ;;  %v2961_v45 = vmax.f32 %v2139_v57, 0.0  ;;  %v6117_v39 = vld [vmem:[#allocation40_spill] sm:$0xff] }
 0x302   :  { %v3483_v34 = vadd.f32 %v3482_v20, %v2947_v17  ;;  %v2145_v9 = vadd.f32 %v6104_v10, %v4841_v2  ;;  %v6105_v17 = vld [vmem:[#allocation27_spill] sm:$0xff]  ;;  %v2962_v20 = vmax.f32 %v2141_v21, 0.0  ;;  %v3609_v21 = vrot.slane %v6117_v39, 4  ;;  %v6118_v59 = vld [vmem:[#allocation38_spill] sm:$0xff] }
 0x303   :  { %v3520_v46 = vadd.f32 %v3519_v31, %v2948_v13  ;;  %v2149_v35 = vadd.f32 %v6105_v17, %v4838_v1  ;;  %v6106_v13 = vld [vmem:[#allocation28_spill] sm:$0xff]  ;;  %v2963_v31 = vmax.f32 %v2143_v22, 0.0  ;;  %v2175_v22 = vadd.f32 %v6118_v59, %v4841_v2 }
 0x304   :  { %v3484_v25 = vadd.f32 %v3483_v34, %v2949_v15  ;;  %v2151_v18 = vadd.f32 %v6106_v13, %v4841_v2  ;;  %v6107_v15 = vld [vmem:[#allocation29_spill] sm:$0xff]  ;;  %v2964_v34 = vmax.f32 %v2145_v9, 0.0  ;;  %v3720_v10 = vrot.slane %v5859_v42, 4 }
 0x305   :  { %v3521_v49 = vadd.f32 %v3520_v46, %v2950_v43  ;;  %v2153_v38 = vadd.f32 %v6107_v15, %v4838_v1  ;;  %v6108_v43 = vld [vmem:[#allocation30_spill] sm:$0xff]  ;;  %v2159_v46 = vadd.f32 %v6109_v27, %v4838_v1  ;;  %v2965_v58 = vmax.f32 %v2149_v35, 0.0 }
 0x306   :  { %v3485_v19 = vadd.f32 %v3484_v25, %v2951_v11  ;;  %v2155_v54 = vadd.f32 %v6108_v43, %v4841_v2  ;;  %v2161_v25 = vadd.f32 %v6110_v51, %v4841_v2  ;;  %v3610_v13 = vadd.f32 %v3609_v21, %v6117_v39 }
 0x307   :  { %v3522_v26 = vadd.f32 %v3521_v49, %v2952_v23  ;;  %v6111_v23 = vld [vmem:[#allocation33_spill] sm:$0xff]  ;;  %v2966_v49 = vmax.f32 %v2151_v18, 0.0  ;;  %v2969_v33 = vmax.f32 %v2159_v46, 0.0  ;;  %v3721_v15 = vadd.f32 %v3720_v10, %v5859_v42 }
 0x308   :  { %v3486_v40 = vadd.f32 %v3485_v19, %v2953_v14  ;;  %v2163_v6 = vadd.f32 %v6111_v23, %v4838_v1  ;;  %v6112_v14 = vld [vmem:[#allocation34_spill] sm:$0xff]  ;;  %v2967_v19 = vmax.f32 %v2153_v38, 0.0  ;;  %v2968_v8 = vmax.f32 %v2155_v54, 0.0 }
 0x309   :  { %v3523_v48 = vadd.f32 %v3522_v26, %v2954_v12  ;;  %v2165_v30 = vadd.f32 %v6112_v14, %v4841_v2  ;;  %v3611_v27 = vrot.slane %v3610_v13, 2  ;;  %v3722_v51 = vrot.slane %v3721_v15, 2 }
 0x30a   :  { %v3487_v53 = vadd.f32 %v3486_v40, %v2955_v36  ;;  %v2970_v36 = vmax.f32 %v2161_v25, 0.0  ;;  %v2971_v41 = vmax.f32 %v2163_v6, 0.0  ;;  %v2169_v40 = vadd.f32 %v6113_v32, %v4838_v1 }
 0x30b   :  { %v3524_v56 = vadd.f32 %v3523_v48, %v2956_v61  ;;  %v2972_v47 = vmax.f32 %v2165_v30, 0.0  ;;  %v2171_v48 = vadd.f32 %v6114_v52, %v4841_v2  ;;  %v2976_v2 = vmax.f32 %v2175_v22, 0.0 }
 0x30c   :  { %v3488_v29 = vadd.f32 %v3487_v53, %v2957_v60  ;;  %v6115_v60 = vld [vmem:[#allocation39_spill] sm:$0xff]  ;;  %v6116_v53 = vld [vmem:[#allocation37_spill] sm:$0xff] }
 0x30d   :  { %v3525_v28 = vadd.f32 %v3524_v56, %v2958_v55  ;;  %v3572_v5 = vrot.slane %v6115_v60, 4  ;;  %v2173_v55 = vadd.f32 %v6116_v53, %v4838_v1  ;;  %v3646_v56 = vrot.slane %v5713_v63, 4 }
 0x30e   :  { %v3489_v4 = vadd.f32 %v3488_v29, %v2959_v0  ;;  %v6119_v29 = vld [vmem:[#allocation41_spill] sm:$0xff]  ;;  %v2974_v35 = vmax.f32 %v2171_v48, 0.0 }
 0x30f   :  { %v3526_v24 = vadd.f32 %v3525_v28, %v2960_v7  ;;  %v3683_v7 = vrot.slane %v6119_v29, 4  ;;  %v2973_v28 = vmax.f32 %v2169_v40, 0.0  ;;  %v3573_v1 = vadd.f32 %v3572_v5, %v6115_v60 }
 0x310   :  { %v3490_v16 = vadd.f32 %v3489_v4, %v2961_v45  ;;  %v3757_v45 = vrot.slane %v5861_v44, 4  ;;  %v3647_v18 = vadd.f32 %v3646_v56, %v5713_v63 }
 0x311   :  { %v3527_v11 = vadd.f32 %v3526_v24, %v2962_v20  ;;  %v2975_v20 = vmax.f32 %v2173_v55, 0.0  ;;  %v3574_v43 = vrot.slane %v3573_v1, 2 }
 0x312   :  { %v3491_v3 = vadd.f32 %v3490_v16, %v2963_v31  ;;  %v3684_v31 = vadd.f32 %v3683_v7, %v6119_v29  ;;  %v3758_v16 = vadd.f32 %v3757_v45, %v5861_v44  ;;  %v3648_v46 = vrot.slane %v3647_v18, 2 }
 0x313   :  { %v3528_v50 = vadd.f32 %v3527_v11, %v2964_v34  ;;  %v3575_v6 = vadd.f32 %v3574_v43, %v3573_v1 }
 0x314   :  { %v3492_v12 = vadd.f32 %v3491_v3, %v2965_v58  ;;  %v3685_v58 = vrot.slane %v3684_v31, 2  ;;  %v3759_v23 = vrot.slane %v3758_v16, 2  ;;  %v3649_v14 = vadd.f32 %v3648_v46, %v3647_v18 }
 0x315   :  { %v3529_v26 = vadd.f32 %v3528_v50, %v2966_v49  ;;  %v3612_v49 = vadd.f32 %v3611_v27, %v3610_v13  ;;  %v3723_v50 = vadd.f32 %v3722_v51, %v3721_v15 }
 0x316   :  { %v3493_v61 = vadd.f32 %v3492_v12, %v2967_v19  ;;  %v3686_v42 = vadd.f32 %v3685_v58, %v3684_v31  ;;  %v3760_v44 = vadd.f32 %v3759_v23, %v3758_v16 }
 0x317   :  { %v3530_v57 = vadd.f32 %v3529_v26, %v2968_v8  ;;  %v3576_v8 = vrot.slane %v3575_v6, 1  ;;  %v3613_v26 = vrot.slane %v3612_v49, 1  ;;  %v3724_v40 = vrot.slane %v3723_v50, 1 }
 0x318   :  { %v3494_v0 = vadd.f32 %v3493_v61, %v2969_v33  ;;  %v3687_v32 = vrot.slane %v3686_v42, 1 }
 0x319   :  { %v3531_v9 = vadd.f32 %v3530_v57, %v2970_v36  ;;  %v3650_v36 = vrot.slane %v3649_v14, 1  ;;  %v3577_v48 = vadd.f32 %v3576_v8, %v3575_v6  ;;  %v3614_v5 = vadd.f32 %v3613_v26, %v3612_v49  ;;  %v4317_v6 = vld [vmem:[%s6039_s5] ss:$0 sm:$0xff] }
 0x31a   :  { %v3495_v17 = vadd.f32 %v3494_v0, %v2971_v41  ;;  %v3688_v55 = vadd.f32 %v3687_v32, %v3686_v42  ;;  %v3725_v39 = vadd.f32 %v3724_v40, %v3723_v50 }
 0x31b   :  { %v3532_v4 = vadd.f32 %v3531_v9, %v2972_v47  ;;  %v3761_v47 = vrot.slane %v3760_v44, 1  ;;  %v3651_v57 = vadd.f32 %v3650_v36, %v3649_v14  ;;  %v4318_v14 = vld [vmem:[%s6040_s6] ss:$0 sm:$0xff] }
 0x31c   :  { %v3496_v24 = vadd.f32 %v3495_v17, %v2973_v28 }
 0x31d   :  { %v3533_v38 = vadd.f32 %v3532_v4, %v2974_v35  ;;  %v3762_v0 = vadd.f32 %v3761_v47, %v3760_v44 }
 0x31e   :  { %v3497_v34 = vadd.f32 %v3496_v24, %v2975_v20 }
 0x31f   :  { %v3534_v54 = vadd.f32 %v3533_v38, %v2976_v2 }
 0x320   :  { %v3498_v11 = vrot.slane %v3497_v34, 4 }
 0x321   :  { %v3535_v25 = vrot.slane %v3534_v54, 4 }
 0x322   :  { %v3499_v63 = vadd.f32 %v3498_v11, %v3497_v34 }
 0x323   :  { %v3536_v3 = vadd.f32 %v3535_v25, %v3534_v54 }
 0x324   :  { %v3500_v30 = vrot.slane %v3499_v63, 2 }
 0x325   :  { %v3537_v19 = vrot.slane %v3536_v3, 2 }
 0x326   :  { %v3501_v12 = vadd.f32 %v3500_v30, %v3499_v63 }
 0x327   :  { %v3538_v33 = vadd.f32 %v3537_v19, %v3536_v3 }
 0x328   :  { %v3502_v41 = vrot.slane %v3501_v12, 1 }
 0x329   :  { %v3539_v61 = vrot.slane %v3538_v33, 1 }
 0x32a   :  { %v3503_v52 = vadd.f32 %v3502_v41, %v3501_v12 }
 0x32b   :  { %v3540_v60 = vadd.f32 %v3539_v61, %v3538_v33 }
 0x32c   :  { %v3786_v53 = vsel %vm3785_vm5, %v3503_v52, %v5895_v37  ;;  %v4300_v37 = vld [vmem:[%s6038_s4] ss:$0 sm:$0xff] }
 0x32d   :  { %v3788_v21 = vsel %vm3787_vm6, %v3577_v48, %v3786_v53  ;;  %v3796_v56 = vsel %vm3785_vm5, %v3540_v60, %v5901_v62 }
 0x32e   :  { %v3790_v59 = vsel %vm3789_vm7, %v3651_v57, %v3788_v21  ;;  %v3797_v22 = vsel %vm3787_vm6, %v3614_v5, %v3796_v56 }
 0x32f   :  { %v3792_v29 = vsel %vm3791_vm8, %v3725_v39, %v3790_v59  ;;  %v3798_v7 = vsel %vm3789_vm7, %v3688_v55, %v3797_v22 }
 0x330   :  { %v3799_v10 = vsel %vm3791_vm8, %v3762_v0, %v3798_v7  ;;  %v3811_v9 = vmul.f32 0.00390625, %v3792_v29 }
 0x331   :  { %v3812_v28 = vmul.f32 0.00390625, %v3799_v10 }
 0x332   :  { %v3813_v17 = vpack.c.bf16 %v3811_v9, %v3811_v9 }
 0x333   :  { %v3814_v45 = vpack.c.bf16 %v3812_v28, %v3812_v28 }
 0x335   :  { %3982 = vmatprep.mubr.bf16.mxu1 %v3814_v45 }
 0x336   :  { %3983 = vmatmul.mubr.bf16.vlgmr.msra.gmra.mrb[252].mxu1 %v3813_v17 }
 0x409   :  { %v4335_v35 = vpop.f32.mrb[252].mxu1 }
 0x40a   :  { %v4336_v1 = vpop.f32.mrb[253].mxu1 }
 0x40b   :  { %v4337_v4 = vadd.f32 %v4336_v1, %v4335_v35  ;;  %v4338_v62 = vpop.f32.mrb[254].mxu1 }
 0x40c   :  { %v4339_v20 = vpop.f32.mrb[255].mxu1 }
 0x40d   :  { %v3985_v13 = vadd.f32 %v4337_v4, %v4300_v37 }
 0x40f   :  { %v3990_v18 = vmax.f32 %v3985_v13, 0.0 }
 0x411   :  { %v3991_v24 = vrot.slane %v3990_v18, 4 }
 0x413   :  { %v3992_v2 = vadd.f32 %v3991_v24, %v3990_v18 }
 0x415   :  { %v3993_v31 = vrot.slane %v3992_v2, 2 }
 0x417   :  { %v3994_v15 = vadd.f32 %v3993_v31, %v3992_v2 }
 0x419   :  { %v3995_v38 = vrot.slane %v3994_v15, 1 }
 0x41b   :  { %v3996_v16 = vadd.f32 %v3995_v38, %v3994_v15 }
 0x41d   :  { %v3998_v34 = vmul.f32 0.125, %v3996_v16 }
 0x41f   :  { %v3999_v43 = vsub.f32 %v3990_v18, %v3998_v34 }
 0x421   :  { %v4000_v54 = vmul.f32 %v3999_v43, %v3999_v43  ;;  %v4017_v3 = vmul.f32 %v4317_v6, %v3999_v43 }
 0x423   :  { %v4001_v27 = vrot.slane %v4000_v54, 4 }
 0x425   :  { %v4002_v46 = vadd.f32 %v4001_v27, %v4000_v54 }
 0x427   :  { %v4003_v11 = vrot.slane %v4002_v46, 2 }
 0x429   :  { %v4004_v58 = vadd.f32 %v4003_v11, %v4002_v46 }
 0x42b   :  { %v4005_v51 = vrot.slane %v4004_v58, 1 }
 0x42d   :  { %v4006_v25 = vadd.f32 %v4005_v51, %v4004_v58 }
 0x42f   :  { %v4007_v23 = vmul.f32 0.125, %v4006_v25 }
 0x431   :  { %v4008_v63 = vadd.f32 1e-05, %v4007_v23 }
 0x433   :  { %4489 = vrsqrt.f32 %v4008_v63 }
 0x43d   :  { %v4490_v49 = vpop.eup %4489 }
 0x43e   :  { %v4018_v30 = vmul.f32 %v4490_v49, %v4017_v3 }
 0x440   :  { %v4026_v42 = vadd.f32 %v4318_v14, %v4018_v30 }
 0x442   :  { %4027 = vst [vmem:[#allocation3] sm:$0xff] %v4026_v42 }
 0x443   :  { %4502 = shalt.err (!%p4499_p4)
}
 0x444   :  { %s4503_s27 = scalar_lea.hbm %s6041_s7, 128 }
 0x445   :  { %p4504_p5 = scmp.ne.s32.totalorder %s6041_s7, %s4503_s27  ;;  %p4507_p6 = scmp.lt.u32.totalorder %s4503_s27, %s6041_s7 }
 0x447   :  { %p4509_p7 = pnand %p4507_p6, %p4504_p5 }
 0x449   :  { %4512 = shalt.err (!%p4509_p7)
}
 0x44a   :  { %4037 = dma.vmem_to_hbm [thread:$0]  %s4035_s24, 128, %s6041_s7, [#allocation4]  }
 0x44b   :  { %4513 = dma.done.wait [#allocation4], 128  }
 0x44c   :  { %4514 = vsyncadd [#allocation4], 4294967168 }
 0x44d   :  { %4041 = vsyncpa [#allocation4], 1 }

</bundles_post_ra>
